<compile_context>
chip_gen: v5e
topology: v5e:2x2
jax: 0.10.0
libtpu: 0.0.40
codegen_flags: <defaults>
</compile_context>

<pallas_src>
import functools

import jax
import jax.numpy as jnp
from jax.experimental import pallas as pl
from jax.experimental.pallas import tpu as pltpu


def _round_up(x, m):
    return (x + m - 1) // m * m


# ----------------------------------------------------------------------------
# Kernel 1: dilated 3x3 conv (stride 1, "same") + fused BN partial statistics.
# One grid step = one batch element ("parallel" axis -> v7x megacore).
# ----------------------------------------------------------------------------
def _atrous_conv_stats_kernel(x_ref, w_ref, o_ref, sum_ref, sq_ref,
                              xpad_ref, zacc_ref, *, rate, left_pad):
    _, H, W, Cin = x_ref.shape
    Hp, Wpad, _ = xpad_ref.shape
    C3 = zacc_ref.shape[-1]
    Cout = C3 // 3
    r, L = rate, left_pad
    dt = xpad_ref.dtype

    # Border-only zero padding (no full-scratch memset; every grid step owns
    # its own image so no program_id gating).
    xpad_ref[:r] = jnp.zeros((r, Wpad, Cin), dt)                       # top rows
    xpad_ref[r + H:] = jnp.zeros((Hp - r - H, Wpad, Cin), dt)          # bottom rows
    xpad_ref[r:r + H, :L] = jnp.zeros((H, L, Cin), dt)                 # left cols
    xpad_ref[r:r + H, L + W:] = jnp.zeros((H, Wpad - L - W, Cin), dt)  # right cols
    # Interior copy at a sublane-aligned column offset (L % 8 == 0).
    xpad_ref[r:r + H, L:L + W] = x_ref[0]

    # 3 fused matmuls (one per kh) instead of 9 per-tap matmuls.  LHS is a
    # zero-copy leading-dim slice of the padded scratch reshaped to
    # (H*Wpad, Cin) (free: Wpad is a multiple of 16); RHS is (Cin, 3*Cout)
    # with the three kw taps concatenated along the output dim.  bf16 MXU
    # operands, f32 accumulation in a VMEM scratch (3 RMW passes, not 9).
    for kh in range(3):
        rows = xpad_ref[kh * r: kh * r + H].reshape(H * Wpad, Cin)
        z = jnp.dot(rows, w_ref[kh], preferred_element_type=jnp.float32)
        if kh == 0:
            zacc_ref[...] = z.reshape(H, Wpad, C3)
        else:
            zacc_ref[...] += z.reshape(H, Wpad, C3)

    # Epilogue: combine the 3 kw slabs (shifted along W), fused per-channel BN
    # partials, and a lane-dense (1, H, W*Cout) store.  All f32 on the VPU.
    z3 = zacc_ref[...]
    y = None
    for kw in range(3):
        slab = z3[:, :, kw * Cout:(kw + 1) * Cout]
        s = L - r + kw * r
        contrib = slab[:, s:s + W, :]   # TODO(synk): pltpu.roll + aligned slice
        y = contrib if y is None else y + contrib

    sum_ref[...] = jnp.sum(y, axis=(0, 1), keepdims=True)        # (1, 1, Cout)
    sq_ref[...] = jnp.sum(y * y, axis=(0, 1), keepdims=True)     # (1, 1, Cout)
    o_ref[...] = y.reshape(1, H, W * Cout)                       # lane-dense


def atrous_conv_bn_stats(x_nhwc_bf16, w_fused_bf16, rate):
    N, H, W, Cin = x_nhwc_bf16.shape
    C3 = w_fused_bf16.shape[-1]
    Cout = C3 // 3
    r = rate
    L = _round_up(r, 8)                     # aligned left pad for interior copy
    Hp = H + 2 * r
    Wpad = _round_up(L + W + r, 16)         # mult. of 16 -> free bf16 reshapes

    kernel = functools.partial(_atrous_conv_stats_kernel, rate=r, left_pad=L)
    return pl.pallas_call(
        kernel,
        out_shape=(
            jax.ShapeDtypeStruct((N, H, W * Cout), jnp.float32),  # conv out (flat)
            jax.ShapeDtypeStruct((N, 1, Cout), jnp.float32),      # sum partials
            jax.ShapeDtypeStruct((N, 1, Cout), jnp.float32),      # sumsq partials
        ),
        grid_spec=pltpu.PrefetchScalarGridSpec(
            num_scalar_prefetch=0,
            grid=(N,),
            in_specs=[
                pl.BlockSpec((1, H, W, Cin), lambda n: (n, 0, 0, 0)),
                pl.BlockSpec((3, Cin, C3), lambda n: (0, 0, 0)),
            ],
            out_specs=[
                pl.BlockSpec((1, H, W * Cout), lambda n: (n, 0, 0)),
                pl.BlockSpec((1, 1, Cout), lambda n: (n, 0, 0)),
                pl.BlockSpec((1, 1, Cout), lambda n: (n, 0, 0)),
            ],
            scratch_shapes=[
                pltpu.VMEM((Hp, Wpad, Cin), jnp.bfloat16),   # padded activations
                pltpu.VMEM((H, Wpad, C3), jnp.float32),      # f32 kh-accumulator
            ],
        ),
        compiler_params=pltpu.CompilerParams(
            dimension_semantics=("parallel",),
            # <= ~75% of v7x's 64 MiB physical VMEM; raise toward ~100 MiB on
            # v5e/v6e if bigger activation tiles help.
            vmem_limit_bytes=48 * 1024 * 1024,
        ),
    )(x_nhwc_bf16, w_fused_bf16)


# ----------------------------------------------------------------------------
# Kernel 2: BN normalize (scale/shift only — stats already fused into conv).
# Operates on the lane-dense flat (N*H, W*Cout) view with large blocks.
# ----------------------------------------------------------------------------
def _bn_apply_kernel(y_ref, s_ref, b_ref, o_ref):
    o_ref[...] = y_ref[...] * s_ref[...] + b_ref[...]


def bn_apply_flat(y2d, scale_row, shift_row):
    R, WC = y2d.shape
    # Largest row tile that keeps a block <= ~4 MiB (amortize per-step
    # overhead); for demo sizes a single block covers the whole tensor.
    target = 4 * 1024 * 1024
    RT = R
    if R * WC * 4 > target:
        cap = max(8, target // (WC * 4))
        best = None
        for d in range(8, cap + 1, 8):      # keep (8,128)-compatible tiles
            if R % d == 0:
                best = d
        RT = best if best is not None else R
    return pl.pallas_call(
        _bn_apply_kernel,
        out_shape=jax.ShapeDtypeStruct((R, WC), jnp.float32),
        grid_spec=pltpu.PrefetchScalarGridSpec(
            num_scalar_prefetch=0,
            grid=(R // RT,),
            in_specs=[
                pl.BlockSpec((RT, WC), lambda i: (i, 0)),
                pl.BlockSpec((1, WC), lambda i: (0, 0)),
                pl.BlockSpec((1, WC), lambda i: (0, 0)),
            ],
            out_specs=pl.BlockSpec((RT, WC), lambda i: (i, 0)),
        ),
        compiler_params=pltpu.CompilerParams(
            dimension_semantics=("parallel",),
            vmem_limit_bytes=48 * 1024 * 1024,
        ),
    )(y2d, scale_row, shift_row)


# ----------------------------------------------------------------------------
# Full module forward: NCHW in, NCHW out (matches the PyTorch interface).
# ----------------------------------------------------------------------------
def astrous_forward(x_nchw, w_oihw, bias, gamma, beta, rate, eps=1e-5):
    N, Cin, H, W = x_nchw.shape
    Cout = w_oihw.shape[0]

    # Boundary glue: NCHW -> NHWC (+ bf16 cast for the MXU); OIHW -> fused
    # (kh, Cin, 3*Cout) with the three kw taps along the output dim.
    x_nhwc = jnp.transpose(x_nchw, (0, 2, 3, 1)).astype(jnp.bfloat16)
    w_fused = jnp.transpose(w_oihw, (2, 1, 3, 0)).reshape(3, Cin, 3 * Cout)
    w_fused = w_fused.astype(jnp.bfloat16)

    # Conv bias NOT applied: exactly cancelled by training-mode BN mean
    # subtraction (would be required again for eval-mode running stats).
    del bias

    y_flat, psum, psq = atrous_conv_bn_stats(x_nhwc, w_fused, rate)

    # Tiny O(Cout) per-channel scalar math to finish the BN statistics.
    count = N * H * W
    mean = jnp.sum(psum, axis=0).reshape(Cout) / count
    ex2 = jnp.sum(psq, axis=0).reshape(Cout) / count
    var = jnp.maximum(ex2 - mean * mean, 0.0)     # biased var, clamped >= 0
    scale = gamma * jax.lax.rsqrt(var + eps)
    shift = beta - mean * scale

    # Lane-dense normalize on the flat (N*H, W*Cout) view (free reshape of the
    # contiguous HBM array).  NOTE: jnp.tile(scale, W) assumes the kernel-1
    # output lane order is w*Cout + c — keep the two in sync.
    y2d = y_flat.reshape(N * H, W * Cout)
    out2d = bn_apply_flat(y2d,
                          jnp.tile(scale, W).reshape(1, W * Cout),
                          jnp.tile(shift, W).reshape(1, W * Cout))
    out = out2d.reshape(N, H, W, Cout)
    return jnp.transpose(out, (0, 3, 1, 2))       # NHWC -> NCHW


# Pure-JAX f32 reference (for correctness check only)
def astrous_reference(x_nchw, w_oihw, bias, gamma, beta, rate, eps=1e-5):
    y = jax.lax.conv_general_dilated(
        x_nchw, w_oihw,
        window_strides=(1, 1),
        padding=[(rate, rate), (rate, rate)],
        rhs_dilation=(rate, rate),
        dimension_numbers=("NCHW", "OIHW", "NCHW"),
    ) + bias.reshape(1, -1, 1, 1)
    mean = jnp.mean(y, axis=(0, 2, 3), keepdims=True)
    var = jnp.mean((y - mean) ** 2, axis=(0, 2, 3), keepdims=True)
    return (y - mean) * jax.lax.rsqrt(var + eps) * gamma.reshape(1, -1, 1, 1) \
        + beta.reshape(1, -1, 1, 1)


if __name__ == "__main__":
    # Small, DeepLab-like synthetic config (inplanes=32, planes=16 scaled down
    # from 2048/256), dilation rate = 2.
    N, Cin, Cout, H, W, rate = 2, 32, 16, 16, 16, 2

    key = jax.random.PRNGKey(0)
    kx, kw_, kb, kg, kbeta = jax.random.split(key, 5)

    x = jax.random.normal(kx, (N, Cin, H, W), dtype=jnp.float32)
    w = jax.random.normal(kw_, (Cout, Cin, 3, 3), dtype=jnp.float32) * 0.05
    b = jax.random.normal(kb, (Cout,), dtype=jnp.float32) * 0.1
    gamma = 1.0 + 0.1 * jax.random.normal(kg, (Cout,), dtype=jnp.float32)
    beta = 0.1 * jax.random.normal(kbeta, (Cout,), dtype=jnp.float32)

    out = astrous_forward(x, w, b, gamma, beta, rate)
    out = jax.block_until_ready(out)

    ref = astrous_reference(x, w, b, gamma, beta, rate)
    assert out.shape == (N, Cout, H, W)
    # Tolerance reflects bf16 MXU operands vs the f32 reference conv
    # (normalized outputs are O(1); bf16-induced error is a few 1e-3).
    err = jnp.max(jnp.abs(out - ref))
    assert jnp.allclose(out, ref, atol=5e-2, rtol=5e-2), f"max abs err = {err}"

    print("KERNEL_OK")
</pallas_src>

<mosaic_0001>
module attributes {stable_mosaic.version = 11 : i64} {
  func.func @_atrous_conv_stats_kernel(%arg0: i32, %arg1: memref<1x16x16x32xbf16, #tpu.memory_space<vmem>>, %arg2: memref<3x32x48xbf16, #tpu.memory_space<vmem>>, %arg3: memref<1x16x256xf32, #tpu.memory_space<vmem>>, %arg4: memref<1x1x16xf32, #tpu.memory_space<vmem>>, %arg5: memref<1x1x16xf32, #tpu.memory_space<vmem>>, %arg6: memref<20x32x32xbf16, #tpu.memory_space<vmem>>, %arg7: memref<16x32x48xf32, #tpu.memory_space<vmem>>) attributes {dimension_semantics = [#tpu.dimension_semantics<parallel>], iteration_bounds = array<i64: 2>, scalar_prefetch = 0 : i64, scratch_operands = 2 : i64, tpu.core_type = #tpu.core_type<tc>, window_params = [{transform_indices = @transform_0, window_bounds = array<i64: 1, 16, 16, 32>}, {pipeline_mode = #tpu.pipeline_mode<synchronous>, transform_indices = @transform_1, window_bounds = array<i64: 3, 32, 48>}, {transform_indices = @transform_2, window_bounds = array<i64: 1, 16, 256>}, {transform_indices = @transform_3, window_bounds = array<i64: 1, 1, 16>}, {transform_indices = @transform_4, window_bounds = array<i64: 1, 1, 16>}]} {
    %cst = arith.constant 0.000000e+00 : bf16
    %0 = vector.broadcast %cst : bf16 to vector<2x32x32xbf16>
    %c0 = arith.constant 0 : index
    %c0_0 = arith.constant 0 : index
    %c0_1 = arith.constant 0 : index
    %1 = vector.load %arg6[%c0, %c0_0, %c0_1] : memref<20x32x32xbf16, #tpu.memory_space<vmem>>, vector<2x32x32xbf16>
    tpu.vector_store %arg6[%c0, %c0_0, %c0_1], %0 {strides = array<i32>} : memref<20x32x32xbf16, #tpu.memory_space<vmem>>, vector<2x32x32xbf16>,
    %cst_2 = arith.constant 0.000000e+00 : bf16
    %2 = vector.broadcast %cst_2 : bf16 to vector<2x32x32xbf16>
    %c18 = arith.constant 18 : index
    %c0_3 = arith.constant 0 : index
    %c0_4 = arith.constant 0 : index
    %3 = vector.load %arg6[%c18, %c0_3, %c0_4] : memref<20x32x32xbf16, #tpu.memory_space<vmem>>, vector<2x32x32xbf16>
    tpu.vector_store %arg6[%c18, %c0_3, %c0_4], %2 {strides = array<i32>} : memref<20x32x32xbf16, #tpu.memory_space<vmem>>, vector<2x32x32xbf16>,
    %cst_5 = arith.constant 0.000000e+00 : bf16
    %4 = vector.broadcast %cst_5 : bf16 to vector<16x8x32xbf16>
    %c2 = arith.constant 2 : index
    %c0_6 = arith.constant 0 : index
    %c0_7 = arith.constant 0 : index
    %5 = vector.load %arg6[%c2, %c0_6, %c0_7] : memref<20x32x32xbf16, #tpu.memory_space<vmem>>, vector<16x8x32xbf16>
    tpu.vector_store %arg6[%c2, %c0_6, %c0_7], %4 {strides = array<i32>} : memref<20x32x32xbf16, #tpu.memory_space<vmem>>, vector<16x8x32xbf16>,
    %cst_8 = arith.constant 0.000000e+00 : bf16
    %6 = vector.broadcast %cst_8 : bf16 to vector<16x8x32xbf16>
    %c2_9 = arith.constant 2 : index
    %c24 = arith.constant 24 : index
    %c0_10 = arith.constant 0 : index
    %7 = vector.load %arg6[%c2_9, %c24, %c0_10] : memref<20x32x32xbf16, #tpu.memory_space<vmem>>, vector<16x8x32xbf16>
    tpu.vector_store %arg6[%c2_9, %c24, %c0_10], %6 {strides = array<i32>} : memref<20x32x32xbf16, #tpu.memory_space<vmem>>, vector<16x8x32xbf16>,
    %c0_11 = arith.constant 0 : index
    %c0_12 = arith.constant 0 : index
    %c0_13 = arith.constant 0 : index
    %c0_14 = arith.constant 0 : index
    %8 = vector.load %arg1[%c0_11, %c0_12, %c0_13, %c0_14] : memref<1x16x16x32xbf16, #tpu.memory_space<vmem>>, vector<1x16x16x32xbf16>
    %9 = vector.shape_cast %8 : vector<1x16x16x32xbf16> to vector<16x16x32xbf16>
    %c2_15 = arith.constant 2 : index
    %c8 = arith.constant 8 : index
    %c0_16 = arith.constant 0 : index
    %10 = vector.load %arg6[%c2_15, %c8, %c0_16] : memref<20x32x32xbf16, #tpu.memory_space<vmem>>, vector<16x16x32xbf16>
    tpu.vector_store %arg6[%c2_15, %c8, %c0_16], %9 {strides = array<i32>} : memref<20x32x32xbf16, #tpu.memory_space<vmem>>, vector<16x16x32xbf16>,
    %c0_17 = arith.constant 0 : index
    %c0_18 = arith.constant 0 : index
    %c0_19 = arith.constant 0 : index
    %11 = vector.load %arg6[%c0_17, %c0_18, %c0_19] : memref<20x32x32xbf16, #tpu.memory_space<vmem>>, vector<16x32x32xbf16>
    %12 = vector.shape_cast %11 : vector<16x32x32xbf16> to vector<512x32xbf16>
    %c0_20 = arith.constant 0 : index
    %c0_21 = arith.constant 0 : index
    %c0_22 = arith.constant 0 : index
    %13 = vector.load %arg2[%c0_20, %c0_21, %c0_22] : memref<3x32x48xbf16, #tpu.memory_space<vmem>>, vector<1x32x48xbf16>
    %14 = vector.shape_cast %13 : vector<1x32x48xbf16> to vector<32x48xbf16>
    %cst_23 = arith.constant dense<0.000000e+00> : vector<512x48xf32>
    %15 = tpu.matmul %12, %14, %cst_23 {dimension_numbers = #tpu.dot_dimension_numbers<[1], [0], [0], [1], [0, 0, 1, 1], [], []>} : vector<512x32xbf16>, vector<32x48xbf16>, vector<512x48xf32> -> vector<512x48xf32>
    %16 = vector.shape_cast %15 : vector<512x48xf32> to vector<16x32x48xf32>
    %c0_24 = arith.constant 0 : index
    %c0_25 = arith.constant 0 : index
    %c0_26 = arith.constant 0 : index
    %17 = vector.load %arg7[%c0_24, %c0_25, %c0_26] : memref<16x32x48xf32, #tpu.memory_space<vmem>>, vector<16x32x48xf32>
    tpu.vector_store %arg7[%c0_24, %c0_25, %c0_26], %16 {strides = array<i32>} : memref<16x32x48xf32, #tpu.memory_space<vmem>>, vector<16x32x48xf32>,
    %c2_27 = arith.constant 2 : index
    %c0_28 = arith.constant 0 : index
    %c0_29 = arith.constant 0 : index
    %18 = vector.load %arg6[%c2_27, %c0_28, %c0_29] : memref<20x32x32xbf16, #tpu.memory_space<vmem>>, vector<16x32x32xbf16>
    %19 = vector.shape_cast %18 : vector<16x32x32xbf16> to vector<512x32xbf16>
    %c1 = arith.constant 1 : index
    %c0_30 = arith.constant 0 : index
    %c0_31 = arith.constant 0 : index
    %20 = vector.load %arg2[%c1, %c0_30, %c0_31] : memref<3x32x48xbf16, #tpu.memory_space<vmem>>, vector<1x32x48xbf16>
    %21 = vector.shape_cast %20 : vector<1x32x48xbf16> to vector<32x48xbf16>
    %cst_32 = arith.constant dense<0.000000e+00> : vector<512x48xf32>
    %22 = tpu.matmul %19, %21, %cst_32 {dimension_numbers = #tpu.dot_dimension_numbers<[1], [0], [0], [1], [0, 0, 1, 1], [], []>} : vector<512x32xbf16>, vector<32x48xbf16>, vector<512x48xf32> -> vector<512x48xf32>
    %c0_33 = arith.constant 0 : index
    %c0_34 = arith.constant 0 : index
    %c0_35 = arith.constant 0 : index
    %23 = vector.load %arg7[%c0_33, %c0_34, %c0_35] : memref<16x32x48xf32, #tpu.memory_space<vmem>>, vector<16x32x48xf32>
    %24 = vector.shape_cast %22 : vector<512x48xf32> to vector<16x32x48xf32>
    %25 = arith.addf %23, %24 : vector<16x32x48xf32>
    %c0_36 = arith.constant 0 : index
    %c0_37 = arith.constant 0 : index
    %c0_38 = arith.constant 0 : index
    %26 = vector.load %arg7[%c0_36, %c0_37, %c0_38] : memref<16x32x48xf32, #tpu.memory_space<vmem>>, vector<16x32x48xf32>
    tpu.vector_store %arg7[%c0_36, %c0_37, %c0_38], %25 {strides = array<i32>} : memref<16x32x48xf32, #tpu.memory_space<vmem>>, vector<16x32x48xf32>,
    %c4 = arith.constant 4 : index
    %c0_39 = arith.constant 0 : index
    %c0_40 = arith.constant 0 : index
    %27 = vector.load %arg6[%c4, %c0_39, %c0_40] : memref<20x32x32xbf16, #tpu.memory_space<vmem>>, vector<16x32x32xbf16>
    %28 = vector.shape_cast %27 : vector<16x32x32xbf16> to vector<512x32xbf16>
    %c2_41 = arith.constant 2 : index
    %c0_42 = arith.constant 0 : index
    %c0_43 = arith.constant 0 : index
    %29 = vector.load %arg2[%c2_41, %c0_42, %c0_43] : memref<3x32x48xbf16, #tpu.memory_space<vmem>>, vector<1x32x48xbf16>
    %30 = vector.shape_cast %29 : vector<1x32x48xbf16> to vector<32x48xbf16>
    %cst_44 = arith.constant dense<0.000000e+00> : vector<512x48xf32>
    %31 = tpu.matmul %28, %30, %cst_44 {dimension_numbers = #tpu.dot_dimension_numbers<[1], [0], [0], [1], [0, 0, 1, 1], [], []>} : vector<512x32xbf16>, vector<32x48xbf16>, vector<512x48xf32> -> vector<512x48xf32>
    %c0_45 = arith.constant 0 : index
    %c0_46 = arith.constant 0 : index
    %c0_47 = arith.constant 0 : index
    %32 = vector.load %arg7[%c0_45, %c0_46, %c0_47] : memref<16x32x48xf32, #tpu.memory_space<vmem>>, vector<16x32x48xf32>
    %33 = vector.shape_cast %31 : vector<512x48xf32> to vector<16x32x48xf32>
    %34 = arith.addf %32, %33 : vector<16x32x48xf32>
    %c0_48 = arith.constant 0 : index
    %c0_49 = arith.constant 0 : index
    %c0_50 = arith.constant 0 : index
    %35 = vector.load %arg7[%c0_48, %c0_49, %c0_50] : memref<16x32x48xf32, #tpu.memory_space<vmem>>, vector<16x32x48xf32>
    tpu.vector_store %arg7[%c0_48, %c0_49, %c0_50], %34 {strides = array<i32>} : memref<16x32x48xf32, #tpu.memory_space<vmem>>, vector<16x32x48xf32>,
    %c0_51 = arith.constant 0 : index
    %c0_52 = arith.constant 0 : index
    %c0_53 = arith.constant 0 : index
    %36 = vector.load %arg7[%c0_51, %c0_52, %c0_53] : memref<16x32x48xf32, #tpu.memory_space<vmem>>, vector<16x32x48xf32>
    %37 = vector.extract_strided_slice %36 {offsets = [0, 0, 0], sizes = [16, 32, 16], strides = [1, 1, 1]} : vector<16x32x48xf32> to vector<16x32x16xf32>
    %38 = vector.extract_strided_slice %37 {offsets = [0, 6, 0], sizes = [16, 16, 16], strides = [1, 1, 1]} : vector<16x32x16xf32> to vector<16x16x16xf32>
    %39 = vector.extract_strided_slice %36 {offsets = [0, 0, 16], sizes = [16, 32, 16], strides = [1, 1, 1]} : vector<16x32x48xf32> to vector<16x32x16xf32>
    %40 = vector.extract_strided_slice %39 {offsets = [0, 8, 0], sizes = [16, 16, 16], strides = [1, 1, 1]} : vector<16x32x16xf32> to vector<16x16x16xf32>
    %41 = arith.addf %38, %40 : vector<16x16x16xf32>
    %42 = vector.extract_strided_slice %36 {offsets = [0, 0, 32], sizes = [16, 32, 16], strides = [1, 1, 1]} : vector<16x32x48xf32> to vector<16x32x16xf32>
    %43 = vector.extract_strided_slice %42 {offsets = [0, 10, 0], sizes = [16, 16, 16], strides = [1, 1, 1]} : vector<16x32x16xf32> to vector<16x16x16xf32>
    %44 = arith.addf %41, %43 : vector<16x16x16xf32>
    %cst_54 = arith.constant dense<0.000000e+00> : vector<16xf32>
    %45 = vector.multi_reduction <add>, %44, %cst_54 [0, 1] : vector<16x16x16xf32> to vector<16xf32>
    %46 = vector.shape_cast %45 : vector<16xf32> to vector<1x1x16xf32>
    %c0_55 = arith.constant 0 : index
    %c0_56 = arith.constant 0 : index
    %c0_57 = arith.constant 0 : index
    %47 = vector.load %arg4[%c0_55, %c0_56, %c0_57] : memref<1x1x16xf32, #tpu.memory_space<vmem>>, vector<1x1x16xf32>
    tpu.vector_store %arg4[%c0_55, %c0_56, %c0_57], %46 {strides = array<i32>} : memref<1x1x16xf32, #tpu.memory_space<vmem>>, vector<1x1x16xf32>,
    %48 = arith.mulf %44, %44 : vector<16x16x16xf32>
    %cst_58 = arith.constant dense<0.000000e+00> : vector<16xf32>
    %49 = vector.multi_reduction <add>, %48, %cst_58 [0, 1] : vector<16x16x16xf32> to vector<16xf32>
    %50 = vector.shape_cast %49 : vector<16xf32> to vector<1x1x16xf32>
    %c0_59 = arith.constant 0 : index
    %c0_60 = arith.constant 0 : index
    %c0_61 = arith.constant 0 : index
    %51 = vector.load %arg5[%c0_59, %c0_60, %c0_61] : memref<1x1x16xf32, #tpu.memory_space<vmem>>, vector<1x1x16xf32>
    tpu.vector_store %arg5[%c0_59, %c0_60, %c0_61], %50 {strides = array<i32>} : memref<1x1x16xf32, #tpu.memory_space<vmem>>, vector<1x1x16xf32>,
    %52 = vector.shape_cast %44 : vector<16x16x16xf32> to vector<1x16x256xf32>
    %c0_62 = arith.constant 0 : index
    %c0_63 = arith.constant 0 : index
    %c0_64 = arith.constant 0 : index
    %53 = vector.load %arg3[%c0_62, %c0_63, %c0_64] : memref<1x16x256xf32, #tpu.memory_space<vmem>>, vector<1x16x256xf32>
    tpu.vector_store %arg3[%c0_62, %c0_63, %c0_64], %52 {strides = array<i32>} : memref<1x16x256xf32, #tpu.memory_space<vmem>>, vector<1x16x256xf32>,
    return
  }
  func.func @transform_0(%arg0: i32) -> (i32, i32, i32, i32) {
    %c0_i32 = arith.constant 0 : i32
    %c0_i32_0 = arith.constant 0 : i32
    %c0_i32_1 = arith.constant 0 : i32
    %c0_i32_2 = arith.constant 0 : i32
    return %arg0, %c0_i32, %c0_i32_0, %c0_i32_1 : i32, i32, i32, i32
  }
  func.func @transform_1(%arg0: i32) -> (i32, i32, i32) {
    %c0_i32 = arith.constant 0 : i32
    %c0_i32_0 = arith.constant 0 : i32
    %c0_i32_1 = arith.constant 0 : i32
    %c0_i32_2 = arith.constant 0 : i32
    return %c0_i32, %c0_i32_0, %c0_i32_1 : i32, i32, i32
  }
  func.func @transform_2(%arg0: i32) -> (i32, i32, i32) {
    %c0_i32 = arith.constant 0 : i32
    %c0_i32_0 = arith.constant 0 : i32
    %c0_i32_1 = arith.constant 0 : i32
    return %arg0, %c0_i32, %c0_i32_0 : i32, i32, i32
  }
  func.func @transform_3(%arg0: i32) -> (i32, i32, i32) {
    %c0_i32 = arith.constant 0 : i32
    %c0_i32_0 = arith.constant 0 : i32
    %c0_i32_1 = arith.constant 0 : i32
    return %arg0, %c0_i32, %c0_i32_0 : i32, i32, i32
  }
  func.func @transform_4(%arg0: i32) -> (i32, i32, i32) {
    %c0_i32 = arith.constant 0 : i32
    %c0_i32_0 = arith.constant 0 : i32
    %c0_i32_1 = arith.constant 0 : i32
    return %arg0, %c0_i32, %c0_i32_0 : i32, i32, i32
  }
}

</mosaic_0001>

<bundles_post_ra>
// kernel: tpu_custom_call.1
= control target key start
LH: loop header
LB: loop body
LE: loop exit
PB: predicated region body
PF: predicated region fallthrough
CT: control target
= control target key end

     0   :  { %10 = vsyncpa [#allocation5], 0  ;;  %s6988_s0 = inlined_call_operand.hbm [shape: bf16[2,16,16,32], index: 0, kind: input, shape index: {}]   ;;  %s6989_s1 = inlined_call_operand.hbm [shape: bf16[3,32,48], index: 1, kind: input, shape index: {}]   ;;  %s6990_s2 = inlined_call_operand.hbm [shape: f32[2,16,256], index: 2, kind: output, shape index: {0}]   ;;  %s6991_s3 = inlined_call_operand.hbm [shape: f32[2,1,16], index: 3, kind: output, shape index: {1}]   ;;  %s6992_s4 = inlined_call_operand.hbm [shape: f32[2,1,16], index: 4, kind: output, shape index: {2}]  }
   0x1   :  { %12 = vsyncpa [#allocation5 + $0x1], 0 }
   0x2   :  { %13 = vsyncpa [#allocation8], 0 }
   0x3   :  { %14 = vsyncpa [#allocation6], 0 }
   0x4   :  { %16 = vsyncpa [#allocation6 + $0x1], 0 }
   0x5   :  { %17 = vsyncpa [#allocation11], 0 }
   0x6   :  { %19 = vsyncpa [#allocation11 + $0x1], 0  ;;  %s5201_s15 = smov 0   ;;  %s5203_s16 = smov 0  }
   0x7   :  { %s5205_s17 = smov 0   ;;  %s5207_s18 = smov 0  }
   0x8 LB: > { %s5222_s19 = sadd.s32 4294967295, %s5160_s18   ;;  %s6993_s20 = sadd.s32 4294967294, %s5160_s18   ;;  %s5160_s18 = sphi %s5207_s18, %s7013_s18   ;;  %s5156_s17 = sphi %s5205_s17, %s7012_s17   ;;  %s5152_s16 = sphi %s5203_s16, %s7011_s16   ;;  %s5148_s15 = sphi %s5201_s15, %s7010_s15  }
   0x9   : > { %p45_p0 = scmp.ne.s32.totalorder %s5152_s16, %s5148_s15  ;;  %p46_p1 = scmp.eq.s32.totalorder %s5222_s19, 0 }
   0xa   : > { %p90_p2 = scmp.eq.s32.totalorder %s5222_s19, 1  ;;  %p96_p3 = scmp.eq.s32.totalorder %s6993_s20, 1 }
   0xb   : > { %p5233_p4 = por %p46_p1, %p45_p0  ;;  %p4256_p5 = scmp.ge.s32.totalorder %s5160_s18, 1 }
   0xc   : > { %p5238_p6 = por %p96_p3, %p45_p0  ;;  %p155_p7 = scmp.lt.s32.totalorder %s5160_s18, 3 }
   0xd   : > { %s166_s25 = sshll.u32 %s6989_s1, 4  ;;  %s5162_s27 = smov [#allocation7]   ;;  %s167_s25 = int_to_ptr.hbm [resolvable:$true] %s166_s25 }
   0xe   : > { %p5246_p8 = pnand %p4256_p5, %p155_p7  ;;  %s168_s28 = sshll.u32 %s5162_s27, 4  ;;  %s169_s28 = int_to_ptr.vmem [resolvable:$true] %s168_s28 }
   0xf   : > { %s5256_s29 = sadd.s32 1, %s5160_s18   ;;  %s5163_s30 = smov 64  }
  0x10   : > { %p4897_p9 = pneg %p5246_p8  ;;  %s5164_s5 = smov 4  }
  0x11   : > { %s29_s6 = ssub.s32 %s5160_s18, %s5256_s29  ;;  %s32_s7 = sadd.s32 1, %s5156_s17 }
  0x12   : > { %p4898_p10 = pnand %p4897_p9, %p46_p1  ;;  %p30_p12 = scmp.eq.s32.totalorder %s29_s6, 0 }
  0x13   : > { %p39_p13 = scmp.ne.s32.totalorder %s5156_s17, %s5152_s16  ;;  %p40_p0 = scmp.eq.s32.totalorder %s5160_s18, 0 }
  0x14   : > { %4900 = dma.hbm_to_vmem [thread:$0]  (!%p4898_p10), %s167_s25, 768, %s169_s28, [#allocation8], %s5163_s30, %s5163_s30, %s5164_s5  }
  0x15   : > { %s5268_s8 = scalar_select %p30_p12, %s5156_s17, %s32_s7  }
  0x16   : > { %p5272_p3 = por %p90_p2, %p39_p13  ;;  %p4916_p5 = scmp.lt.s32.totalorder %s5160_s18, 2 }
  0x17   : > { %s182_s10 = sand.u32 1, %s5156_s17   ;;  %s4775_s11 = sshll.u32 %s5160_s18, 7 }
  0x18   : > { %p41_p7 = por %p40_p0, %p39_p13  ;;  %s4259_s12 = sshll.u32 %s182_s10, 7 }
  0x19   : > { %s191_s23 = scalar_lea.hbm %s6988_s0, %s4775_s11  ;;  %s186_s25 = scalar_lea.vmem [#allocation4], %s4259_s12 }
  0x1a   : > { %s192_s24 = sshll.u32 %s191_s23, 4  ;;  %s194_s27 = sshll.u32 %s186_s25, 4  ;;  %s193_s24 = int_to_ptr.hbm [resolvable:$true] %s192_s24  ;;  %s195_s27 = int_to_ptr.vmem [resolvable:$true] %s194_s27 }
  0x1b   : > { %p5282_p9 = pnand %p4916_p5, %p41_p7  ;;  %s183_s6 = scalar_lea.sflag [#allocation5], %s182_s10 }
  0x1c   : > { %s5000_s7 = sshra.s32 %s193_s24, 4  ;;  %s5007_s12 = scalar_lea.hbm %s6988_s0, 256  ;;  %s5001_s7 = int_to_ptr.hbm [resolvable:$true] %s5000_s7 }
  0x1d   : > { %s5002_s20 = scalar_lea.hbm %s5001_s7, 128  ;;  %p5004_p10 = pneg %p5282_p9 }
  0x1e   : > { %p5003_p2 = scmp.ne.s32.totalorder %s5001_s7, %s5002_s20  ;;  %p5008_p0 = scmp.lt.s32.totalorder %s5001_s7, %s6988_s0 }
  0x1f   : > { %p5009_p5 = scmp.lt.s32.totalorder %s5007_s12, %s5002_s20 }
  0x20   : > { %p5005_p12 = pnand %p5004_p10, %p5003_p2 }
  0x21   : > { %p5010_p7 = por %p5009_p5, %p5008_p0 }
  0x22   : > { %p5006_p13 = pneg %p5005_p12 }
  0x24   : > { %p5011_p11 = pnand %p5010_p7, %p5006_p13 }
  0x26   : > { %5014 = shalt.err (!%p5011_p11)
}
  0x27   : > { %4904 = dma.hbm_to_vmem [thread:$0]  (!%p5282_p9), %s193_s24, 2048, %s195_s27, %s183_s6, %s5163_s30, %s5163_s30, %s5164_s5  }
  0x28   : > { %206 = sbr.rel (%p5246_p8) target bundleno = 939 (0x3ab), region = 28  ;;  %s5302_s10 = sand.u32 (!%p5246_p8), 1, %s5152_s16  }
  0x29   : > { %s4263_s25 = sshll.u32 (!%p5246_p8), %s5302_s10, 7  ;;  %s209_s20 = scalar_lea.sflag (!%p5246_p8), [#allocation5], %s5302_s10 }
  0x2a   : > { %s5306_s7 = scalar_lea.vmem (!%p5246_p8), [#allocation4], %s4263_s25 }
  0x2d   : > { %5131 = dma.done.wait (%p5233_p4), %s209_s20, 2048  }
  0x2e   : > { %5133 = vsyncadd (%p5233_p4), %s209_s20, 4294965248 }
  0x2f   : > { %5135 = dma.done.wait (%p46_p1), [#allocation8], 768  }
  0x30   : > { %5137 = vsyncadd (%p46_p1), [#allocation8], 4294966528  ;;  %vm252_vm0 = vcmask 257024   ;;  %v5165_v0 = vmov 0   ;;  %v4809_v1 = vld [vmem:[#allocation7 + $0x8] sm:$0xff]  ;;  %v4843_v2 = vld [vmem:[#allocation7 + $0x18] sm:$0xff]  ;;  %s4104_s23 = scalar_lea.hbm %s6991_s3, %s5222_s19 }
  0x31   : > { %253 = vst.msk [vmem:[#allocation2] sm:$0xf] %vm252_vm0, %v5165_v0  ;;  %710 = vmatpush.bf16.msra.mxu0 %v4809_v1  ;;  %4879 = vmatpush.bf16.msra.mxu3 %v4809_v1  ;;  %v4808_v3 = vld [vmem:[#allocation7] sm:$0xff]  ;;  %vm607_vm1 = vcmask 261120   ;;  %v4842_v5 = vld [vmem:[#allocation7 + $0x10] sm:$0xff]  ;;  %v4877_v6 = vld [vmem:[#allocation7 + $0x28] sm:$0xff] }
  0x32   : > { %254 = vst.msk [vmem:[#allocation2 + $0x4] sm:$0xf] %vm252_vm0, %v5165_v0  ;;  %1281 = vmatpush.bf16.msra.mxu1 %v4843_v2  ;;  %1980 = vmatpush.bf16.msra.mxu2 %v4877_v6  ;;  %v4876_v7 = vld [vmem:[#allocation7 + $0x20] sm:$0xff]  ;;  %v323_v10 = vld [vmem:[%s5306_s7 + $0x50] sm:$0xf]  ;;  %vm873_vm2 = vcmask 392192  }
  0x33   : > { %255 = vst.msk [vmem:[#allocation2 + $0x8] sm:$0xf] %vm252_vm0, %v5165_v0  ;;  %v303_v11 = vld [vmem:[%s5306_s7] sm:$0xf]  ;;  %v307_v12 = vld [vmem:[%s5306_s7 + $0x10] sm:$0xf] }
  0x34   : > { %256 = vst.msk [vmem:[#allocation2 + $0xc] sm:$0xf] %vm252_vm0, %v5165_v0  ;;  %v324_v13 = vld [vmem:[%s5306_s7 + $0x54] sm:$0xf]  ;;  %v304_v14 = vld [vmem:[%s5306_s7 + $0x4] sm:$0xf] }
  0x35   : > { %257 = vst.msk [vmem:[#allocation2 + $0x10] sm:$0xf] %vm252_vm0, %v5165_v0  ;;  %711 = vmatpush.bf16.msra.mxu0 %v4808_v3  ;;  %4880 = vmatpush.bf16.msra.mxu3 %v4808_v3  ;;  %v308_v15 = vld [vmem:[%s5306_s7 + $0x14] sm:$0xf]  ;;  %v325_v16 = vld [vmem:[%s5306_s7 + $0x58] sm:$0xf] }
  0x36   : > { %258 = vst.msk [vmem:[#allocation2 + $0x14] sm:$0xf] %vm252_vm0, %v5165_v0  ;;  %1282 = vmatpush.bf16.msra.mxu1 %v4842_v5  ;;  %1981 = vmatpush.bf16.msra.mxu2 %v4876_v7  ;;  %v305_v17 = vld [vmem:[%s5306_s7 + $0x8] sm:$0xf]  ;;  %v309_v19 = vld [vmem:[%s5306_s7 + $0x18] sm:$0xf] }
  0x37   : > { %259 = vst.msk [vmem:[#allocation2 + $0x18] sm:$0xf] %vm252_vm0, %v5165_v0  ;;  %v326_v23 = vld [vmem:[%s5306_s7 + $0x5c] sm:$0xf]  ;;  %v306_v24 = vld [vmem:[%s5306_s7 + $0xc] sm:$0xf] }
  0x38   : > { %260 = vst.msk [vmem:[#allocation2 + $0x1c] sm:$0xf] %vm252_vm0, %v5165_v0  ;;  %v310_v28 = vld [vmem:[%s5306_s7 + $0x1c] sm:$0xf]  ;;  %v327_v30 = vld [vmem:[%s5306_s7 + $0x60] sm:$0xf] }
  0x39   : > { %262 = vst.msk [vmem:[#allocation2 + $0x120] sm:$0xf] %vm252_vm0, %v5165_v0  ;;  %v4776_v4 = vld [vmem:[#allocation2] sm:$0xff]  ;;  %4881 = vmatpush.bf16.msrb.mxu3 %v4843_v2  ;;  %v329_v42 = vld [vmem:[%s5306_s7 + $0x68] sm:$0xf]  ;;  %s5166_s21 = smov 112  }
  0x3a   : > { %263 = vst.msk [vmem:[#allocation2 + $0x124] sm:$0xf] %vm252_vm0, %v5165_v0  ;;  %4402 = vmatmul.msk.bf16.vlgmr.msra.gmra.mxu0 %vm607_vm1, %v4776_v4  ;;  %v311_v34 = vld [vmem:[%s5306_s7 + $0x20] sm:$0xf]  ;;  %v328_v36 = vld [vmem:[%s5306_s7 + $0x64] sm:$0xf] }
  0x3b   : > { %264 = vst.msk [vmem:[#allocation2 + $0x128] sm:$0xf] %vm252_vm0, %v5165_v0  ;;  %v4777_v8 = vld [vmem:[#allocation2 + $0x8] sm:$0xff]  ;;  %v312_v40 = vld [vmem:[%s5306_s7 + $0x24] sm:$0xf]  ;;  %s5167_s26 = smov 96  }
  0x3c   : > { %265 = vst.msk [vmem:[#allocation2 + $0x12c] sm:$0xf] %vm252_vm0, %v5165_v0  ;;  %v313_v46 = vld [vmem:[%s5306_s7 + $0x28] sm:$0xf]  ;;  %v330_v48 = vld [vmem:[%s5306_s7 + $0x6c] sm:$0xf] }
  0x3d   : > { %266 = vst.msk [vmem:[#allocation2 + $0x130] sm:$0xf] %vm252_vm0, %v5165_v0  ;;  %4882 = vmatpush.bf16.msrb.mxu3 %v4842_v5  ;;  %v4778_v9 = vld [vmem:[#allocation2 + $0x10] sm:$0xff]  ;;  %v314_v52 = vld [vmem:[%s5306_s7 + $0x2c] sm:$0xf]  ;;  %vm2688_vm3 = vcmask 1043456  }
  0x3e   : > { %267 = vst.msk [vmem:[#allocation2 + $0x134] sm:$0xf] %vm252_vm0, %v5165_v0  ;;  %v315_v58 = vld [vmem:[%s5306_s7 + $0x30] sm:$0xf]  ;;  %v316_v1 = vld [vmem:[%s5306_s7 + $0x34] sm:$0xf] }
  0x3f   : > { %268 = vst.msk [vmem:[#allocation2 + $0x138] sm:$0xf] %vm252_vm0, %v5165_v0  ;;  %v4779_v22 = vld [vmem:[#allocation2 + $0x18] sm:$0xff]  ;;  %vm2431_vm4 = vcmask 1045504   ;;  %vm3009_vm5 = vcmask 1041408   ;;  %vm3122_vm6 = vcmask 130048  }
  0x40   : > { %269 = vst.msk [vmem:[#allocation2 + $0x13c] sm:$0xf] %vm252_vm0, %v5165_v0  ;;  %vm3473_vm7 = vcmask 1047556   ;;  %s5170_s30 = smov 16   ;;  %s5171_s5 = smov 32   ;;  %vm4039_vm8 = vcmask 523264  }
  0x41   : > { %271 = vst.msk [vmem:[#allocation2 + $0x20] sm:$0xf] %vm252_vm0, %v5165_v0  ;;  %s5172_s24 = smov 64   ;;  %s5173_s27 = smov 48   ;;  %vm4042_vm9 = vcmask 654336   ;;  %vm4045_vm10 = vcmask 785408  }
  0x42   : > { %272 = vst.msk [vmem:[#allocation2 + $0x30] sm:$0xf] %vm252_vm0, %v5165_v0  ;;  %s5174_s28 = smov 80   ;;  %vm4048_vm11 = vcmask 916480   ;;  %s4265_s6 = sshll.u32 %s5302_s10, 5  ;;  %vm3192_vm12 = vcmask 122880  }
  0x43   : > { %273 = vst.msk [vmem:[#allocation2 + $0x40] sm:$0xf] %vm252_vm0, %v5165_v0  ;;  %s6815_s11 = scalar_lea.vmem [#allocation9], %s4265_s6  ;;  %s4074_s13 = sand.u32 1, %s5222_s19  }
  0x44   : > { %274 = vst.msk [vmem:[#allocation2 + $0x50] sm:$0xf] %vm252_vm0, %v5165_v0  ;;  %s244_s25 = scalar_lea.vmem [#allocation10], %s5302_s10 }
  0x45   : > { %275 = vst.msk [vmem:[#allocation2 + $0x60] sm:$0xf] %vm252_vm0, %v5165_v0  ;;  %s4106_s20 = sshll.u32 %s244_s25, 4  ;;  %s4107_s20 = int_to_ptr.vmem [resolvable:$true] %s4106_s20 }
  0x46   : > { %276 = vst.msk [vmem:[#allocation2 + $0x70] sm:$0xf] %vm252_vm0, %v5165_v0 }
  0x47   : > { %277 = vst.msk [vmem:[#allocation2 + $0x80] sm:$0xf] %vm252_vm0, %v5165_v0 }
  0x48   : > { %278 = vst.msk [vmem:[#allocation2 + $0x90] sm:$0xf] %vm252_vm0, %v5165_v0 }
  0x49   : > { %279 = vst.msk [vmem:[#allocation2 + $0xa0] sm:$0xf] %vm252_vm0, %v5165_v0 }
  0x4a   : > { %280 = vst.msk [vmem:[#allocation2 + $0xb0] sm:$0xf] %vm252_vm0, %v5165_v0  ;;  %4403 = vmatmul.msk.bf16.gmra.mxu0 %vm607_vm1, %v4777_v8 }
  0x4b   : > { %281 = vst.msk [vmem:[#allocation2 + $0xc0] sm:$0xf] %vm252_vm0, %v5165_v0 }
  0x4c   : > { %282 = vst.msk [vmem:[#allocation2 + $0xd0] sm:$0xf] %vm252_vm0, %v5165_v0 }
  0x4d   : > { %283 = vst.msk [vmem:[#allocation2 + $0xe0] sm:$0xf] %vm252_vm0, %v5165_v0 }
  0x4e   : > { %284 = vst.msk [vmem:[#allocation2 + $0xf0] sm:$0xf] %vm252_vm0, %v5165_v0 }
  0x4f   : > { %285 = vst.msk [vmem:[#allocation2 + $0x100] sm:$0xf] %vm252_vm0, %v5165_v0 }
  0x50   : > { %286 = vst.msk [vmem:[#allocation2 + $0x110] sm:$0xf] %vm252_vm0, %v5165_v0 }
  0x51   : > { %287 = vst.msk [vmem:[#allocation2 + $0x2c] sm:$0xf] %vm252_vm0, %v5165_v0 }
  0x52   : > { %288 = vst.msk [vmem:[#allocation2 + $0x3c] sm:$0xf] %vm252_vm0, %v5165_v0 }
  0x53   : > { %289 = vst.msk [vmem:[#allocation2 + $0x4c] sm:$0xf] %vm252_vm0, %v5165_v0 }
  0x54   : > { %290 = vst.msk [vmem:[#allocation2 + $0x5c] sm:$0xf] %vm252_vm0, %v5165_v0 }
  0x55   : > { %291 = vst.msk [vmem:[#allocation2 + $0x6c] sm:$0xf] %vm252_vm0, %v5165_v0 }
  0x56   : > { %292 = vst.msk [vmem:[#allocation2 + $0x7c] sm:$0xf] %vm252_vm0, %v5165_v0 }
  0x57   : > { %293 = vst.msk [vmem:[#allocation2 + $0x8c] sm:$0xf] %vm252_vm0, %v5165_v0 }
  0x58   : > { %294 = vst.msk [vmem:[#allocation2 + $0x9c] sm:$0xf] %vm252_vm0, %v5165_v0 }
  0x59   : > { %295 = vst.msk [vmem:[#allocation2 + $0xac] sm:$0xf] %vm252_vm0, %v5165_v0 }
  0x5a   : > { %296 = vst.msk [vmem:[#allocation2 + $0xbc] sm:$0xf] %vm252_vm0, %v5165_v0  ;;  %4404 = vmatmul.msk.bf16.gmra.mxu0 %vm607_vm1, %v4778_v9 }
  0x5b   : > { %297 = vst.msk [vmem:[#allocation2 + $0xcc] sm:$0xf] %vm252_vm0, %v5165_v0 }
  0x5c   : > { %298 = vst.msk [vmem:[#allocation2 + $0xdc] sm:$0xf] %vm252_vm0, %v5165_v0 }
  0x5d   : > { %299 = vst.msk [vmem:[#allocation2 + $0xec] sm:$0xf] %vm252_vm0, %v5165_v0 }
  0x5e   : > { %300 = vst.msk [vmem:[#allocation2 + $0xfc] sm:$0xf] %vm252_vm0, %v5165_v0 }
  0x5f   : > { %301 = vst.msk [vmem:[#allocation2 + $0x10c] sm:$0xf] %vm252_vm0, %v5165_v0 }
  0x60   : > { %302 = vst.msk [vmem:[#allocation2 + $0x11c] sm:$0xf] %vm252_vm0, %v5165_v0 }
  0x61   : > { %355 = vst.msk [vmem:[#allocation2 + $0xc4] sm:$0xf] %vm252_vm0, %v323_v10  ;;  %v317_v10 = vld [vmem:[%s5306_s7 + $0x38] sm:$0xf] }
  0x62   : > { %335 = vst.msk [vmem:[#allocation2 + $0x24] sm:$0xf] %vm252_vm0, %v303_v11 }
  0x63   : > { %339 = vst.msk [vmem:[#allocation2 + $0x44] sm:$0xf] %vm252_vm0, %v307_v12 }
  0x64   : > { %356 = vst.msk [vmem:[#allocation2 + $0xc8] sm:$0xf] %vm252_vm0, %v324_v13 }
  0x65   : > { %336 = vst.msk [vmem:[#allocation2 + $0x28] sm:$0xf] %vm252_vm0, %v304_v14 }
  0x66   : > { %340 = vst.msk [vmem:[#allocation2 + $0x48] sm:$0xf] %vm252_vm0, %v308_v15 }
  0x67   : > { %357 = vst.msk [vmem:[#allocation2 + $0xd4] sm:$0xf] %vm252_vm0, %v325_v16 }
  0x68   : > { %v4800_v18 = vld [vmem:[#allocation2 + $0xc0] sm:$0xff]  ;;  %337 = vst.msk [vmem:[#allocation2 + $0x34] sm:$0xf] %vm252_vm0, %v305_v17 }
  0x69   : > { %v4810_v20 = vld [vmem:[#allocation2 + $0x20] sm:$0xff]  ;;  %341 = vst.msk [vmem:[#allocation2 + $0x54] sm:$0xf] %vm252_vm0, %v309_v19  ;;  %4426 = vmatmul.msk.bf16.vlgmr.msra.gmra.mxu3 %vm607_vm1, %v4800_v18 }
  0x6a   : > { %v4844_v21 = vld [vmem:[#allocation2 + $0x40] sm:$0xff]  ;;  %4570 = vmatmul.msk.bf16.vlgmr.msra.gmra.mxu1 %vm607_vm1, %v4810_v20  ;;  %4883 = vmatpush.bf16.msra.mxu3 %v4877_v6  ;;  %358 = vst.msk [vmem:[#allocation2 + $0xd8] sm:$0xf] %vm252_vm0, %v326_v23 }
  0x6b   : > { %4738 = vmatmul.msk.bf16.vlgmr.msra.gmra.mxu2 %vm607_vm1, %v4844_v21  ;;  %4405 = vmatmul.msk.bf16.gmra.mxu0 %vm607_vm1, %v4779_v22  ;;  %338 = vst.msk [vmem:[#allocation2 + $0x38] sm:$0xf] %vm252_vm0, %v306_v24  ;;  %v4801_v25 = vld [vmem:[#allocation2 + $0xc8] sm:$0xff]  ;;  %v4780_v29 = vld [vmem:[#allocation2 + $0x20] sm:$0xff] }
  0x6c   : > { %v4811_v26 = vld [vmem:[#allocation2 + $0x28] sm:$0xff]  ;;  %342 = vst.msk [vmem:[#allocation2 + $0x58] sm:$0xf] %vm252_vm0, %v310_v28  ;;  %v4814_v44 = vld [vmem:[#allocation2 + $0x40] sm:$0xff] }
  0x6d   : > { %v4845_v27 = vld [vmem:[#allocation2 + $0x48] sm:$0xff]  ;;  %359 = vst.msk [vmem:[#allocation2 + $0xe4] sm:$0xf] %vm252_vm0, %v327_v30  ;;  %v4784_v53 = vld [vmem:[#allocation2 + $0x40] sm:$0xff] }
  0x6e   : > { %4884 = vmatpush.bf16.msra.mxu3 %v4876_v7  ;;  %v4802_v31 = vld [vmem:[#allocation2 + $0xd0] sm:$0xff]  ;;  %343 = vst.msk [vmem:[#allocation2 + $0x64] sm:$0xf] %vm252_vm0, %v311_v34  ;;  %v4781_v35 = vld [vmem:[#allocation2 + $0x28] sm:$0xff] }
  0x6f   : > { %v4812_v32 = vld [vmem:[#allocation2 + $0x30] sm:$0xff]  ;;  %360 = vst.msk [vmem:[#allocation2 + $0xe8] sm:$0xf] %vm252_vm0, %v328_v36  ;;  %v4815_v50 = vld [vmem:[#allocation2 + $0x48] sm:$0xff] }
  0x70   : > { %v4846_v33 = vld [vmem:[#allocation2 + $0x50] sm:$0xff]  ;;  %344 = vst.msk [vmem:[#allocation2 + $0x68] sm:$0xf] %vm252_vm0, %v312_v40  ;;  %v4785_v62 = vld [vmem:[#allocation2 + $0x48] sm:$0xff] }
  0x71   : > { %v4803_v37 = vld [vmem:[#allocation2 + $0xd8] sm:$0xff]  ;;  %v4782_v41 = vld [vmem:[#allocation2 + $0x30] sm:$0xff]  ;;  %361 = vst.msk [vmem:[#allocation2 + $0xf4] sm:$0xf] %vm252_vm0, %v329_v42 }
  0x72   : > { %v4813_v38 = vld [vmem:[#allocation2 + $0x38] sm:$0xff]  ;;  %345 = vst.msk [vmem:[#allocation2 + $0x74] sm:$0xf] %vm252_vm0, %v313_v46  ;;  %v4816_v56 = vld [vmem:[#allocation2 + $0x50] sm:$0xff] }
  0x73   : > { %v4847_v39 = vld [vmem:[#allocation2 + $0x58] sm:$0xff]  ;;  %362 = vst.msk [vmem:[#allocation2 + $0xf8] sm:$0xf] %vm252_vm0, %v330_v48  ;;  %v4786_v6 = vld [vmem:[#allocation2 + $0x50] sm:$0xff] }
  0x74   : > { %v4804_v43 = vld [vmem:[#allocation2 + $0xe0] sm:$0xff]  ;;  %v4783_v47 = vld [vmem:[#allocation2 + $0x38] sm:$0xff]  ;;  %346 = vst.msk [vmem:[#allocation2 + $0x78] sm:$0xf] %vm252_vm0, %v314_v52 }
  0x75   : > { %v4848_v45 = vld [vmem:[#allocation2 + $0x60] sm:$0xff]  ;;  %347 = vst.msk [vmem:[#allocation2 + $0x84] sm:$0xf] %vm252_vm0, %v315_v58  ;;  %v4817_v63 = vld [vmem:[#allocation2 + $0x58] sm:$0xff] }
  0x76   : > { %v4805_v49 = vld [vmem:[#allocation2 + $0xe8] sm:$0xff]  ;;  %348 = vst.msk [vmem:[#allocation2 + $0x88] sm:$0xf] %vm252_vm0, %v316_v1  ;;  %v4834_v3 = vld [vmem:[#allocation2 + $0xe0] sm:$0xff]  ;;  %v4787_v24 = vld [vmem:[#allocation2 + $0x58] sm:$0xff] }
  0x77   : > { %v4849_v51 = vld [vmem:[#allocation2 + $0x68] sm:$0xff]  ;;  %v4818_v7 = vld [vmem:[#allocation2 + $0x60] sm:$0xff]  ;;  %349 = vst.msk [vmem:[#allocation2 + $0x94] sm:$0xf] %vm252_vm0, %v317_v10  ;;  %v332_v1 = vld [vmem:[%s5306_s7 + $0x74] sm:$0xf] }
  0x78   : > { %v4806_v55 = vld [vmem:[#allocation2 + $0xf0] sm:$0xff]  ;;  %v4835_v21 = vld [vmem:[#allocation2 + $0xe8] sm:$0xff]  ;;  %v4788_v48 = vld [vmem:[#allocation2 + $0x60] sm:$0xff]  ;;  %364 = vst.msk [vmem:[#allocation2 + $0x108] sm:$0xf] %vm252_vm0, %v332_v1 }
  0x79   : > { %4427 = vmatmul.msk.bf16.gmra.mxu3 %vm607_vm1, %v4801_v25  ;;  %v4850_v57 = vld [vmem:[#allocation2 + $0x70] sm:$0xff] }
  0x7a   : > { %4571 = vmatmul.msk.bf16.gmra.mxu1 %vm607_vm1, %v4811_v26  ;;  %v4807_v60 = vld [vmem:[#allocation2 + $0xf8] sm:$0xff]  ;;  %v4819_v26 = vld [vmem:[#allocation2 + $0x68] sm:$0xff] }
  0x7b   : > { %4739 = vmatmul.msk.bf16.gmra.mxu2 %vm607_vm1, %v4845_v27  ;;  %4406 = vmatmul.msk.bf16.gmra.mxu0 %vm607_vm1, %v4780_v29  ;;  %v4851_v0 = vld [vmem:[#allocation2 + $0x78] sm:$0xff] }
  0x7c   : > { %v4852_v9 = vld [vmem:[#allocation2 + $0x80] sm:$0xff]  ;;  %v318_v29 = vld [vmem:[%s5306_s7 + $0x3c] sm:$0xf] }
  0x7d   : > { %v4853_v28 = vld [vmem:[#allocation2 + $0x88] sm:$0xff]  ;;  %350 = vst.msk [vmem:[#allocation2 + $0x98] sm:$0xf] %vm252_vm0, %v318_v29  ;;  %v333_v29 = vld [vmem:[%s5306_s7 + $0x78] sm:$0xf] }
  0x7e   : > { %v4854_v52 = vld [vmem:[#allocation2 + $0x90] sm:$0xff]  ;;  %365 = vst.msk [vmem:[#allocation2 + $0x114] sm:$0xf] %vm252_vm0, %v333_v29 }
  0x7f   : > { %v4839_v1 = vld [vmem:[#allocation2 + $0x108] sm:$0xff] }
  0x89   : > { %4428 = vmatmul.msk.bf16.gmra.mxu3 %vm607_vm1, %v4802_v31 }
  0x8a   : > { %4572 = vmatmul.msk.bf16.gmra.mxu1 %vm607_vm1, %v4812_v32 }
  0x8b   : > { %4740 = vmatmul.msk.bf16.gmra.mxu2 %vm607_vm1, %v4846_v33  ;;  %4407 = vmatmul.msk.bf16.gmra.mxu0 %vm607_vm1, %v4781_v35 }
  0x99   : > { %4429 = vmatmul.msk.bf16.gmra.mxu3 %vm607_vm1, %v4803_v37 }
  0x9a   : > { %4573 = vmatmul.msk.bf16.gmra.mxu1 %vm607_vm1, %v4813_v38  ;;  %v331_v38 = vld [vmem:[%s5306_s7 + $0x70] sm:$0xf] }
  0x9b   : > { %4741 = vmatmul.msk.bf16.gmra.mxu2 %vm607_vm1, %v4847_v39  ;;  %4408 = vmatmul.msk.bf16.gmra.mxu0 %vm607_vm1, %v4782_v41  ;;  %363 = vst.msk [vmem:[#allocation2 + $0x104] sm:$0xf] %vm252_vm0, %v331_v38 }
  0xa9   : > { %4430 = vmatmul.msk.bf16.gmra.mxu3 %vm607_vm1, %v4804_v43 }
  0xaa   : > { %4574 = vmatmul.msk.bf16.gmra.mxu1 %vm607_vm1, %v4814_v44 }
  0xab   : > { %4742 = vmatmul.msk.bf16.gmra.mxu2 %vm607_vm1, %v4848_v45  ;;  %4409 = vmatmul.msk.bf16.gmra.mxu0 %vm607_vm1, %v4783_v47  ;;  %v4836_v45 = vld [vmem:[#allocation2 + $0xf0] sm:$0xff] }
  0xb7   : > { %v713_v54 = vpop.f32.mrf.mxu0 }
  0xb8   : > { %874 = vst.msk [vmem:[#allocation3] sm:$0xff] %vm873_vm2, %v713_v54 }
  0xb9   : > { %4431 = vmatmul.msk.bf16.gmra.mxu3 %vm607_vm1, %v4805_v49 }
  0xba   : > { %4575 = vmatmul.msk.bf16.gmra.mxu1 %vm607_vm1, %v4815_v50  ;;  %v4820_v50 = vld [vmem:[#allocation2 + $0x70] sm:$0xff] }
  0xbb   : > { %4743 = vmatmul.msk.bf16.gmra.mxu2 %vm607_vm1, %v4849_v51  ;;  %4410 = vmatmul.msk.bf16.gmra.mxu0 %vm607_vm1, %v4784_v53  ;;  %v319_v53 = vld [vmem:[%s5306_s7 + $0x40] sm:$0xf] }
  0xbc   : > { %351 = vst.msk [vmem:[#allocation2 + $0xa4] sm:$0xf] %vm252_vm0, %v319_v53 }
  0xbf   : > { %v715_v59 = vpop.f32.mrf.mxu0  ;;  %v1444_v4 = vld [vmem:[#allocation3] sm:$0xff] }
  0xc0   : > { %875 = vst.msk [vmem:[#allocation3 + $0x8] sm:$0xff] %vm873_vm2, %v715_v59 }
  0xc7   : > { %v718_v61 = vpop.f32.mrf.mxu0  ;;  %v1445_v13 = vld [vmem:[#allocation3 + $0x8] sm:$0xff] }
  0xc8   : > { %876 = vst.msk [vmem:[#allocation3 + $0x10] sm:$0xff] %vm873_vm2, %v718_v61 }
  0xc9   : > { %4432 = vmatmul.msk.bf16.gmra.mxu3 %vm607_vm1, %v4806_v55 }
  0xca   : > { %4576 = vmatmul.msk.bf16.gmra.mxu1 %vm607_vm1, %v4816_v56 }
  0xcb   : > { %4744 = vmatmul.msk.bf16.gmra.mxu2 %vm607_vm1, %v4850_v57  ;;  %4411 = vmatmul.msk.bf16.gmra.mxu0 %vm607_vm1, %v4785_v62 }
  0xcf   : > { %v720_v2 = vpop.f32.mrf.mxu0  ;;  %v1446_v22 = vld [vmem:[#allocation3 + $0x10] sm:$0xff] }
  0xd0   : > { %877 = vst.msk [vmem:[#allocation3 + $0x18] sm:$0xff] %vm873_vm2, %v720_v2 }
  0xd7   : > { %v723_v5 = vpop.f32.mrf.mxu0  ;;  %v1447_v34 = vld [vmem:[#allocation3 + $0x18] sm:$0xff] }
  0xd8   : > { %878 = vst.msk [vmem:[#allocation3 + $0x20] sm:$0xff] %vm873_vm2, %v723_v5 }
  0xd9   : > { %4433 = vmatmul.msk.bf16.gmra.mxu3 %vm607_vm1, %v4807_v60 }
  0xda   : > { %4577 = vmatmul.msk.bf16.gmra.mxu1 %vm607_vm1, %v4817_v63 }
  0xdb   : > { %4745 = vmatmul.msk.bf16.gmra.mxu2 %vm607_vm1, %v4851_v0  ;;  %4412 = vmatmul.msk.bf16.gmra.mxu0 %vm607_vm1, %v4786_v6 }
  0xdf   : > { %v725_v14 = vpop.f32.mrf.mxu0  ;;  %v1448_v46 = vld [vmem:[#allocation3 + $0x20] sm:$0xff] }
  0xe0   : > { %879 = vst.msk [vmem:[#allocation3 + $0x28] sm:$0xff] %vm873_vm2, %v725_v14  ;;  %v4789_v14 = vld [vmem:[#allocation2 + $0x68] sm:$0xff] }
  0xe7   : > { %v1284_v8 = vpop.f32.mrf.mxu1  ;;  %v1449_v61 = vld [vmem:[#allocation3 + $0x28] sm:$0xff] }
  0xe8   : > { %v1508_v11 = vadd.f32 %v1444_v4, %v1284_v8  ;;  %v728_v23 = vpop.f32.mrf.mxu0 }
  0xe9   : > { %4594 = vmatmul.msk.bf16.vlgmr.msrb.gmra.mxu3 %vm607_vm1, %v4834_v3  ;;  %880 = vst.msk [vmem:[#allocation3 + $0x30] sm:$0xff] %vm873_vm2, %v728_v23 }
  0xea   : > { %1572 = vst.msk [vmem:[#allocation3] sm:$0xff] %vm873_vm2, %v1508_v11  ;;  %4578 = vmatmul.msk.bf16.gmra.mxu1 %vm607_vm1, %v4818_v7 }
  0xeb   : > { %4746 = vmatmul.msk.bf16.gmra.mxu2 %vm607_vm1, %v4852_v9  ;;  %4413 = vmatmul.msk.bf16.gmra.mxu0 %vm607_vm1, %v4787_v24  ;;  %v4837_v9 = vld [vmem:[#allocation2 + $0xf8] sm:$0xff] }
  0xec   : > { %v833_v12 = vpop.f32.mrf.mxu3 }
  0xed   : > { %922 = vst.msk [vmem:[#allocation3 + $0x180] sm:$0xff] %vm873_vm2, %v833_v12 }
  0xee   : > { %v1983_v15 = vpop.f32.mrf.mxu2 }
  0xef   : > { %v1286_v16 = vpop.f32.mrf.mxu1 }
  0xf0   : > { %v1509_v17 = vadd.f32 %v1445_v13, %v1286_v16  ;;  %v730_v35 = vpop.f32.mrf.mxu0  ;;  %v1450_v10 = vld [vmem:[#allocation3 + $0x30] sm:$0xff]  ;;  %v4821_v16 = vld [vmem:[#allocation2 + $0x78] sm:$0xff] }
  0xf1   : > { %v2143_v18 = vld [vmem:[#allocation3] sm:$0xff]  ;;  %881 = vst.msk [vmem:[#allocation3 + $0x38] sm:$0xff] %vm873_vm2, %v730_v35 }
  0xf2   : > { %1573 = vst.msk [vmem:[#allocation3 + $0x8] sm:$0xff] %vm873_vm2, %v1509_v17  ;;  %v2207_v19 = vadd.f32 %v2143_v18, %v1983_v15 }
  0xf4   : > { %v835_v20 = vpop.f32.mrf.mxu3  ;;  %2271 = vst.msk [vmem:[#allocation3] sm:$0xff] %vm873_vm2, %v2207_v19  ;;  %v4855_v19 = vld [vmem:[#allocation2 + $0x98] sm:$0xff] }
  0xf5   : > { %923 = vst.msk [vmem:[#allocation3 + $0x188] sm:$0xff] %vm873_vm2, %v835_v20  ;;  %v320_v20 = vld [vmem:[%s5306_s7 + $0x44] sm:$0xf] }
  0xf6   : > { %v1985_v25 = vpop.f32.mrf.mxu2  ;;  %352 = vst.msk [vmem:[#allocation2 + $0xa8] sm:$0xf] %vm252_vm0, %v320_v20 }
  0xf7   : > { %v1289_v27 = vpop.f32.mrf.mxu1 }
  0xf8   : > { %v1510_v30 = vadd.f32 %v1446_v22, %v1289_v27  ;;  %v733_v47 = vpop.f32.mrf.mxu0 }
  0xf9   : > { %4595 = vmatmul.msk.bf16.gmra.mxu3 %vm607_vm1, %v4835_v21  ;;  %v2144_v31 = vld [vmem:[#allocation3 + $0x8] sm:$0xff]  ;;  %882 = vst.msk [vmem:[#allocation3 + $0x40] sm:$0xff] %vm873_vm2, %v733_v47 }
  0xfa   : > { %1574 = vst.msk [vmem:[#allocation3 + $0x10] sm:$0xff] %vm873_vm2, %v1510_v30  ;;  %v2208_v32 = vadd.f32 %v2144_v31, %v1985_v25  ;;  %4579 = vmatmul.msk.bf16.gmra.mxu1 %vm607_vm1, %v4819_v26  ;;  %v1451_v25 = vld [vmem:[#allocation3 + $0x38] sm:$0xff] }
  0xfb   : > { %4747 = vmatmul.msk.bf16.gmra.mxu2 %vm607_vm1, %v4853_v28  ;;  %4414 = vmatmul.msk.bf16.gmra.mxu0 %vm607_vm1, %v4788_v48 }
  0xfc   : > { %v838_v33 = vpop.f32.mrf.mxu3  ;;  %2272 = vst.msk [vmem:[#allocation3 + $0x8] sm:$0xff] %vm873_vm2, %v2208_v32 }
  0xfd   : > { %924 = vst.msk [vmem:[#allocation3 + $0x190] sm:$0xff] %vm873_vm2, %v838_v33 }
  0xfe   : > { %v1988_v36 = vpop.f32.mrf.mxu2 }
  0xff   : > { %v1291_v37 = vpop.f32.mrf.mxu1 }
 0x100   : > { %v1511_v39 = vadd.f32 %v1447_v34, %v1291_v37  ;;  %v735_v62 = vpop.f32.mrf.mxu0  ;;  %v4838_v37 = vld [vmem:[#allocation2 + $0x100] sm:$0xff] }
 0x101   : > { %v2145_v40 = vld [vmem:[#allocation3 + $0x10] sm:$0xff]  ;;  %883 = vst.msk [vmem:[#allocation3 + $0x48] sm:$0xff] %vm873_vm2, %v735_v62  ;;  %v1452_v38 = vld [vmem:[#allocation3 + $0x40] sm:$0xff] }
 0x102   : > { %1575 = vst.msk [vmem:[#allocation3 + $0x18] sm:$0xff] %vm873_vm2, %v1511_v39  ;;  %v2209_v41 = vadd.f32 %v2145_v40, %v1988_v36  ;;  %v4790_v40 = vld [vmem:[#allocation2 + $0x70] sm:$0xff] }
 0x103   : > { %v5521_v42 = vld [vmem:[#allocation3 + $0x8] sm:$0xff] }
 0x104   : > { %v840_v43 = vpop.f32.mrf.mxu3  ;;  %2273 = vst.msk [vmem:[#allocation3 + $0x10] sm:$0xff] %vm873_vm2, %v2209_v41  ;;  %v2432_v44 = vrot.slane %v5521_v42, 2  ;;  %v2689_v59 = vrot.slane %v5521_v42, 4 }
 0x105   : > { %925 = vst.msk [vmem:[#allocation3 + $0x198] sm:$0xff] %vm873_vm2, %v840_v43  ;;  %v4822_v43 = vld [vmem:[#allocation2 + $0x80] sm:$0xff] }
 0x106   : > { %v1990_v49 = vpop.f32.mrf.mxu2  ;;  %2480 = vrot.lane.b32.xlu0 %v2432_v44, %s5166_s21 }
 0x107   : > { %v1294_v51 = vpop.f32.mrf.mxu1 }
 0x108   : > { %v1512_v54 = vadd.f32 %v1448_v46, %v1294_v51  ;;  %v738_v13 = vpop.f32.mrf.mxu0  ;;  %v321_v46 = vld [vmem:[%s5306_s7 + $0x48] sm:$0xf] }
 0x109   : > { %4596 = vmatmul.msk.bf16.gmra.mxu3 %vm607_vm1, %v4836_v45  ;;  %v2146_v55 = vld [vmem:[#allocation3 + $0x18] sm:$0xff]  ;;  %884 = vst.msk [vmem:[#allocation3 + $0x50] sm:$0xff] %vm873_vm2, %v738_v13  ;;  %v4856_v45 = vld [vmem:[#allocation2 + $0xa0] sm:$0xff] }
 0x10a   : > { %1576 = vst.msk [vmem:[#allocation3 + $0x20] sm:$0xff] %vm873_vm2, %v1512_v54  ;;  %v2210_v56 = vadd.f32 %v2146_v55, %v1990_v49  ;;  %4580 = vmatmul.msk.bf16.gmra.mxu1 %vm607_vm1, %v4820_v50  ;;  %v1453_v54 = vld [vmem:[#allocation3 + $0x48] sm:$0xff] }
 0x10b   : > { %4748 = vmatmul.msk.bf16.gmra.mxu2 %vm607_vm1, %v4854_v52  ;;  %v5535_v57 = vld [vmem:[#allocation3 + $0x10] sm:$0xff]  ;;  %4415 = vmatmul.msk.bf16.gmra.mxu0 %vm607_vm1, %v4789_v14  ;;  %353 = vst.msk [vmem:[#allocation2 + $0xb4] sm:$0xf] %vm252_vm0, %v321_v46 }
 0x10c   : > { %v843_v58 = vpop.f32.mrf.mxu3  ;;  %2274 = vst.msk [vmem:[#allocation3 + $0x18] sm:$0xff] %vm873_vm2, %v2210_v56  ;;  %v2433_v60 = vrot.slane %v5535_v57, 2  ;;  %v2690_v4 = vrot.slane %v5535_v57, 4 }
 0x10d   : > { %926 = vst.msk [vmem:[#allocation3 + $0x1a0] sm:$0xff] %vm873_vm2, %v843_v58 }
 0x10e   : > { %v1993_v63 = vpop.f32.mrf.mxu2  ;;  %2769 = vrot.lane.b32.xlu0 %v2689_v59, %s5167_s26  ;;  %2484 = vrot.lane.b32.xlu1 %v2433_v60, %s5166_s21  ;;  %v2691_v11 = vsel %vm2688_vm3, %v2689_v59, %v2690_v4  ;;  %v2434_v12 = vsel %vm2431_vm4, %v2432_v44, %v2433_v60  ;;  %v334_v60 = vld [vmem:[%s5306_s7 + $0x7c] sm:$0xf] }
 0x10f   : > { %v1296_v0 = vpop.f32.mrf.mxu1  ;;  %366 = vst.msk [vmem:[#allocation2 + $0x118] sm:$0xf] %vm252_vm0, %v334_v60 }
 0x110   : > { %v1513_v2 = vadd.f32 %v1449_v61, %v1296_v0  ;;  %v740_v26 = vpop.f32.mrf.mxu0 }
 0x111   : > { %v2147_v3 = vld [vmem:[#allocation3 + $0x20] sm:$0xff]  ;;  %885 = vst.msk [vmem:[#allocation3 + $0x58] sm:$0xff] %vm873_vm2, %v740_v26 }
 0x112   : > { %1577 = vst.msk [vmem:[#allocation3 + $0x28] sm:$0xff] %vm873_vm2, %v1513_v2  ;;  %v2211_v5 = vadd.f32 %v2147_v3, %v1993_v63  ;;  %v1454_v2 = vld [vmem:[#allocation3 + $0x50] sm:$0xff] }
 0x113   : > { %v2338_v6 = vld [vmem:[#allocation3 + $0x18] sm:$0xff] }
 0x114   : > { %v845_v7 = vpop.f32.mrf.mxu3  ;;  %2275 = vst.msk [vmem:[#allocation3 + $0x20] sm:$0xff] %vm873_vm2, %v2211_v5  ;;  %v2692_v8 = vrot.slane %v2338_v6, 4  ;;  %v4791_v5 = vld [vmem:[#allocation2 + $0x78] sm:$0xff] }
 0x115   : > { %927 = vst.msk [vmem:[#allocation3 + $0x1a8] sm:$0xff] %vm873_vm2, %v845_v7  ;;  %v4823_v7 = vld [vmem:[#allocation2 + $0x88] sm:$0xff] }
 0x116   : > { %v1995_v15 = vpop.f32.mrf.mxu2  ;;  %2771 = vrot.lane.b32.xlu1 %v2691_v11, %s5167_s26  ;;  %2482 = vrot.lane.b32.xlu0 %v2434_v12, %s5166_s21  ;;  %v2693_v17 = vsel %vm2688_vm3, %v2690_v4, %v2692_v8  ;;  %v322_v11 = vld [vmem:[%s5306_s7 + $0x4c] sm:$0xf]  ;;  %s4108_s7 = sshll.u32 %s4104_s23, 4  ;;  %s4109_s7 = int_to_ptr.hbm [resolvable:$true] %s4108_s7 }
 0x117   : > { %v1299_v18 = vpop.f32.mrf.mxu1  ;;  %2773 = vrot.lane.b32.xlu2 %v2693_v17, %s5167_s26  ;;  %354 = vst.msk [vmem:[#allocation2 + $0xb8] sm:$0xf] %vm252_vm0, %v322_v11 }
 0x118   : > { %v1514_v21 = vadd.f32 %v1450_v10, %v1299_v18  ;;  %v743_v39 = vpop.f32.mrf.mxu0  ;;  %v4857_v10 = vld [vmem:[#allocation2 + $0xa8] sm:$0xff]  ;;  %v1455_v17 = vld [vmem:[#allocation3 + $0x58] sm:$0xff] }
 0x119   : > { %4597 = vmatmul.msk.bf16.gmra.mxu3 %vm607_vm1, %v4837_v9  ;;  %v2148_v22 = vld [vmem:[#allocation3 + $0x28] sm:$0xff]  ;;  %886 = vst.msk [vmem:[#allocation3 + $0x60] sm:$0xff] %vm873_vm2, %v743_v39 }
 0x11a   : > { %1578 = vst.msk [vmem:[#allocation3 + $0x30] sm:$0xff] %vm873_vm2, %v1514_v21  ;;  %v2212_v23 = vadd.f32 %v2148_v22, %v1995_v15  ;;  %4581 = vmatmul.msk.bf16.gmra.mxu1 %vm607_vm1, %v4821_v16 }
 0x11b   : > { %4749 = vmatmul.msk.bf16.gmra.mxu2 %vm607_vm1, %v4855_v19  ;;  %4416 = vmatmul.msk.bf16.gmra.mxu0 %vm607_vm1, %v4790_v40 }
 0x11c   : > { %v848_v24 = vpop.f32.mrf.mxu3  ;;  %2276 = vst.msk [vmem:[#allocation3 + $0x28] sm:$0xff] %vm873_vm2, %v2212_v23 }
 0x11d   : > { %928 = vst.msk [vmem:[#allocation3 + $0x1b0] sm:$0xff] %vm873_vm2, %v848_v24 }
 0x11e   : > { %v1998_v27 = vpop.f32.mrf.mxu2 }
 0x11f   : > { %v1301_v28 = vpop.f32.mrf.mxu1 }
 0x120   : > { %v1515_v30 = vadd.f32 %v1451_v25, %v1301_v28  ;;  %v745_v55 = vpop.f32.mrf.mxu0  ;;  %v4840_v28 = vld [vmem:[#allocation2 + $0x110] sm:$0xff]  ;;  %v1456_v29 = vld [vmem:[#allocation3 + $0x60] sm:$0xff] }
 0x121   : > { %v2149_v31 = vld [vmem:[#allocation3 + $0x30] sm:$0xff]  ;;  %887 = vst.msk [vmem:[#allocation3 + $0x68] sm:$0xff] %vm873_vm2, %v745_v55 }
 0x122   : > { %1579 = vst.msk [vmem:[#allocation3 + $0x38] sm:$0xff] %vm873_vm2, %v1515_v30  ;;  %v2213_v32 = vadd.f32 %v2149_v31, %v1998_v27  ;;  %v4792_v31 = vld [vmem:[#allocation2 + $0x80] sm:$0xff] }
 0x123   : > { %v5570_v33 = vld [vmem:[#allocation3 + $0x28] sm:$0xff] }
 0x124   : > { %v850_v34 = vpop.f32.mrf.mxu3  ;;  %2277 = vst.msk [vmem:[#allocation3 + $0x30] sm:$0xff] %vm873_vm2, %v2213_v32  ;;  %v2694_v35 = vrot.slane %v5570_v33, 4  ;;  %v2435_v36 = vrot.slane %v5570_v33, 2 }
 0x125   : > { %929 = vst.msk [vmem:[#allocation3 + $0x1b8] sm:$0xff] %vm873_vm2, %v850_v34  ;;  %v4824_v34 = vld [vmem:[#allocation2 + $0x90] sm:$0xff] }
 0x126   : > { %v2000_v41 = vpop.f32.mrf.mxu2  ;;  %2775 = vrot.lane.b32.xlu0 %v2694_v35, %s5167_s26  ;;  %2486 = vrot.lane.b32.xlu1 %v2435_v36, %s5166_s21 }
 0x127   : > { %v1304_v44 = vpop.f32.mrf.mxu1 }
 0x128   : > { %v1516_v47 = vadd.f32 %v1452_v38, %v1304_v44  ;;  %v748_v4 = vpop.f32.mrf.mxu0 }
 0x129   : > { %4598 = vmatmul.msk.bf16.gmra.mxu3 %vm607_vm1, %v4838_v37  ;;  %v2150_v48 = vld [vmem:[#allocation3 + $0x38] sm:$0xff]  ;;  %888 = vst.msk [vmem:[#allocation3 + $0x70] sm:$0xff] %vm873_vm2, %v748_v4 }
 0x12a   : > { %1580 = vst.msk [vmem:[#allocation3 + $0x40] sm:$0xff] %vm873_vm2, %v1516_v47  ;;  %v2214_v49 = vadd.f32 %v2150_v48, %v2000_v41  ;;  %4582 = vmatmul.msk.bf16.gmra.mxu1 %vm607_vm1, %v4822_v43  ;;  %v4859_v4 = vld [vmem:[#allocation2 + $0xb8] sm:$0xff] }
 0x12b   : > { %4750 = vmatmul.msk.bf16.gmra.mxu2 %vm607_vm1, %v4856_v45  ;;  %v5586_v50 = vld [vmem:[#allocation3 + $0x30] sm:$0xff]  ;;  %4417 = vmatmul.msk.bf16.gmra.mxu0 %vm607_vm1, %v4791_v5  ;;  %v1457_v45 = vld [vmem:[#allocation3 + $0x68] sm:$0xff] }
 0x12c   : > { %v853_v51 = vpop.f32.mrf.mxu3  ;;  %2278 = vst.msk [vmem:[#allocation3 + $0x38] sm:$0xff] %vm873_vm2, %v2214_v49  ;;  %v2436_v52 = vrot.slane %v5586_v50, 2  ;;  %v2695_v53 = vrot.slane %v5586_v50, 4 }
 0x12d   : > { %930 = vst.msk [vmem:[#allocation3 + $0x1c0] sm:$0xff] %vm873_vm2, %v853_v51 }
 0x12e   : > { %v2003_v56 = vpop.f32.mrf.mxu2  ;;  %2490 = vrot.lane.b32.xlu2 %v2436_v52, %s5166_s21  ;;  %v2696_v58 = vsel %vm2688_vm3, %v2694_v35, %v2695_v53  ;;  %v2437_v3 = vsel %vm2431_vm4, %v2435_v36, %v2436_v52  ;;  %v4858_v36 = vld [vmem:[#allocation2 + $0xb0] sm:$0xff] }
 0x12f   : > { %v1306_v59 = vpop.f32.mrf.mxu1  ;;  %2777 = vrot.lane.b32.xlu1 %v2696_v58, %s5167_s26 }
 0x130   : > { %v1517_v61 = vadd.f32 %v1453_v54, %v1306_v59  ;;  %v750_v19 = vpop.f32.mrf.mxu0  ;;  %v4841_v59 = vld [vmem:[#allocation2 + $0x118] sm:$0xff]  ;;  %v1458_v60 = vld [vmem:[#allocation3 + $0x70] sm:$0xff] }
 0x131   : > { %v2151_v62 = vld [vmem:[#allocation3 + $0x40] sm:$0xff]  ;;  %889 = vst.msk [vmem:[#allocation3 + $0x78] sm:$0xff] %vm873_vm2, %v750_v19 }
 0x132   : > { %1581 = vst.msk [vmem:[#allocation3 + $0x48] sm:$0xff] %vm873_vm2, %v1517_v61  ;;  %v2215_v63 = vadd.f32 %v2151_v62, %v2003_v56  ;;  %v4868_v19 = vld [vmem:[#allocation2 + $0x100] sm:$0xff] }
 0x133   : > { %v2342_v8 = vld [vmem:[#allocation3 + $0x38] sm:$0xff] }
 0x134   : > { %v855_v0 = vpop.f32.mrf.mxu3  ;;  %2279 = vst.msk [vmem:[#allocation3 + $0x40] sm:$0xff] %vm873_vm2, %v2215_v63  ;;  %v2697_v14 = vrot.slane %v2342_v8, 4  ;;  %v4825_v63 = vld [vmem:[#allocation2 + $0x98] sm:$0xff] }
 0x135   : > { %931 = vst.msk [vmem:[#allocation3 + $0x1c8] sm:$0xff] %vm873_vm2, %v855_v0 }
 0x136   : > { %v2005_v6 = vpop.f32.mrf.mxu2  ;;  %2488 = vrot.lane.b32.xlu2 %v2437_v3, %s5166_s21  ;;  %v2698_v18 = vsel %vm2688_vm3, %v2695_v53, %v2697_v14 }
 0x137   : > { %v1309_v9 = vpop.f32.mrf.mxu1 }
 0x138   : > { %v1518_v12 = vadd.f32 %v1454_v2, %v1309_v9  ;;  %v753_v30 = vpop.f32.mrf.mxu0  ;;  %v4793_v2 = vld [vmem:[#allocation2 + $0x88] sm:$0xff]  ;;  %v1459_v9 = vld [vmem:[#allocation3 + $0x78] sm:$0xff] }
 0x139   : > { %4599 = vmatmul.msk.bf16.gmra.mxu3 %vm607_vm1, %v4839_v1  ;;  %v2152_v13 = vld [vmem:[#allocation3 + $0x48] sm:$0xff]  ;;  %890 = vst.msk [vmem:[#allocation3 + $0x80] sm:$0xff] %vm873_vm2, %v753_v30 }
 0x13a   : > { %1582 = vst.msk [vmem:[#allocation3 + $0x50] sm:$0xff] %vm873_vm2, %v1518_v12  ;;  %v2216_v15 = vadd.f32 %v2152_v13, %v2005_v6  ;;  %4583 = vmatmul.msk.bf16.gmra.mxu1 %vm607_vm1, %v4823_v7 }
 0x13b   : > { %4751 = vmatmul.msk.bf16.gmra.mxu2 %vm607_vm1, %v4857_v10  ;;  %4418 = vmatmul.msk.bf16.gmra.mxu0 %vm607_vm1, %v4792_v31 }
 0x13c   : > { %v858_v16 = vpop.f32.mrf.mxu3  ;;  %2280 = vst.msk [vmem:[#allocation3 + $0x48] sm:$0xff] %vm873_vm2, %v2216_v15 }
 0x13d   : > { %932 = vst.msk [vmem:[#allocation3 + $0x1d0] sm:$0xff] %vm873_vm2, %v858_v16 }
 0x13e   : > { %v2008_v20 = vpop.f32.mrf.mxu2  ;;  %2779 = vrot.lane.b32.xlu2 %v2698_v18, %s5167_s26 }
 0x13f   : > { %v1311_v21 = vpop.f32.mrf.mxu1 }
 0x140   : > { %v1519_v22 = vadd.f32 %v1455_v17, %v1311_v21  ;;  %v755_v46 = vpop.f32.mrf.mxu0 }
 0x141   : > { %v2153_v23 = vld [vmem:[#allocation3 + $0x50] sm:$0xff]  ;;  %891 = vst.msk [vmem:[#allocation3 + $0x88] sm:$0xff] %vm873_vm2, %v755_v46 }
 0x142   : > { %1583 = vst.msk [vmem:[#allocation3 + $0x58] sm:$0xff] %vm873_vm2, %v1519_v22  ;;  %v2217_v24 = vadd.f32 %v2153_v23, %v2008_v20  ;;  %v1460_v20 = vld [vmem:[#allocation3 + $0x80] sm:$0xff] }
 0x143   : > { %v5617_v25 = vld [vmem:[#allocation3 + $0x48] sm:$0xff]  ;;  %v4826_v23 = vld [vmem:[#allocation2 + $0xa0] sm:$0xff] }
 0x144   : > { %v860_v26 = vpop.f32.mrf.mxu3  ;;  %2281 = vst.msk [vmem:[#allocation3 + $0x50] sm:$0xff] %vm873_vm2, %v2217_v24  ;;  %v2438_v27 = vrot.slane %v5617_v25, 2  ;;  %v2699_v43 = vrot.slane %v5617_v25, 4  ;;  %v4794_v24 = vld [vmem:[#allocation2 + $0x90] sm:$0xff] }
 0x145   : > { %933 = vst.msk [vmem:[#allocation3 + $0x1d8] sm:$0xff] %vm873_vm2, %v860_v26 }
 0x146   : > { %v2010_v32 = vpop.f32.mrf.mxu2  ;;  %2492 = vrot.lane.b32.xlu0 %v2438_v27, %s5166_s21 }
 0x147   : > { %v1314_v35 = vpop.f32.mrf.mxu1 }
 0x148   : > { %v1520_v37 = vadd.f32 %v1456_v29, %v1314_v35  ;;  %v758_v61 = vpop.f32.mrf.mxu0 }
 0x149   : > { %4600 = vmatmul.msk.bf16.gmra.mxu3 %vm607_vm1, %v4840_v28  ;;  %v2154_v38 = vld [vmem:[#allocation3 + $0x58] sm:$0xff]  ;;  %892 = vst.msk [vmem:[#allocation3 + $0x90] sm:$0xff] %vm873_vm2, %v758_v61 }
 0x14a   : > { %1584 = vst.msk [vmem:[#allocation3 + $0x60] sm:$0xff] %vm873_vm2, %v1520_v37  ;;  %v2218_v39 = vadd.f32 %v2154_v38, %v2010_v32  ;;  %4584 = vmatmul.msk.bf16.gmra.mxu1 %vm607_vm1, %v4824_v34  ;;  %v1492_v34 = vld [vmem:[#allocation3 + $0x180] sm:$0xff]  ;;  %v1461_v38 = vld [vmem:[#allocation3 + $0x88] sm:$0xff] }
 0x14b   : > { %4752 = vmatmul.msk.bf16.gmra.mxu2 %vm607_vm1, %v4858_v36  ;;  %v5629_v40 = vld [vmem:[#allocation3 + $0x50] sm:$0xff]  ;;  %4419 = vmatmul.msk.bf16.gmra.mxu0 %vm607_vm1, %v4793_v2 }
 0x14c   : > { %v863_v41 = vpop.f32.mrf.mxu3  ;;  %2282 = vst.msk [vmem:[#allocation3 + $0x58] sm:$0xff] %vm873_vm2, %v2218_v39  ;;  %v2439_v44 = vrot.slane %v5629_v40, 2  ;;  %v2700_v54 = vrot.slane %v5629_v40, 4 }
 0x14d   : > { %934 = vst.msk [vmem:[#allocation3 + $0x1e0] sm:$0xff] %vm873_vm2, %v863_v41 }
 0x14e   : > { %v2013_v47 = vpop.f32.mrf.mxu2  ;;  %2781 = vrot.lane.b32.xlu0 %v2699_v43, %s5167_s26  ;;  %2496 = vrot.lane.b32.xlu2 %v2439_v44, %s5166_s21  ;;  %v2440_v48 = vsel %vm2431_vm4, %v2438_v27, %v2439_v44  ;;  %v2701_v0 = vsel %vm2688_vm3, %v2699_v43, %v2700_v54  ;;  %v4860_v27 = vld [vmem:[#allocation2 + $0xc0] sm:$0xff] }
 0x14f   : > { %v1316_v49 = vpop.f32.mrf.mxu1  ;;  %2494 = vrot.lane.b32.xlu1 %v2440_v48, %s5166_s21 }
 0x150   : > { %v1521_v51 = vadd.f32 %v1457_v45, %v1316_v49  ;;  %v760_v10 = vpop.f32.mrf.mxu0 }
 0x151   : > { %v2155_v52 = vld [vmem:[#allocation3 + $0x60] sm:$0xff]  ;;  %893 = vst.msk [vmem:[#allocation3 + $0x98] sm:$0xff] %vm873_vm2, %v760_v10 }
 0x152   : > { %1585 = vst.msk [vmem:[#allocation3 + $0x68] sm:$0xff] %vm873_vm2, %v1521_v51  ;;  %v2219_v53 = vadd.f32 %v2155_v52, %v2013_v47  ;;  %v1493_v52 = vld [vmem:[#allocation3 + $0x188] sm:$0xff] }
 0x153   : > { %v2346_v55 = vld [vmem:[#allocation3 + $0x58] sm:$0xff] }
 0x154   : > { %v865_v56 = vpop.f32.mrf.mxu3  ;;  %2283 = vst.msk [vmem:[#allocation3 + $0x60] sm:$0xff] %vm873_vm2, %v2219_v53  ;;  %v2702_v58 = vrot.slane %v2346_v55, 4  ;;  %v4869_v55 = vld [vmem:[#allocation2 + $0x108] sm:$0xff] }
 0x155   : > { %935 = vst.msk [vmem:[#allocation3 + $0x1e8] sm:$0xff] %vm873_vm2, %v865_v56  ;;  %v1462_v56 = vld [vmem:[#allocation3 + $0x90] sm:$0xff] }
 0x156   : > { %v2015_v62 = vpop.f32.mrf.mxu2  ;;  %v2703_v1 = vsel %vm2688_vm3, %v2700_v54, %v2702_v58 }
 0x157   : > { %v1319_v3 = vpop.f32.mrf.mxu1  ;;  %2783 = vrot.lane.b32.xlu1 %v2701_v0, %s5167_s26  ;;  %2785 = vrot.lane.b32.xlu2 %v2703_v1, %s5167_s26  ;;  %v4861_v1 = vld [vmem:[#allocation2 + $0xc8] sm:$0xff] }
 0x158   : > { %v1522_v5 = vadd.f32 %v1458_v60, %v1319_v3  ;;  %v763_v21 = vpop.f32.mrf.mxu0  ;;  %v4827_v60 = vld [vmem:[#allocation2 + $0xa8] sm:$0xff] }
 0x159   : > { %4601 = vmatmul.msk.bf16.gmra.mxu3 %vm607_vm1, %v4841_v59  ;;  %v2156_v6 = vld [vmem:[#allocation3 + $0x68] sm:$0xff]  ;;  %894 = vst.msk [vmem:[#allocation3 + $0xa0] sm:$0xff] %vm873_vm2, %v763_v21 }
 0x15a   : > { %1586 = vst.msk [vmem:[#allocation3 + $0x70] sm:$0xff] %vm873_vm2, %v1522_v5  ;;  %v2220_v7 = vadd.f32 %v2156_v6, %v2015_v62  ;;  %4585 = vmatmul.msk.bf16.gmra.mxu1 %vm607_vm1, %v4825_v63  ;;  %v4795_v63 = vld [vmem:[#allocation2 + $0x98] sm:$0xff] }
 0x15b   : > { %4753 = vmatmul.msk.bf16.gmra.mxu2 %vm607_vm1, %v4859_v4  ;;  %4420 = vmatmul.msk.bf16.gmra.mxu0 %vm607_vm1, %v4794_v24 }
 0x15c   : > { %v868_v8 = vpop.f32.mrf.mxu3  ;;  %2284 = vst.msk [vmem:[#allocation3 + $0x68] sm:$0xff] %vm873_vm2, %v2220_v7  ;;  %v1494_v7 = vld [vmem:[#allocation3 + $0x190] sm:$0xff] }
 0x15d   : > { %936 = vst.msk [vmem:[#allocation3 + $0x1f0] sm:$0xff] %vm873_vm2, %v868_v8 }
 0x15e   : > { %v2018_v11 = vpop.f32.mrf.mxu2 }
 0x15f   : > { %v1321_v12 = vpop.f32.mrf.mxu1 }
 0x160   : > { %v1523_v13 = vadd.f32 %v1459_v9, %v1321_v12  ;;  %v765_v39 = vpop.f32.mrf.mxu0  ;;  %v1463_v9 = vld [vmem:[#allocation3 + $0x98] sm:$0xff] }
 0x161   : > { %v2157_v14 = vld [vmem:[#allocation3 + $0x70] sm:$0xff]  ;;  %895 = vst.msk [vmem:[#allocation3 + $0xa8] sm:$0xff] %vm873_vm2, %v765_v39 }
 0x162   : > { %1587 = vst.msk [vmem:[#allocation3 + $0x78] sm:$0xff] %vm873_vm2, %v1523_v13  ;;  %v2221_v15 = vadd.f32 %v2157_v14, %v2018_v11  ;;  %v2335_v11 = vld [vmem:[#allocation3] sm:$0xff]  ;;  %v4862_v39 = vld [vmem:[#allocation2 + $0xd0] sm:$0xff] }
 0x163   : > { %v5658_v16 = vld [vmem:[#allocation3 + $0x68] sm:$0xff] }
 0x164   : > { %v870_v17 = vpop.f32.mrf.mxu3  ;;  %2285 = vst.msk [vmem:[#allocation3 + $0x70] sm:$0xff] %vm873_vm2, %v2221_v15  ;;  %v2441_v18 = vrot.slane %v5658_v16, 2  ;;  %v2704_v35 = vrot.slane %v5658_v16, 4 }
 0x165   : > { %937 = vst.msk [vmem:[#allocation3 + $0x1f8] sm:$0xff] %vm873_vm2, %v870_v17 }
 0x166   : > { %v2020_v22 = vpop.f32.mrf.mxu2  ;;  %2498 = vrot.lane.b32.xlu0 %v2441_v18, %s5166_s21 }
 0x167   : > { %v1324_v26 = vpop.f32.mrf.mxu1 }
 0x168   : > { %v1524_v28 = vadd.f32 %v1460_v20, %v1324_v26  ;;  %v768_v58 = vpop.f32.mrf.mxu0 }
 0x169   : > { %4762 = vmatmul.msk.bf16.vlgmr.msra.gmra.mxu3 %vm607_vm1, %v4868_v19  ;;  %v2158_v29 = vld [vmem:[#allocation3 + $0x78] sm:$0xff]  ;;  %896 = vst.msk [vmem:[#allocation3 + $0xb0] sm:$0xff] %vm873_vm2, %v768_v58 }
 0x16a   : > { %1588 = vst.msk [vmem:[#allocation3 + $0x80] sm:$0xff] %vm873_vm2, %v1524_v28  ;;  %v2222_v30 = vadd.f32 %v2158_v29, %v2020_v22  ;;  %4586 = vmatmul.msk.bf16.gmra.mxu1 %vm607_vm1, %v4826_v23  ;;  %v1495_v28 = vld [vmem:[#allocation3 + $0x198] sm:$0xff] }
 0x16b   : > { %4754 = vmatmul.msk.bf16.gmra.mxu2 %vm607_vm1, %v4860_v27  ;;  %v5670_v31 = vld [vmem:[#allocation3 + $0x70] sm:$0xff]  ;;  %4421 = vmatmul.msk.bf16.gmra.mxu0 %vm607_vm1, %v4795_v63 }
 0x16c   : > { %v1404_v32 = vpop.f32.mrf.mxu3  ;;  %2286 = vst.msk [vmem:[#allocation3 + $0x78] sm:$0xff] %vm873_vm2, %v2222_v30  ;;  %v2442_v36 = vrot.slane %v5670_v31, 2  ;;  %v2705_v48 = vrot.slane %v5670_v31, 4 }
 0x16d   : > { %v1556_v37 = vadd.f32 %v1492_v34, %v1404_v32  ;;  %v4870_v32 = vld [vmem:[#allocation2 + $0x110] sm:$0xff]  ;;  %v1464_v34 = vld [vmem:[#allocation3 + $0xa0] sm:$0xff] }
 0x16e   : > { %v2023_v41 = vpop.f32.mrf.mxu2  ;;  %2787 = vrot.lane.b32.xlu0 %v2704_v35, %s5167_s26  ;;  %2502 = vrot.lane.b32.xlu2 %v2442_v36, %s5166_s21  ;;  %v2443_v43 = vsel %vm2431_vm4, %v2441_v18, %v2442_v36  ;;  %v2706_v61 = vsel %vm2688_vm3, %v2704_v35, %v2705_v48 }
 0x16f   : > { %1620 = vst.msk [vmem:[#allocation3 + $0x180] sm:$0xff] %vm873_vm2, %v1556_v37  ;;  %v1326_v44 = vpop.f32.mrf.mxu1  ;;  %2500 = vrot.lane.b32.xlu1 %v2443_v43, %s5166_s21  ;;  %v4796_v37 = vld [vmem:[#allocation2 + $0xa0] sm:$0xff] }
 0x170   : > { %v1525_v45 = vadd.f32 %v1461_v38, %v1326_v44  ;;  %v770_v10 = vpop.f32.mrf.mxu0 }
 0x171   : > { %v2159_v46 = vld [vmem:[#allocation3 + $0x80] sm:$0xff]  ;;  %897 = vst.msk [vmem:[#allocation3 + $0xb8] sm:$0xff] %vm873_vm2, %v770_v10  ;;  %v2774_v19 = vpop.permute.xlu2 %2773 }
 0x172   : > { %1589 = vst.msk [vmem:[#allocation3 + $0x88] sm:$0xff] %vm873_vm2, %v1525_v45  ;;  %v2223_v47 = vadd.f32 %v2159_v46, %v2023_v41 }
 0x173   : > { %v2350_v49 = vld [vmem:[#allocation3 + $0x78] sm:$0xff] }
 0x174   : > { %v1406_v51 = vpop.f32.mrf.mxu3  ;;  %2287 = vst.msk [vmem:[#allocation3 + $0x80] sm:$0xff] %vm873_vm2, %v2223_v47  ;;  %v2707_v53 = vrot.slane %v2350_v49, 4 }
 0x175   : > { %v1557_v54 = vadd.f32 %v1493_v52, %v1406_v51 }
 0x176   : > { %v2025_v59 = vpop.f32.mrf.mxu2  ;;  %v2708_v62 = vsel %vm2688_vm3, %v2705_v48, %v2707_v53 }
 0x177   : > { %1621 = vst.msk [vmem:[#allocation3 + $0x188] sm:$0xff] %vm873_vm2, %v1557_v54  ;;  %v1329_v0 = vpop.f32.mrf.mxu1  ;;  %2789 = vrot.lane.b32.xlu1 %v2706_v61, %s5167_s26  ;;  %2791 = vrot.lane.b32.xlu2 %v2708_v62, %s5167_s26 }
 0x178   : > { %v1526_v2 = vadd.f32 %v1462_v56, %v1329_v0  ;;  %v2481_v3 = vpop.permute.xlu0 %2480  ;;  %v773_v35 = vpop.f32.mrf.mxu0  ;;  %v1496_v56 = vld [vmem:[#allocation3 + $0x1a0] sm:$0xff] }
 0x179   : > { %4763 = vmatmul.msk.bf16.gmra.mxu3 %vm607_vm1, %v4869_v55  ;;  %v2160_v4 = vld [vmem:[#allocation3 + $0x88] sm:$0xff]  ;;  %v2624_v13 = vadd.f32 %v2481_v3, %v2335_v11  ;;  %898 = vst.msk [vmem:[#allocation3 + $0xc0] sm:$0xff] %vm873_vm2, %v773_v35 }
 0x17a   : > { %1590 = vst.msk [vmem:[#allocation3 + $0x90] sm:$0xff] %vm873_vm2, %v1526_v2  ;;  %v2224_v5 = vadd.f32 %v2160_v4, %v2025_v59  ;;  %4587 = vmatmul.msk.bf16.gmra.mxu1 %vm607_vm1, %v4827_v60  ;;  %v4797_v35 = vld [vmem:[#allocation2 + $0xa8] sm:$0xff] }
 0x17b   : > { %4755 = vmatmul.msk.bf16.gmra.mxu2 %vm607_vm1, %v4861_v1  ;;  %4422 = vmatmul.msk.bf16.gmra.mxu0 %vm607_vm1, %v4796_v37  ;;  %v1465_v1 = vld [vmem:[#allocation3 + $0xa8] sm:$0xff] }
 0x17c   : > { %v1409_v6 = vpop.f32.mrf.mxu3  ;;  %2288 = vst.msk [vmem:[#allocation3 + $0x88] sm:$0xff] %vm873_vm2, %v2224_v5 }
 0x17d   : > { %v1558_v8 = vadd.f32 %v1494_v7, %v1409_v6 }
 0x17e   : > { %v2028_v12 = vpop.f32.mrf.mxu2 }
 0x17f   : > { %1622 = vst.msk [vmem:[#allocation3 + $0x190] sm:$0xff] %vm873_vm2, %v1558_v8  ;;  %v1331_v14 = vpop.f32.mrf.mxu1 }
 0x180   : > { %v1527_v15 = vadd.f32 %v1463_v9, %v1331_v14  ;;  %v2770_v17 = vpop.permute.xlu0 %2769  ;;  %v2485_v18 = vpop.permute.xlu1 %2484 }
 0x181   : > { %v2161_v20 = vld [vmem:[#allocation3 + $0x90] sm:$0xff]  ;;  %v2913_v21 = vadd.f32 %v2770_v17, %v2624_v13  ;;  %v2626_v22 = vadd.f32 %v2485_v18, %v5535_v57  ;;  %v775_v63 = vpop.f32.mrf.mxu0 }
 0x182   : > { %1591 = vst.msk [vmem:[#allocation3 + $0x98] sm:$0xff] %vm873_vm2, %v1527_v15  ;;  %v2225_v23 = vadd.f32 %v2161_v20, %v2028_v12  ;;  %v4828_v57 = vld [vmem:[#allocation2 + $0xb0] sm:$0xff] }
 0x183   : > { %v2915_v24 = vadd.f32 %v2774_v19, %v2626_v22  ;;  %v5700_v26 = vld [vmem:[#allocation3 + $0x88] sm:$0xff]  ;;  %v3194_v47 = vmul.f32 %v2913_v21, %v2913_v21  ;;  %v3010_v54 = vrot.slane %v2913_v21, 6  ;;  %899 = vst.msk [vmem:[#allocation3 + $0xc8] sm:$0xff] %vm873_vm2, %v775_v63 }
 0x184   : > { %v1411_v27 = vpop.f32.mrf.mxu3  ;;  %2289 = vst.msk [vmem:[#allocation3 + $0x90] sm:$0xff] %vm873_vm2, %v2225_v23  ;;  %v2444_v29 = vrot.slane %v5700_v26, 2  ;;  %v1497_v22 = vld [vmem:[#allocation3 + $0x1a8] sm:$0xff] }
 0x185   : > { %v1559_v30 = vadd.f32 %v1495_v28, %v1411_v27  ;;  %v3196_v51 = vmul.f32 %v2915_v24, %v2915_v24  ;;  %v3013_v59 = vrot.slane %v2915_v24, 6  ;;  %v3290_v0 = vrot.slane %v3194_v47, 6  ;;  %v1466_v27 = vld [vmem:[#allocation3 + $0xb0] sm:$0xff] }
 0x186   : > { %v2030_v36 = vpop.f32.mrf.mxu2  ;;  %2504 = vrot.lane.b32.xlu0 %v2444_v29, %s5166_s21 }
 0x187   : > { %1623 = vst.msk [vmem:[#allocation3 + $0x198] sm:$0xff] %vm873_vm2, %v1559_v30  ;;  %v1334_v38 = vpop.f32.mrf.mxu1  ;;  %v3293_v4 = vrot.slane %v3196_v51, 6  ;;  %v4829_v30 = vld [vmem:[#allocation2 + $0xb8] sm:$0xff] }
 0x188   : > { %v1528_v41 = vadd.f32 %v1464_v34, %v1334_v38  ;;  %v2483_v43 = vpop.permute.xlu0 %2482  ;;  %v5710_v46 = vpop.permute.xlu2 %2490 }
 0x189   : > { %4764 = vmatmul.msk.bf16.gmra.mxu3 %vm607_vm1, %v4870_v32  ;;  %v2162_v44 = vld [vmem:[#allocation3 + $0x98] sm:$0xff]  ;;  %v2625_v45 = vadd.f32 %v2483_v43, %v5521_v42  ;;  %v2772_v49 = vpop.permute.xlu1 %2771  ;;  %v2709_v42 = vrot.slane %v5700_v26, 4  ;;  %v778_v28 = vpop.f32.mrf.mxu0  ;;  %v2629_v37 = vadd.f32 %v5710_v46, %v5586_v50  ;;  %v1498_v46 = vld [vmem:[#allocation3 + $0x1b0] sm:$0xff] }
 0x18a   : > { %1592 = vst.msk [vmem:[#allocation3 + $0xa0] sm:$0xff] %vm873_vm2, %v1528_v41  ;;  %v2226_v48 = vadd.f32 %v2162_v44, %v2030_v36  ;;  %4588 = vmatmul.msk.bf16.gmra.mxu1 %vm607_vm1, %v4828_v57  ;;  %v4871_v26 = vld [vmem:[#allocation2 + $0x118] sm:$0xff] }
 0x18b   : > { %v2914_v52 = vadd.f32 %v2772_v49, %v2625_v45  ;;  %4756 = vmatmul.msk.bf16.gmra.mxu2 %vm607_vm1, %v4862_v39  ;;  %v5715_v53 = vld [vmem:[#allocation3 + $0x90] sm:$0xff]  ;;  %900 = vst.msk [vmem:[#allocation3 + $0xd0] sm:$0xff] %vm873_vm2, %v778_v28  ;;  %v4863_v57 = vld [vmem:[#allocation2 + $0xd8] sm:$0xff]  ;;  %v2339_v39 = vld [vmem:[#allocation3 + $0x20] sm:$0xff]  ;;  %4423 = vmatmul.msk.bf16.gmra.mxu0 %vm607_vm1, %v4797_v35 }
 0x18c   : > { %v1414_v55 = vpop.f32.mrf.mxu3  ;;  %2290 = vst.msk [vmem:[#allocation3 + $0x98] sm:$0xff] %vm873_vm2, %v2226_v48  ;;  %v2445_v58 = vrot.slane %v5715_v53, 2  ;;  %v2710_v18 = vrot.slane %v5715_v53, 4 }
 0x18d   : > { %v1560_v60 = vadd.f32 %v1496_v56, %v1414_v55  ;;  %v3011_v61 = vrot.slane %v2914_v52, 6  ;;  %v3195_v62 = vmul.f32 %v2914_v52, %v2914_v52 }
 0x18e   : > { %v2033_v2 = vpop.f32.mrf.mxu2  ;;  %2793 = vrot.lane.b32.xlu0 %v2709_v42, %s5167_s26  ;;  %2508 = vrot.lane.b32.xlu2 %v2445_v58, %s5166_s21  ;;  %v2446_v3 = vsel %vm2431_vm4, %v2444_v29, %v2445_v58  ;;  %v2711_v32 = vsel %vm2688_vm3, %v2709_v42, %v2710_v18 }
 0x18f   : > { %1624 = vst.msk [vmem:[#allocation3 + $0x1a0] sm:$0xff] %vm873_vm2, %v1560_v60  ;;  %v5726_v5 = vsel %vm3009_vm5, %v3010_v54, %v3011_v61  ;;  %v5729_v6 = vsel %vm3009_vm5, %v3011_v61, %v3013_v59  ;;  %v3291_v7 = vrot.slane %v3195_v62, 6  ;;  %v1336_v8 = vpop.f32.mrf.mxu1  ;;  %2506 = vrot.lane.b32.xlu1 %v2446_v3, %s5166_s21  ;;  %v1467_v54 = vld [vmem:[#allocation3 + $0xb8] sm:$0xff] }
 0x190   : > { %v1529_v11 = vadd.f32 %v1465_v1, %v1336_v8  ;;  %v2489_v13 = vpop.permute.xlu2 %2488 }
 0x191   : > { %v3292_v9 = vsel %vm3009_vm5, %v3290_v0, %v3291_v7  ;;  %v3294_v10 = vsel %vm3009_vm5, %v3291_v7, %v3293_v4  ;;  %v2163_v12 = vld [vmem:[#allocation3 + $0xa0] sm:$0xff]  ;;  %v780_v55 = vpop.f32.mrf.mxu0  ;;  %v2628_v58 = vadd.f32 %v2489_v13, %v5570_v33  ;;  %v1499_v7 = vld [vmem:[#allocation3 + $0x1b8] sm:$0xff] }
 0x192   : > { %v3402_v14 = vsel %vm3122_vm6, %v3292_v9, 0.0  ;;  %v3403_v15 = vsel %vm3122_vm6, %v3294_v10, 0.0  ;;  %v2227_v17 = vadd.f32 %v2163_v12, %v2033_v2  ;;  %1593 = vst.msk [vmem:[#allocation3 + $0xa8] sm:$0xff] %vm873_vm2, %v1529_v11  ;;  %v4872_v12 = vld [vmem:[#allocation2 + $0x120] sm:$0xff] }
 0x193   : > { %v2354_v19 = vld [vmem:[#allocation3 + $0x98] sm:$0xff]  ;;  %v5738_v20 = vadd.f32 %v3403_v15, %v3402_v14  ;;  %901 = vst.msk [vmem:[#allocation3 + $0xd8] sm:$0xff] %vm873_vm2, %v780_v55  ;;  %v1468_v13 = vld [vmem:[#allocation3 + $0xc0] sm:$0xff] }
 0x194   : > { %v1416_v21 = vpop.f32.mrf.mxu3  ;;  %2291 = vst.msk [vmem:[#allocation3 + $0xa0] sm:$0xff] %vm873_vm2, %v2227_v17  ;;  %v2712_v23 = vrot.slane %v2354_v19, 4 }
 0x195   : > { %v1561_v24 = vadd.f32 %v1497_v22, %v1416_v21 }
 0x196   : > { %v2035_v29 = vpop.f32.mrf.mxu2  ;;  %v2713_v34 = vsel %vm2688_vm3, %v2710_v18, %v2712_v23  ;;  %v4830_v23 = vld [vmem:[#allocation2 + $0xc0] sm:$0xff] }
 0x197   : > { %1625 = vst.msk [vmem:[#allocation3 + $0x1a8] sm:$0xff] %vm873_vm2, %v1561_v24  ;;  %v1339_v36 = vpop.f32.mrf.mxu1  ;;  %2795 = vrot.lane.b32.xlu1 %v2711_v32, %s5167_s26  ;;  %2797 = vrot.lane.b32.xlu2 %v2713_v34, %s5167_s26  ;;  %v4798_v24 = vld [vmem:[#allocation2 + $0xb0] sm:$0xff] }
 0x198   : > { %v1530_v38 = vadd.f32 %v1466_v27, %v1339_v36  ;;  %v2487_v41 = vpop.permute.xlu1 %2486  ;;  %v2780_v44 = vpop.permute.xlu2 %2779  ;;  %v4864_v27 = vld [vmem:[#allocation2 + $0xe0] sm:$0xff] }
 0x199   : > { %4765 = vmatmul.msk.bf16.gmra.mxu3 %vm607_vm1, %v4871_v26  ;;  %v2627_v43 = vadd.f32 %v2487_v41, %v2339_v39  ;;  %v2164_v45 = vld [vmem:[#allocation3 + $0xa8] sm:$0xff]  ;;  %v2776_v47 = vpop.permute.xlu0 %2775  ;;  %v2918_v48 = vadd.f32 %v2780_v44, %v2629_v37  ;;  %v783_v15 = vpop.f32.mrf.mxu0 }
 0x19a   : > { %1594 = vst.msk [vmem:[#allocation3 + $0xb0] sm:$0xff] %vm873_vm2, %v1530_v38  ;;  %4589 = vmatmul.msk.bf16.gmra.mxu1 %vm607_vm1, %v4829_v30  ;;  %v2228_v49 = vadd.f32 %v2164_v45, %v2035_v29  ;;  %v1469_v45 = vld [vmem:[#allocation3 + $0xc8] sm:$0xff] }
 0x19b   : > { %v2916_v51 = vadd.f32 %v2776_v47, %v2627_v43  ;;  %4757 = vmatmul.msk.bf16.gmra.mxu2 %vm607_vm1, %v4863_v57  ;;  %v3199_v60 = vmul.f32 %v2918_v48, %v2918_v48  ;;  %v3018_v3 = vrot.slane %v2918_v48, 6  ;;  %902 = vst.msk [vmem:[#allocation3 + $0xe0] sm:$0xff] %vm873_vm2, %v783_v15  ;;  %4424 = vmatmul.msk.bf16.gmra.mxu0 %vm607_vm1, %v4798_v24  ;;  %v1500_v43 = vld [vmem:[#allocation3 + $0x1c0] sm:$0xff]  ;;  %v1502_v15 = vld [vmem:[#allocation3 + $0x1d0] sm:$0xff] }
 0x19c   : > { %v1419_v50 = vpop.f32.mrf.mxu3  ;;  %2292 = vst.msk [vmem:[#allocation3 + $0xa8] sm:$0xff] %vm873_vm2, %v2228_v49 }
 0x19d   : > { %v1562_v52 = vadd.f32 %v1498_v46, %v1419_v50  ;;  %v3197_v63 = vmul.f32 %v2916_v51, %v2916_v51  ;;  %v3015_v2 = vrot.slane %v2916_v51, 6  ;;  %v3298_v33 = vrot.slane %v3199_v60, 6 }
 0x19e   : > { %v2038_v56 = vpop.f32.mrf.mxu2 }
 0x19f   : > { %1626 = vst.msk [vmem:[#allocation3 + $0x1b0] sm:$0xff] %vm873_vm2, %v1562_v52  ;;  %v1341_v42 = vpop.f32.mrf.mxu1  ;;  %v3295_v17 = vrot.slane %v3197_v63, 6 }
 0x1a0   : > { %v1531_v59 = vadd.f32 %v1467_v54, %v1341_v42 }
 0x1a1   : > { %v2165_v61 = vld [vmem:[#allocation3 + $0xb0] sm:$0xff]  ;;  %v2778_v62 = vpop.permute.xlu1 %2777  ;;  %v785_v48 = vpop.f32.mrf.mxu0 }
 0x1a2   : > { %1595 = vst.msk [vmem:[#allocation3 + $0xb8] sm:$0xff] %vm873_vm2, %v1531_v59  ;;  %v2229_v0 = vadd.f32 %v2165_v61, %v2038_v56  ;;  %v2917_v1 = vadd.f32 %v2778_v62, %v2628_v58  ;;  %v1501_v61 = vld [vmem:[#allocation3 + $0x1c8] sm:$0xff] }
 0x1a3   : > { %v5760_v10 = vld [vmem:[#allocation3 + $0xa8] sm:$0xff]  ;;  %903 = vst.msk [vmem:[#allocation3 + $0xe8] sm:$0xff] %vm873_vm2, %v785_v48 }
 0x1a4   : > { %v1421_v4 = vpop.f32.mrf.mxu3  ;;  %2293 = vst.msk [vmem:[#allocation3 + $0xb0] sm:$0xff] %vm873_vm2, %v2229_v0  ;;  %v3016_v8 = vrot.slane %v2917_v1, 6  ;;  %v3198_v9 = vmul.f32 %v2917_v1, %v2917_v1  ;;  %v2447_v14 = vrot.slane %v5760_v10, 2  ;;  %v2714_v47 = vrot.slane %v5760_v10, 4  ;;  %v4873_v0 = vld [vmem:[#allocation2 + $0x128] sm:$0xff]  ;;  %v1470_v1 = vld [vmem:[#allocation3 + $0xd0] sm:$0xff] }
 0x1a5   : > { %v1563_v11 = vadd.f32 %v1499_v7, %v1421_v4  ;;  %v4865_v10 = vld [vmem:[#allocation2 + $0xe8] sm:$0xff] }
 0x1a6   : > { %v5764_v18 = vsel %vm3009_vm5, %v3015_v2, %v3016_v8  ;;  %v5767_v19 = vsel %vm3009_vm5, %v3016_v8, %v3018_v3  ;;  %v3296_v21 = vrot.slane %v3198_v9, 6  ;;  %v2040_v22 = vpop.f32.mrf.mxu2  ;;  %2510 = vrot.lane.b32.xlu0 %v2447_v14, %s5166_s21  ;;  %v4831_v3 = vld [vmem:[#allocation2 + $0xc8] sm:$0xff]  ;;  %v4799_v8 = vld [vmem:[#allocation2 + $0xb8] sm:$0xff] }
 0x1a7   : > { %1627 = vst.msk [vmem:[#allocation3 + $0x1b8] sm:$0xff] %vm873_vm2, %v1563_v11  ;;  %v1344_v26 = vpop.f32.mrf.mxu1 }
 0x1a8   : > { %v3297_v28 = vsel %vm3009_vm5, %v3295_v17, %v3296_v21  ;;  %v3299_v29 = vsel %vm3009_vm5, %v3296_v21, %v3298_v33  ;;  %v1532_v30 = vadd.f32 %v1468_v13, %v1344_v26  ;;  %v2497_v32 = vpop.permute.xlu2 %2496  ;;  %v1471_v21 = vld [vmem:[#allocation3 + $0xd8] sm:$0xff] }
 0x1a9   : > { %v3405_v34 = vsel %vm3122_vm6, %v3297_v28, 0.0  ;;  %4766 = vmatmul.msk.bf16.gmra.mxu3 %vm607_vm1, %v4872_v12  ;;  %v2166_v35 = vld [vmem:[#allocation3 + $0xb8] sm:$0xff]  ;;  %v3407_v37 = vsel %vm3122_vm6, %v3299_v29, 0.0  ;;  %v2632_v46 = vadd.f32 %v2497_v32, %v5629_v40  ;;  %v788_v40 = vpop.f32.mrf.mxu0 }
 0x1aa   : > { %v3406_v36 = vadd.f32 %v3405_v34, %v5738_v20  ;;  %1596 = vst.msk [vmem:[#allocation3 + $0xc0] sm:$0xff] %vm873_vm2, %v1532_v30  ;;  %v2230_v57 = vadd.f32 %v2166_v35, %v2040_v22  ;;  %4590 = vmatmul.msk.bf16.gmra.mxu1 %vm607_vm1, %v4830_v23  ;;  %v2343_v23 = vld [vmem:[#allocation3 + $0x40] sm:$0xff] }
 0x1ab   : > { %4758 = vmatmul.msk.bf16.gmra.mxu2 %vm607_vm1, %v4864_v27  ;;  %v5782_v38 = vld [vmem:[#allocation3 + $0xb0] sm:$0xff]  ;;  %904 = vst.msk [vmem:[#allocation3 + $0xf0] sm:$0xff] %vm873_vm2, %v788_v40  ;;  %4425 = vmatmul.msk.bf16.gmra.mxu0 %vm607_vm1, %v4799_v8 }
 0x1ac   : > { %v5784_v39 = vadd.f32 %v3407_v37, %v3406_v36  ;;  %v1424_v41 = vpop.f32.mrf.mxu3  ;;  %2294 = vst.msk [vmem:[#allocation3 + $0xb8] sm:$0xff] %vm873_vm2, %v2230_v57  ;;  %v2448_v44 = vrot.slane %v5782_v38, 2  ;;  %v2715_v58 = vrot.slane %v5782_v38, 4  ;;  %v3123_v57 = vsel %vm3122_vm6, %v5726_v5, 0.0 }
 0x1ad   : > { %v1564_v20 = vadd.f32 %v1500_v43, %v1424_v41  ;;  %v3124_v37 = vsel %vm3122_vm6, %v5729_v6, 0.0  ;;  %v1503_v43 = vld [vmem:[#allocation3 + $0x1d8] sm:$0xff] }
 0x1ae   : > { %v2043_v49 = vpop.f32.mrf.mxu2  ;;  %2514 = vrot.lane.b32.xlu2 %v2448_v44, %s5166_s21  ;;  %v2449_v51 = vsel %vm2431_vm4, %v2447_v14, %v2448_v44  ;;  %2799 = vrot.lane.b32.xlu0 %v2714_v47, %s5167_s26  ;;  %v2716_v4 = vsel %vm2688_vm3, %v2714_v47, %v2715_v58  ;;  %v1472_v47 = vld [vmem:[#allocation3 + $0xe0] sm:$0xff] }
 0x1af   : > { %1628 = vst.msk [vmem:[#allocation3 + $0x1c0] sm:$0xff] %vm873_vm2, %v1564_v20  ;;  %v1346_v50 = vpop.f32.mrf.mxu1  ;;  %2512 = vrot.lane.b32.xlu1 %v2449_v51, %s5166_s21 }
 0x1b0   : > { %v1533_v52 = vadd.f32 %v1469_v45, %v1346_v50  ;;  %v4874_v45 = vld [vmem:[#allocation2 + $0x130] sm:$0xff] }
 0x1b1   : > { %v2167_v54 = vld [vmem:[#allocation3 + $0xc0] sm:$0xff]  ;;  %v2786_v55 = vpop.permute.xlu2 %2785  ;;  %v790_v22 = vpop.f32.mrf.mxu0  ;;  %v4832_v50 = vld [vmem:[#allocation2 + $0xd0] sm:$0xff] }
 0x1b2   : > { %1597 = vst.msk [vmem:[#allocation3 + $0xc8] sm:$0xff] %vm873_vm2, %v1533_v52  ;;  %v2231_v56 = vadd.f32 %v2167_v54, %v2043_v49  ;;  %v5797_v42 = vadd.f32 %v2786_v55, %v2632_v46  ;;  %v3126_v49 = vsel %vm3122_vm6, %v5764_v18, 0.0  ;;  %v3125_v46 = vadd.f32 %v3124_v37, %v3123_v57  ;;  %v4866_v54 = vld [vmem:[#allocation2 + $0xf0] sm:$0xff] }
 0x1b3   : > { %v2358_v59 = vld [vmem:[#allocation3 + $0xb8] sm:$0xff]  ;;  %905 = vst.msk [vmem:[#allocation3 + $0xf8] sm:$0xff] %vm873_vm2, %v790_v22 }
 0x1b4   : > { %v1426_v60 = vpop.f32.mrf.mxu3  ;;  %2295 = vst.msk [vmem:[#allocation3 + $0xc0] sm:$0xff] %vm873_vm2, %v2231_v56  ;;  %v2717_v62 = vrot.slane %v2358_v59, 4  ;;  %v3127_v59 = vadd.f32 %v3126_v49, %v3125_v46  ;;  %v3023_v40 = vrot.slane %v5797_v42, 6 }
 0x1b5   : > { %v1565_v63 = vadd.f32 %v1501_v61, %v1426_v60  ;;  %v3202_v60 = vmul.f32 %v5797_v42, %v5797_v42 }
 0x1b6   : > { %v2045_v2 = vpop.f32.mrf.mxu2  ;;  %v2718_v7 = vsel %vm2688_vm3, %v2715_v58, %v2717_v62 }
 0x1b7   : > { %1629 = vst.msk [vmem:[#allocation3 + $0x1c8] sm:$0xff] %vm873_vm2, %v1565_v63  ;;  %v1349_v9 = vpop.f32.mrf.mxu1  ;;  %2801 = vrot.lane.b32.xlu1 %v2716_v4, %s5167_s26  ;;  %2803 = vrot.lane.b32.xlu2 %v2718_v7, %s5167_s26  ;;  %v1504_v7 = vld [vmem:[#allocation3 + $0x1e0] sm:$0xff] }
 0x1b8   : > { %v1534_v33 = vadd.f32 %v1470_v1, %v1349_v9  ;;  %v2493_v11 = vpop.permute.xlu0 %2492 }
 0x1b9   : > { %4767 = vmatmul.msk.bf16.gmra.mxu3 %vm607_vm1, %v4873_v0  ;;  %v2168_v12 = vld [vmem:[#allocation3 + $0xc8] sm:$0xff]  ;;  %v2630_v26 = vadd.f32 %v2493_v11, %v2343_v23  ;;  %v793_v48 = vpop.f32.mrf.mxu0 }
 0x1ba   : > { %1598 = vst.msk [vmem:[#allocation3 + $0xd0] sm:$0xff] %vm873_vm2, %v1534_v33  ;;  %v2232_v13 = vadd.f32 %v2168_v12, %v2045_v2  ;;  %4591 = vmatmul.msk.bf16.gmra.mxu1 %vm607_vm1, %v4831_v3  ;;  %v3303_v12 = vrot.slane %v3202_v60, 6 }
 0x1bb   : > { %4759 = vmatmul.msk.bf16.gmra.mxu2 %vm607_vm1, %v4865_v10  ;;  %906 = vst.msk [vmem:[#allocation3 + $0x100] sm:$0xff] %vm873_vm2, %v793_v48 }
 0x1bc   : > { %v1429_v14 = vpop.f32.mrf.mxu3  ;;  %2296 = vst.msk [vmem:[#allocation3 + $0xc8] sm:$0xff] %vm873_vm2, %v2232_v13 }
 0x1bd   : > { %v1566_v17 = vadd.f32 %v1502_v15, %v1429_v14 }
 0x1be   : > { %v2048_v24 = vpop.f32.mrf.mxu2 }
 0x1bf   : > { %1630 = vst.msk [vmem:[#allocation3 + $0x1d0] sm:$0xff] %vm873_vm2, %v1566_v17  ;;  %v1351_v27 = vpop.f32.mrf.mxu1 }
 0x1c0   : > { %v1535_v28 = vadd.f32 %v1471_v21, %v1351_v27  ;;  %v2782_v29 = vpop.permute.xlu0 %2781 }
 0x1c1   : > { %v2169_v30 = vld [vmem:[#allocation3 + $0xd0] sm:$0xff]  ;;  %v2919_v32 = vadd.f32 %v2782_v29, %v2630_v26  ;;  %v2495_v34 = vpop.permute.xlu1 %2494  ;;  %v795_v42 = vpop.f32.mrf.mxu0 }
 0x1c2   : > { %1599 = vst.msk [vmem:[#allocation3 + $0xd8] sm:$0xff] %vm873_vm2, %v1535_v28  ;;  %v2233_v35 = vadd.f32 %v2169_v30, %v2048_v24  ;;  %v2631_v55 = vadd.f32 %v2495_v34, %v5617_v25  ;;  %v3128_v25 = vsel %vm3122_vm6, %v5767_v19, 0.0  ;;  %v1473_v30 = vld [vmem:[#allocation3 + $0xe8] sm:$0xff] }
 0x1c3   : > { %v5816_v36 = vld [vmem:[#allocation3 + $0xc8] sm:$0xff]  ;;  %v3200_v61 = vmul.f32 %v2919_v32, %v2919_v32  ;;  %v3020_v2 = vrot.slane %v2919_v32, 6  ;;  %v3129_v11 = vadd.f32 %v3128_v25, %v3127_v59  ;;  %907 = vst.msk [vmem:[#allocation3 + $0x108] sm:$0xff] %vm873_vm2, %v795_v42 }
 0x1c4   : > { %v1431_v41 = vpop.f32.mrf.mxu3  ;;  %2297 = vst.msk [vmem:[#allocation3 + $0xd0] sm:$0xff] %vm873_vm2, %v2233_v35  ;;  %v2450_v44 = vrot.slane %v5816_v36, 2  ;;  %v2719_v10 = vrot.slane %v5816_v36, 4 }
 0x1c5   : > { %v1567_v20 = vadd.f32 %v1503_v43, %v1431_v41  ;;  %v3300_v13 = vrot.slane %v3200_v61, 6  ;;  %v4867_v61 = vld [vmem:[#allocation2 + $0xf8] sm:$0xff] }
 0x1c6   : > { %v2050_v51 = vpop.f32.mrf.mxu2  ;;  %2516 = vrot.lane.b32.xlu0 %v2450_v44, %s5166_s21 }
 0x1c7   : > { %1631 = vst.msk [vmem:[#allocation3 + $0x1d8] sm:$0xff] %vm873_vm2, %v1567_v20  ;;  %v1354_v52 = vpop.f32.mrf.mxu1 }
 0x1c8   : > { %v1536_v56 = vadd.f32 %v1472_v47, %v1354_v52  ;;  %v2503_v58 = vpop.permute.xlu2 %2502  ;;  %v4875_v52 = vld [vmem:[#allocation2 + $0x138] sm:$0xff] }
 0x1c9   : > { %4768 = vmatmul.msk.bf16.gmra.mxu3 %vm607_vm1, %v4874_v45  ;;  %v2170_v62 = vld [vmem:[#allocation3 + $0xd8] sm:$0xff]  ;;  %v2784_v63 = vpop.permute.xlu1 %2783  ;;  %v2635_v57 = vadd.f32 %v2503_v58, %v5670_v31 }
 0x1ca   : > { %1600 = vst.msk [vmem:[#allocation3 + $0xe0] sm:$0xff] %vm873_vm2, %v1536_v56  ;;  %v2234_v0 = vadd.f32 %v2170_v62, %v2050_v51  ;;  %4592 = vmatmul.msk.bf16.gmra.mxu1 %vm607_vm1, %v4832_v50  ;;  %v2920_v1 = vadd.f32 %v2784_v63, %v2631_v55  ;;  %v1505_v51 = vld [vmem:[#allocation3 + $0x1e8] sm:$0xff]  ;;  %v4833_v56 = vld [vmem:[#allocation2 + $0xd8] sm:$0xff] }
 0x1cb   : > { %4760 = vmatmul.msk.bf16.gmra.mxu2 %vm607_vm1, %v4866_v54  ;;  %v5839_v3 = vld [vmem:[#allocation3 + $0xd0] sm:$0xff] }
 0x1cc   : > { %v1434_v4 = vpop.f32.mrf.mxu3  ;;  %2298 = vst.msk [vmem:[#allocation3 + $0xd8] sm:$0xff] %vm873_vm2, %v2234_v0  ;;  %v3021_v8 = vrot.slane %v2920_v1, 6  ;;  %v3201_v9 = vmul.f32 %v2920_v1, %v2920_v1  ;;  %v2451_v33 = vrot.slane %v5839_v3, 2  ;;  %v2720_v43 = vrot.slane %v5839_v3, 4  ;;  %v1474_v54 = vld [vmem:[#allocation3 + $0xf0] sm:$0xff] }
 0x1cd   : > { %v1568_v14 = vadd.f32 %v1504_v7, %v1434_v4  ;;  %v1506_v1 = vld [vmem:[#allocation3 + $0x1f0] sm:$0xff]  ;;  %v1475_v4 = vld [vmem:[#allocation3 + $0xf8] sm:$0xff]  ;;  %v2347_v7 = vld [vmem:[#allocation3 + $0x60] sm:$0xff] }
 0x1ce   : > { %v5845_v15 = vsel %vm3009_vm5, %v3020_v2, %v3021_v8  ;;  %v5848_v17 = vsel %vm3009_vm5, %v3021_v8, %v3023_v40  ;;  %v3301_v21 = vrot.slane %v3201_v9, 6  ;;  %v2053_v22 = vpop.f32.mrf.mxu2  ;;  %2805 = vrot.lane.b32.xlu0 %v2719_v10, %s5167_s26  ;;  %2520 = vrot.lane.b32.xlu2 %v2451_v33, %s5166_s21  ;;  %v2452_v23 = vsel %vm2431_vm4, %v2450_v44, %v2451_v33 }
 0x1cf   : > { %1632 = vst.msk [vmem:[#allocation3 + $0x1e0] sm:$0xff] %vm873_vm2, %v1568_v14  ;;  %v3130_v24 = vsel %vm3122_vm6, %v5845_v15, 0.0  ;;  %v1356_v26 = vpop.f32.mrf.mxu1  ;;  %2518 = vrot.lane.b32.xlu1 %v2452_v23, %s5166_s21  ;;  %v3132_v32 = vsel %vm3122_vm6, %v5848_v17, 0.0  ;;  %v2721_v58 = vsel %vm2688_vm3, %v2719_v10, %v2720_v43 }
 0x1d0   : > { %v3131_v27 = vadd.f32 %v3130_v24, %v3129_v11  ;;  %v3302_v28 = vsel %vm3009_vm5, %v3300_v13, %v3301_v21  ;;  %v3304_v29 = vsel %vm3009_vm5, %v3301_v21, %v3303_v12  ;;  %v1537_v20 = vadd.f32 %v1473_v30, %v1356_v26 }
 0x1d1   : > { %v3409_v34 = vsel %vm3122_vm6, %v3302_v28, 0.0  ;;  %v2171_v35 = vld [vmem:[#allocation3 + $0xe0] sm:$0xff]  ;;  %v2792_v36 = vpop.permute.xlu2 %2791  ;;  %v3411_v44 = vsel %vm3122_vm6, %v3304_v29, 0.0  ;;  %v5168_v13 = vmov 1983009808   ;;  %v3472_v24 = vrot.slane %v5845_v15, 4 }
 0x1d2   : > { %v5864_v37 = vadd.f32 %v3132_v32, %v3131_v27  ;;  %v3410_v41 = vadd.f32 %v3409_v34, %v5784_v39  ;;  %v2235_v45 = vadd.f32 %v2171_v35, %v2053_v22  ;;  %v5871_v50 = vadd.f32 %v2792_v36, %v2635_v57  ;;  %1601 = vst.msk [vmem:[#allocation3 + $0xe8] sm:$0xff] %vm873_vm2, %v1537_v20  ;;  %v798_v39 = vpop.f32.mrf.mxu0  ;;  %v1507_v28 = vld [vmem:[#allocation3 + $0x1f8] sm:$0xff]  ;;  %v1476_v35 = vld [vmem:[#allocation3 + $0x100] sm:$0xff] }
 0x1d3   : > { %v2362_v47 = vld [vmem:[#allocation3 + $0xd8] sm:$0xff]  ;;  %908 = vst.msk [vmem:[#allocation3 + $0x110] sm:$0xff] %vm873_vm2, %v798_v39  ;;  %v3478_v14 = vunpack.c.l.s4 %v5168_v13  ;;  %v3475_v26 = vrot.slane %v5726_v5, 4  ;;  %v3699_v29 = vrot.slane %v5729_v6, 4  ;;  %v3697_v32 = vrot.slane %v5848_v17, 4 }
 0x1d4   : > { %v5869_v48 = vadd.f32 %v3411_v44, %v3410_v41  ;;  %v1436_v49 = vpop.f32.mrf.mxu3  ;;  %v2722_v46 = vrot.slane %v2362_v47, 4  ;;  %2299 = vst.msk [vmem:[#allocation3 + $0xe0] sm:$0xff] %vm873_vm2, %v2235_v45  ;;  %v3205_v20 = vmul.f32 %v5871_v50, %v5871_v50 }
 0x1d5   : > { %v1569_v31 = vadd.f32 %v1505_v51, %v1436_v49  ;;  %v5893_v30 = vunpack.c.0.s8 %v3478_v14  ;;  %v3476_v36 = vsel %vm3473_vm7, %v5845_v15, %v3475_v26  ;;  %v3700_v44 = vsel %vm3473_vm7, %v5848_v17, %v3699_v29 }
 0x1d6   : > { %v2055_v55 = vpop.f32.mrf.mxu2  ;;  %v2723_v59 = vsel %vm2688_vm3, %v2720_v43, %v2722_v46  ;;  %v3474_v43 = vsel %vm3473_vm7, %v3472_v24, %v5726_v5  ;;  %v3487_v5 = vrot.slane %v5764_v18, 4 }
 0x1d7   : > { %1633 = vst.msk [vmem:[#allocation3 + $0x1e8] sm:$0xff] %vm873_vm2, %v1569_v31  ;;  %v1359_v60 = vpop.f32.mrf.mxu1  ;;  %2807 = vrot.lane.b32.xlu1 %v2721_v58, %s5167_s26  ;;  %2809 = vrot.lane.b32.xlu2 %v2723_v59, %s5167_s26  ;;  %v5912_v17 = vperm.slane %v3476_v36, %v5893_v30  ;;  %v3028_v59 = vrot.slane %v5871_v50, 6 }
 0x1d8   : > { %v1538_v62 = vadd.f32 %v1474_v54, %v1359_v60  ;;  %v2499_v63 = vpop.permute.xlu0 %2498  ;;  %v3308_v60 = vrot.slane %v3205_v20, 6 }
 0x1d9   : > { %4769 = vmatmul.msk.bf16.gmra.mxu3 %vm607_vm1, %v4875_v52  ;;  %v2172_v25 = vld [vmem:[#allocation3 + $0xe8] sm:$0xff]  ;;  %v2633_v10 = vadd.f32 %v2499_v63, %v2347_v7  ;;  %v5916_v52 = vsel %vm3473_vm7, %v3697_v32, %v5729_v6  ;;  %v5928_v6 = vperm.slane %v3474_v43, %v5893_v30 }
 0x1da   : > { %1602 = vst.msk [vmem:[#allocation3 + $0xf0] sm:$0xff] %vm873_vm2, %v1538_v62  ;;  %4593 = vmatmul.msk.bf16.gmra.mxu1 %vm607_vm1, %v4833_v56  ;;  %v2236_v2 = vadd.f32 %v2172_v25, %v2055_v55  ;;  %v800_v9 = vpop.f32.mrf.mxu0  ;;  %v3711_v55 = vrot.slane %v5767_v19, 4 }
 0x1db   : > { %4761 = vmatmul.msk.bf16.gmra.mxu2 %vm607_vm1, %v4867_v61  ;;  %909 = vst.msk [vmem:[#allocation3 + $0x118] sm:$0xff] %vm873_vm2, %v800_v9 }
 0x1dc   : > { %v1439_v0 = vpop.f32.mrf.mxu3  ;;  %2300 = vst.msk [vmem:[#allocation3 + $0xe8] sm:$0xff] %vm873_vm2, %v2236_v2 }
 0x1dd   : > { %v1570_v40 = vadd.f32 %v1506_v1, %v1439_v0  ;;  %v2191_v1 = vld [vmem:[#allocation3 + $0x180] sm:$0xff] }
 0x1de   : > { %v2058_v8 = vpop.f32.mrf.mxu2 }
 0x1df   : > { %1634 = vst.msk [vmem:[#allocation3 + $0x1f0] sm:$0xff] %vm873_vm2, %v1570_v40  ;;  %v1361_v33 = vpop.f32.mrf.mxu1 }
 0x1e0   : > { %v1539_v11 = vadd.f32 %v1475_v4, %v1361_v33  ;;  %v2788_v12 = vpop.permute.xlu0 %2787 }
 0x1e1   : > { %v2173_v42 = vld [vmem:[#allocation3 + $0xf0] sm:$0xff]  ;;  %v2922_v21 = vadd.f32 %v2788_v12, %v2633_v10  ;;  %v2501_v22 = vpop.permute.xlu1 %2500 }
 0x1e2   : > { %1603 = vst.msk [vmem:[#allocation3 + $0xf8] sm:$0xff] %vm873_vm2, %v1539_v11  ;;  %v2237_v23 = vadd.f32 %v2173_v42, %v2058_v8  ;;  %v803_v41 = vpop.f32.mrf.mxu0  ;;  %v2634_v51 = vadd.f32 %v2501_v22, %v5658_v16  ;;  %v5920_v16 = vperm.slane %v3700_v44, %v5893_v30 }
 0x1e3   : > { %v5905_v47 = vld [vmem:[#allocation3 + $0xe8] sm:$0xff]  ;;  %v3203_v49 = vmul.f32 %v2922_v21, %v2922_v21  ;;  %910 = vst.msk [vmem:[#allocation3 + $0x120] sm:$0xff] %vm873_vm2, %v803_v41  ;;  %v3025_v61 = vrot.slane %v2922_v21, 6 }
 0x1e4   : > { %v1441_v27 = vpop.f32.mrf.mxu3  ;;  %2301 = vst.msk [vmem:[#allocation3 + $0xf0] sm:$0xff] %vm873_vm2, %v2237_v23  ;;  %v2453_v46 = vrot.slane %v5905_v47, 2  ;;  %v2724_v50 = vrot.slane %v5905_v47, 4 }
 0x1e5   : > { %v1571_v34 = vadd.f32 %v1507_v28, %v1441_v27  ;;  %v3305_v63 = vrot.slane %v3203_v49, 6  ;;  %v1477_v28 = vld [vmem:[#allocation3 + $0x108] sm:$0xff] }
 0x1e6   : > { %v2060_v57 = vpop.f32.mrf.mxu2  ;;  %2522 = vrot.lane.b32.xlu0 %v2453_v46, %s5166_s21 }
 0x1e7   : > { %1635 = vst.msk [vmem:[#allocation3 + $0x1f8] sm:$0xff] %vm873_vm2, %v1571_v34  ;;  %v1364_v45 = vpop.f32.mrf.mxu1 }
 0x1e8   : > { %v1540_v15 = vadd.f32 %v1476_v35, %v1364_v45  ;;  %v2509_v31 = vpop.permute.xlu2 %2508 }
 0x1e9   : > { %v2174_v54 = vld [vmem:[#allocation3 + $0xf8] sm:$0xff]  ;;  %v2790_v39 = vpop.permute.xlu1 %2789  ;;  %v2638_v7 = vadd.f32 %v2509_v31, %v5715_v53 }
 0x1ea   : > { %1604 = vst.msk [vmem:[#allocation3 + $0x100] sm:$0xff] %vm873_vm2, %v1540_v15  ;;  %v2238_v56 = vadd.f32 %v2174_v54, %v2060_v57  ;;  %v2923_v58 = vadd.f32 %v2790_v39, %v2634_v51  ;;  %v805_v13 = vpop.f32.mrf.mxu0  ;;  %v3523_v54 = vrot.slane %v5928_v6, 4 }
 0x1eb   : > { %v5925_v62 = vld [vmem:[#allocation3 + $0xf0] sm:$0xff]  ;;  %911 = vst.msk [vmem:[#allocation3 + $0x128] sm:$0xff] %vm873_vm2, %v805_v13 }
 0x1ec   : > { %2302 = vst.msk [vmem:[#allocation3 + $0xf8] sm:$0xff] %vm873_vm2, %v2238_v56  ;;  %v2103_v0 = vpop.f32.mrf.mxu3  ;;  %v3026_v25 = vrot.slane %v2923_v58, 6  ;;  %v3204_v40 = vmul.f32 %v2923_v58, %v2923_v58  ;;  %v2454_v2 = vrot.slane %v5925_v62, 2  ;;  %v2725_v8 = vrot.slane %v5925_v62, 4 }
 0x1ed   : > { %v2255_v4 = vadd.f32 %v2191_v1, %v2103_v0  ;;  %v3704_v58 = vperm.slane %v5916_v52, %v5893_v30  ;;  %v3535_v1 = vrot.slane %v5912_v17, 4 }
 0x1ee   : > { %v3027_v9 = vsel %vm3009_vm5, %v3025_v61, %v3026_v25  ;;  %v3029_v10 = vsel %vm3009_vm5, %v3026_v25, %v3028_v59  ;;  %v3306_v33 = vrot.slane %v3204_v40, 6  ;;  %v2063_v11 = vpop.f32.mrf.mxu2  ;;  %2526 = vrot.lane.b32.xlu2 %v2454_v2, %s5166_s21  ;;  %v2455_v12 = vsel %vm2431_vm4, %v2453_v46, %v2454_v2  ;;  %2811 = vrot.lane.b32.xlu0 %v2724_v50, %s5167_s26 }
 0x1ef   : > { %2319 = vst.msk [vmem:[#allocation3 + $0x180] sm:$0xff] %vm873_vm2, %v2255_v4  ;;  %v3134_v14 = vsel %vm3122_vm6, %v3027_v9, 0.0  ;;  %v3136_v53 = vsel %vm3122_vm6, %v3029_v10, 0.0  ;;  %v3485_v42 = vrot.slane %v3027_v9, 4  ;;  %v3488_v21 = vsel %vm3473_vm7, %v3027_v9, %v3487_v5  ;;  %v1366_v22 = vpop.f32.mrf.mxu1  ;;  %2524 = vrot.lane.b32.xlu1 %v2455_v12, %s5166_s21 }
 0x1f0   : > { %v3135_v23 = vadd.f32 %v3134_v14, %v5864_v37  ;;  %v3307_v24 = vsel %vm3009_vm5, %v3305_v63, %v3306_v33  ;;  %v3309_v26 = vsel %vm3009_vm5, %v3306_v33, %v3308_v60  ;;  %v3496_v27 = vperm.slane %v3488_v21, %v5893_v30  ;;  %v2193_v14 = vld [vmem:[#allocation3 + $0x190] sm:$0xff] }
 0x1f1   : > { %v3413_v29 = vsel %vm3122_vm6, %v3307_v24, 0.0  ;;  %v3415_v32 = vsel %vm3122_vm6, %v3309_v26, 0.0  ;;  %v3486_v34 = vsel %vm3473_vm7, %v3485_v42, %v5764_v18  ;;  %v3709_v35 = vrot.slane %v3029_v10, 4  ;;  %v2175_v36 = vld [vmem:[#allocation3 + $0x100] sm:$0xff]  ;;  %v2798_v57 = vpop.permute.xlu2 %2797 }
 0x1f2   : > { %v5953_v37 = vadd.f32 %v3136_v53, %v3135_v23  ;;  %v3414_v41 = vadd.f32 %v3413_v29, %v5869_v48  ;;  %v3492_v43 = vperm.slane %v3486_v34, %v5893_v30  ;;  %v3712_v44 = vsel %vm3473_vm7, %v3029_v10, %v3711_v55  ;;  %v2192_v48 = vld [vmem:[#allocation3 + $0x188] sm:$0xff]  ;;  %v1478_v55 = vld [vmem:[#allocation3 + $0x110] sm:$0xff]  ;;  %v808_v52 = vpop.f32.mrf.mxu0  ;;  %v2351_v34 = vld [vmem:[#allocation3 + $0x80] sm:$0xff] }
 0x1f3   : > { %v3710_v20 = vsel %vm3473_vm7, %v3709_v35, %v5767_v19  ;;  %v3720_v45 = vperm.slane %v3712_v44, %v5893_v30  ;;  %v1541_v49 = vadd.f32 %v1477_v28, %v1366_v22  ;;  %v2239_v18 = vadd.f32 %v2175_v36, %v2063_v11  ;;  %v2366_v51 = vld [vmem:[#allocation3 + $0xf8] sm:$0xff]  ;;  %912 = vst.msk [vmem:[#allocation3 + $0x130] sm:$0xff] %vm873_vm2, %v808_v52 }
 0x1f4   : > { %v5962_v15 = vadd.f32 %v3415_v32, %v3414_v41  ;;  %v3716_v46 = vperm.slane %v3710_v20, %v5893_v30  ;;  %v2105_v31 = vpop.f32.mrf.mxu3  ;;  %v5965_v5 = vadd.f32 %v2798_v57, %v2638_v7  ;;  %v2727_v19 = vrot.slane %v2366_v51, 4  ;;  %v1479_v22 = vld [vmem:[#allocation3 + $0x118] sm:$0xff] }
 0x1f5   : > { %1605 = vst.msk [vmem:[#allocation3 + $0x108] sm:$0xff] %vm873_vm2, %v1541_v49  ;;  %v2256_v39 = vadd.f32 %v2192_v48, %v2105_v31  ;;  %v3521_v56 = vrot.slane %v3492_v43, 4  ;;  %v3757_v59 = vrot.slane %v3720_v45, 4  ;;  %v2726_v61 = vsel %vm2688_vm3, %v2724_v50, %v2725_v8  ;;  %v4965_v48 = vld [vmem:[#allocation3 + $0x88] sm:$0xff] }
 0x1f6   : > { %2303 = vst.msk [vmem:[#allocation3 + $0x100] sm:$0xff] %vm873_vm2, %v2239_v18  ;;  %v2065_v60 = vpop.f32.mrf.mxu2  ;;  %v5974_v63 = vsel %vm3473_vm7, %v3492_v43, %v3523_v54  ;;  %v3533_v0 = vrot.slane %v3496_v27, 4  ;;  %v2728_v40 = vsel %vm2688_vm3, %v2725_v8, %v2727_v19  ;;  %v3745_v4 = vrot.slane %v3716_v46, 4  ;;  %v2194_v43 = vld [vmem:[#allocation3 + $0x198] sm:$0xff] }
 0x1f7   : > { %2320 = vst.msk [vmem:[#allocation3 + $0x188] sm:$0xff] %vm873_vm2, %v2256_v39  ;;  %v1369_v25 = vpop.f32.mrf.mxu1  ;;  %2813 = vrot.lane.b32.xlu1 %v2726_v61, %s5167_s26  ;;  %v5982_v2 = vsel %vm3473_vm7, %v3521_v56, %v5928_v6  ;;  %2815 = vrot.lane.b32.xlu2 %v2728_v40, %s5167_s26  ;;  %v5991_v10 = vsel %vm3473_vm7, %v3496_v27, %v3535_v1  ;;  %v3747_v8 = vrot.slane %v3704_v58, 4  ;;  %v3759_v11 = vrot.slane %v5920_v16, 4 }
 0x1f8   : > { %v1542_v7 = vadd.f32 %v1478_v55, %v1369_v25  ;;  %v2505_v50 = vpop.permute.xlu0 %2504  ;;  %v5988_v9 = vsel %vm3473_vm7, %v3533_v0, %v5912_v17  ;;  %v5996_v6 = vsel %vm3473_vm7, %v3757_v59, %v5920_v16  ;;  %v5999_v33 = vsel %vm3473_vm7, %v3745_v4, %v3704_v58  ;;  %v2195_v25 = vld [vmem:[#allocation3 + $0x1a0] sm:$0xff] }
 0x1f9   : > { %v6003_v12 = vsel %vm3473_vm7, %v3716_v46, %v3747_v8  ;;  %v6006_v53 = vsel %vm3473_vm7, %v3720_v45, %v3759_v11  ;;  %v2636_v57 = vadd.f32 %v2505_v50, %v2351_v34  ;;  %v1480_v45 = vld [vmem:[#allocation3 + $0x120] sm:$0xff]  ;;  %v3208_v19 = vmul.f32 %v5965_v5, %v5965_v5 }
 0x1fa   : > { %1606 = vst.msk [vmem:[#allocation3 + $0x110] sm:$0xff] %vm873_vm2, %v1542_v7  ;;  %v810_v27 = vpop.f32.mrf.mxu0  ;;  %v1481_v7 = vld [vmem:[#allocation3 + $0x128] sm:$0xff] }
 0x1fb   : > { %913 = vst.msk [vmem:[#allocation3 + $0x138] sm:$0xff] %vm873_vm2, %v810_v27  ;;  %v3313_v50 = vrot.slane %v3208_v19, 6 }
 0x1fc   : > { %v2176_v17 = vld [vmem:[#allocation3 + $0x108] sm:$0xff]  ;;  %v2108_v13 = vpop.f32.mrf.mxu3 }
 0x1fd   : > { %v2240_v42 = vadd.f32 %v2176_v17, %v2065_v60  ;;  %v2257_v21 = vadd.f32 %v2193_v14, %v2108_v13 }
 0x1fe   : > { %v6008_v23 = vld [vmem:[#allocation3 + $0x188] sm:$0xff]  ;;  %v2068_v24 = vpop.f32.mrf.mxu2 }
 0x1ff   : > { %2304 = vst.msk [vmem:[#allocation3 + $0x108] sm:$0xff] %vm873_vm2, %v2240_v42  ;;  %v2468_v26 = vrot.slane %v6008_v23, 2  ;;  %v1371_v16 = vpop.f32.mrf.mxu1  ;;  %v2749_v18 = vrot.slane %v6008_v23, 4 }
 0x200   : > { %2321 = vst.msk [vmem:[#allocation3 + $0x190] sm:$0xff] %vm873_vm2, %v2257_v21  ;;  %v1543_v28 = vadd.f32 %v1479_v22, %v1371_v16  ;;  %v2794_v36 = vpop.permute.xlu0 %2793 }
 0x201   : > { %2552 = vrot.lane.b32.xlu0 %v2468_v26, %s5166_s21  ;;  %v2177_v29 = vld [vmem:[#allocation3 + $0x110] sm:$0xff]  ;;  %v2507_v32 = vpop.permute.xlu1 %2506  ;;  %v6017_v20 = vadd.f32 %v2794_v36, %v2636_v57 }
 0x202   : > { %1607 = vst.msk [vmem:[#allocation3 + $0x118] sm:$0xff] %vm873_vm2, %v1543_v28  ;;  %v2241_v35 = vadd.f32 %v2177_v29, %v2068_v24  ;;  %v813_v31 = vpop.f32.mrf.mxu0  ;;  %v2637_v54 = vadd.f32 %v4965_v48, %v2507_v32 }
 0x203   : > { %914 = vst.msk [vmem:[#allocation3 + $0x140] sm:$0xff] %vm873_vm2, %v813_v31  ;;  %v3206_v56 = vmul.f32 %v6017_v20, %v6017_v20 }
 0x204   : > { %2305 = vst.msk [vmem:[#allocation3 + $0x110] sm:$0xff] %vm873_vm2, %v2241_v35  ;;  %v2110_v41 = vpop.f32.mrf.mxu3 }
 0x205   : > { %v2258_v44 = vadd.f32 %v2194_v43, %v2110_v41  ;;  %v3310_v8 = vrot.slane %v3206_v56, 6 }
 0x206   : > { %v2070_v49 = vpop.f32.mrf.mxu2  ;;  %v6039_v52 = vld [vmem:[#allocation3 + $0x108] sm:$0xff] }
 0x207   : > { %2322 = vst.msk [vmem:[#allocation3 + $0x198] sm:$0xff] %vm873_vm2, %v2258_v44  ;;  %v6021_v51 = vld [vmem:[#allocation3 + $0x190] sm:$0xff]  ;;  %v1374_v46 = vpop.f32.mrf.mxu1  ;;  %v2456_v42 = vrot.slane %v6039_v52, 2  ;;  %v2196_v44 = vld [vmem:[#allocation3 + $0x1a8] sm:$0xff]  ;;  %v2729_v31 = vrot.slane %v6039_v52, 4 }
 0x208   : > { %v2469_v39 = vrot.slane %v6021_v51, 2  ;;  %v1544_v55 = vadd.f32 %v1480_v45, %v1374_v46  ;;  %v2750_v17 = vrot.slane %v6021_v51, 4 }
 0x209   : > { %2841 = vrot.lane.b32.xlu0 %v2749_v18, %s5167_s26  ;;  %v2178_v58 = vld [vmem:[#allocation3 + $0x118] sm:$0xff]  ;;  %v2796_v59 = vpop.permute.xlu1 %2795 }
 0x20a   : > { %2556 = vrot.lane.b32.xlu2 %v2469_v39, %s5166_s21  ;;  %1608 = vst.msk [vmem:[#allocation3 + $0x120] sm:$0xff] %vm873_vm2, %v1544_v55  ;;  %v2470_v60 = vsel %vm2431_vm4, %v2468_v26, %v2469_v39  ;;  %v2242_v61 = vadd.f32 %v2178_v58, %v2070_v49  ;;  %v6033_v0 = vadd.f32 %v2796_v59, %v2637_v54  ;;  %v815_v22 = vpop.f32.mrf.mxu0  ;;  %v1482_v49 = vld [vmem:[#allocation3 + $0x130] sm:$0xff]  ;;  %v2515_v55 = vpop.permute.xlu2 %2514 }
 0x20b   : > { %2554 = vrot.lane.b32.xlu1 %v2470_v60, %s5166_s21  ;;  %915 = vst.msk [vmem:[#allocation3 + $0x148] sm:$0xff] %vm873_vm2, %v815_v22  ;;  %v2751_v34 = vsel %vm2688_vm3, %v2749_v18, %v2750_v17  ;;  %v6055_v41 = vld [vmem:[#allocation3 + $0x110] sm:$0xff] }
 0x20c   : > { %2306 = vst.msk [vmem:[#allocation3 + $0x118] sm:$0xff] %vm873_vm2, %v2242_v61  ;;  %v2113_v1 = vpop.f32.mrf.mxu3  ;;  %v3207_v40 = vmul.f32 %v6033_v0, %v6033_v0  ;;  %v2457_v18 = vrot.slane %v6055_v41, 2  ;;  %v2197_v61 = vld [vmem:[#allocation3 + $0x1b0] sm:$0xff] }
 0x20d   : > { %v2259_v4 = vadd.f32 %v2195_v25, %v2113_v1 }
 0x20e   : > { %v3311_v11 = vrot.slane %v3207_v40, 6  ;;  %v2386_v13 = vld [vmem:[#allocation3 + $0x198] sm:$0xff]  ;;  %v2073_v14 = vpop.f32.mrf.mxu2  ;;  %v2458_v58 = vsel %vm2431_vm4, %v2456_v42, %v2457_v18 }
 0x20f   : > { %2323 = vst.msk [vmem:[#allocation3 + $0x1a0] sm:$0xff] %vm873_vm2, %v2259_v4  ;;  %v1376_v21 = vpop.f32.mrf.mxu1  ;;  %v2752_v28 = vrot.slane %v2386_v13, 4  ;;  %v1483_v40 = vld [vmem:[#allocation3 + $0x138] sm:$0xff]  ;;  %v2730_v4 = vrot.slane %v6055_v41, 4 }
 0x210   : > { %v3312_v24 = vsel %vm3009_vm5, %v3310_v8, %v3311_v11  ;;  %v3314_v26 = vsel %vm3009_vm5, %v3311_v11, %v3313_v50  ;;  %v1545_v16 = vadd.f32 %v1481_v7, %v1376_v21 }
 0x211   : > { %v3417_v27 = vsel %vm3122_vm6, %v3312_v24, 0.0  ;;  %2528 = vrot.lane.b32.xlu0 %v2456_v42, %s5166_s21  ;;  %v2179_v29 = vld [vmem:[#allocation3 + $0x120] sm:$0xff]  ;;  %v3419_v36 = vsel %vm3122_vm6, %v3314_v26, 0.0  ;;  %v2753_v57 = vsel %vm2688_vm3, %v2750_v17, %v2752_v28  ;;  %v2731_v21 = vsel %vm2688_vm3, %v2729_v31, %v2730_v4 }
 0x212   : > { %v3418_v32 = vadd.f32 %v3417_v27, %v5962_v15  ;;  %1609 = vst.msk [vmem:[#allocation3 + $0x128] sm:$0xff] %vm873_vm2, %v1545_v16  ;;  %v2243_v35 = vadd.f32 %v2179_v29, %v2073_v14  ;;  %2845 = vrot.lane.b32.xlu2 %v2753_v57, %s5167_s26  ;;  %v818_v54 = vpop.f32.mrf.mxu0  ;;  %v2804_v24 = vpop.permute.xlu2 %2803  ;;  %v2355_v26 = vld [vmem:[#allocation3 + $0xa0] sm:$0xff]  ;;  %v2641_v28 = vadd.f32 %v2515_v55, %v5782_v38 }
 0x213   : > { %2843 = vrot.lane.b32.xlu1 %v2751_v34, %s5167_s26  ;;  %916 = vst.msk [vmem:[#allocation3 + $0x150] sm:$0xff] %vm873_vm2, %v818_v54  ;;  %v2370_v1 = vld [vmem:[#allocation3 + $0x118] sm:$0xff] }
 0x214   : > { %v6057_v43 = vadd.f32 %v3419_v36, %v3418_v32  ;;  %2307 = vst.msk [vmem:[#allocation3 + $0x120] sm:$0xff] %vm873_vm2, %v2243_v35  ;;  %v2115_v15 = vpop.f32.mrf.mxu3  ;;  %v2732_v11 = vrot.slane %v2370_v1, 4  ;;  %v2198_v34 = vld [vmem:[#allocation3 + $0x1b8] sm:$0xff]  ;;  %v1484_v36 = vld [vmem:[#allocation3 + $0x140] sm:$0xff]  ;;  %v6085_v57 = vadd.f32 %v2804_v24, %v2641_v28 }
 0x215   : > { %v2260_v45 = vadd.f32 %v2196_v44, %v2115_v15  ;;  %v2199_v1 = vld [vmem:[#allocation3 + $0x1c0] sm:$0xff] }
 0x216   : > { %v2075_v46 = vpop.f32.mrf.mxu2  ;;  %v2733_v16 = vsel %vm2688_vm3, %v2730_v4, %v2732_v11  ;;  %v1485_v4 = vld [vmem:[#allocation3 + $0x148] sm:$0xff] }
 0x217   : > { %2324 = vst.msk [vmem:[#allocation3 + $0x1a8] sm:$0xff] %vm873_vm2, %v2260_v45  ;;  %v1379_v48 = vpop.f32.mrf.mxu1 }
 0x218   : > { %v1546_v39 = vadd.f32 %v1482_v49, %v1379_v48  ;;  %v2511_v56 = vpop.permute.xlu0 %2510 }
 0x219   : > { %2817 = vrot.lane.b32.xlu0 %v2729_v31, %s5167_s26  ;;  %v2180_v19 = vld [vmem:[#allocation3 + $0x128] sm:$0xff]  ;;  %v2639_v29 = vadd.f32 %v2511_v56, %v2355_v26  ;;  %v3211_v56 = vmul.f32 %v6085_v57, %v6085_v57 }
 0x21a   : > { %1610 = vst.msk [vmem:[#allocation3 + $0x130] sm:$0xff] %vm873_vm2, %v1546_v39  ;;  %v2244_v59 = vadd.f32 %v2180_v19, %v2075_v46  ;;  %2532 = vrot.lane.b32.xlu2 %v2457_v18, %s5166_s21  ;;  %v820_v17 = vpop.f32.mrf.mxu0  ;;  %v4966_v31 = vld [vmem:[#allocation3 + $0xa8] sm:$0xff] }
 0x21b   : > { %2530 = vrot.lane.b32.xlu1 %v2458_v58, %s5166_s21  ;;  %917 = vst.msk [vmem:[#allocation3 + $0x158] sm:$0xff] %vm873_vm2, %v820_v17 }
 0x21c   : > { %2308 = vst.msk [vmem:[#allocation3 + $0x128] sm:$0xff] %vm873_vm2, %v2244_v59  ;;  %v2118_v60 = vpop.f32.mrf.mxu3 }
 0x21d   : > { %v2261_v25 = vadd.f32 %v2197_v61, %v2118_v60 }
 0x21e   : > { %v6071_v52 = vld [vmem:[#allocation3 + $0x1a8] sm:$0xff]  ;;  %v2078_v7 = vpop.f32.mrf.mxu2 }
 0x21f   : > { %2325 = vst.msk [vmem:[#allocation3 + $0x1b0] sm:$0xff] %vm873_vm2, %v2261_v25  ;;  %v2471_v50 = vrot.slane %v6071_v52, 2  ;;  %v1381_v8 = vpop.f32.mrf.mxu1  ;;  %v2754_v38 = vrot.slane %v6071_v52, 4 }
 0x220   : > { %v1547_v13 = vadd.f32 %v1483_v40, %v1381_v8  ;;  %v2800_v27 = vpop.permute.xlu0 %2799 }
 0x221   : > { %2558 = vrot.lane.b32.xlu0 %v2471_v50, %s5166_s21  ;;  %v2181_v14 = vld [vmem:[#allocation3 + $0x130] sm:$0xff]  ;;  %v2513_v42 = vpop.permute.xlu1 %2512  ;;  %v6087_v15 = vadd.f32 %v2800_v27, %v2639_v29 }
 0x222   : > { %1611 = vst.msk [vmem:[#allocation3 + $0x138] sm:$0xff] %vm873_vm2, %v1547_v13  ;;  %v2245_v22 = vadd.f32 %v2181_v14, %v2078_v7  ;;  %2821 = vrot.lane.b32.xlu2 %v2733_v16, %s5167_s26  ;;  %v823_v46 = vpop.f32.mrf.mxu0  ;;  %v2640_v48 = vadd.f32 %v4966_v31, %v2513_v42  ;;  %v3318_v7 = vrot.slane %v3211_v56, 6  ;;  %v1486_v31 = vld [vmem:[#allocation3 + $0x150] sm:$0xff] }
 0x223   : > { %2819 = vrot.lane.b32.xlu1 %v2731_v21, %s5167_s26  ;;  %918 = vst.msk [vmem:[#allocation3 + $0x160] sm:$0xff] %vm873_vm2, %v823_v46  ;;  %v3209_v58 = vmul.f32 %v6087_v15, %v6087_v15  ;;  %v6109_v40 = vld [vmem:[#allocation3 + $0x128] sm:$0xff] }
 0x224   : > { %2309 = vst.msk [vmem:[#allocation3 + $0x130] sm:$0xff] %vm873_vm2, %v2245_v22  ;;  %v2120_v32 = vpop.f32.mrf.mxu3  ;;  %v2459_v14 = vrot.slane %v6109_v40, 2 }
 0x225   : > { %v2262_v35 = vadd.f32 %v2198_v34, %v2120_v32 }
 0x226   : > { %v6089_v44 = vld [vmem:[#allocation3 + $0x1b0] sm:$0xff]  ;;  %v2080_v45 = vpop.f32.mrf.mxu2 }
 0x227   : > { %2326 = vst.msk [vmem:[#allocation3 + $0x1b8] sm:$0xff] %vm873_vm2, %v2262_v35  ;;  %v1384_v49 = vpop.f32.mrf.mxu1  ;;  %v2472_v18 = vrot.slane %v6089_v44, 2  ;;  %v2755_v11 = vrot.slane %v6089_v44, 4 }
 0x228   : > { %v1548_v54 = vadd.f32 %v1484_v36, %v1384_v49  ;;  %v2521_v56 = vpop.permute.xlu2 %2520 }
 0x229   : > { %2847 = vrot.lane.b32.xlu0 %v2754_v38, %s5167_s26  ;;  %v2473_v39 = vsel %vm2431_vm4, %v2471_v50, %v2472_v18  ;;  %v2182_v55 = vld [vmem:[#allocation3 + $0x138] sm:$0xff]  ;;  %v2802_v19 = vpop.permute.xlu1 %2801  ;;  %v3315_v50 = vrot.slane %v3209_v58, 6  ;;  %v2756_v32 = vsel %vm2688_vm3, %v2754_v38, %v2755_v11 }
 0x22a   : > { %1612 = vst.msk [vmem:[#allocation3 + $0x140] sm:$0xff] %vm873_vm2, %v1548_v54  ;;  %v2246_v59 = vadd.f32 %v2182_v55, %v2080_v45  ;;  %v6102_v60 = vadd.f32 %v2802_v19, %v2640_v48  ;;  %2562 = vrot.lane.b32.xlu2 %v2472_v18, %s5166_s21  ;;  %v825_v21 = vpop.f32.mrf.mxu0  ;;  %v2200_v18 = vld [vmem:[#allocation3 + $0x1c8] sm:$0xff]  ;;  %v2734_v54 = vrot.slane %v6109_v40, 4  ;;  %v3031_v19 = vrot.slane %v6033_v0, 6 }
 0x22b   : > { %2560 = vrot.lane.b32.xlu1 %v2473_v39, %s5166_s21  ;;  %919 = vst.msk [vmem:[#allocation3 + $0x168] sm:$0xff] %vm873_vm2, %v825_v21  ;;  %v6125_v45 = vld [vmem:[#allocation3 + $0x130] sm:$0xff] }
 0x22c   : > { %2310 = vst.msk [vmem:[#allocation3 + $0x138] sm:$0xff] %vm873_vm2, %v2246_v59  ;;  %v2123_v61 = vpop.f32.mrf.mxu3  ;;  %v3210_v25 = vmul.f32 %v6102_v60, %v6102_v60  ;;  %v2460_v38 = vrot.slane %v6125_v45, 2 }
 0x22d   : > { %v2263_v52 = vadd.f32 %v2199_v1, %v2123_v61  ;;  %v3030_v1 = vrot.slane %v6017_v20, 6 }
 0x22e   : > { %v3316_v8 = vrot.slane %v3210_v25, 6  ;;  %v2390_v17 = vld [vmem:[#allocation3 + $0x1b8] sm:$0xff]  ;;  %v2083_v13 = vpop.f32.mrf.mxu2  ;;  %v2461_v25 = vsel %vm2431_vm4, %v2459_v14, %v2460_v38 }
 0x22f   : > { %2327 = vst.msk [vmem:[#allocation3 + $0x1c0] sm:$0xff] %vm873_vm2, %v2263_v52  ;;  %v1386_v42 = vpop.f32.mrf.mxu1  ;;  %v2757_v27 = vrot.slane %v2390_v17, 4  ;;  %v2735_v17 = vrot.slane %v6125_v45, 4 }
 0x230   : > { %v3317_v22 = vsel %vm3009_vm5, %v3315_v50, %v3316_v8  ;;  %v3319_v24 = vsel %vm3009_vm5, %v3316_v8, %v3318_v7  ;;  %v1549_v26 = vadd.f32 %v1485_v4, %v1386_v42  ;;  %v6142_v4 = vsel %vm3009_vm5, %v3030_v1, %v3031_v19  ;;  %v2201_v7 = vld [vmem:[#allocation3 + $0x1d0] sm:$0xff] }
 0x231   : > { %v3421_v16 = vsel %vm3122_vm6, %v3317_v22, 0.0  ;;  %2534 = vrot.lane.b32.xlu0 %v2459_v14, %s5166_s21  ;;  %v2183_v28 = vld [vmem:[#allocation3 + $0x140] sm:$0xff]  ;;  %v3423_v35 = vsel %vm3122_vm6, %v3319_v24, 0.0  ;;  %v2758_v36 = vsel %vm2688_vm3, %v2755_v11, %v2757_v27  ;;  %v1487_v11 = vld [vmem:[#allocation3 + $0x158] sm:$0xff]  ;;  %v3138_v14 = vsel %vm3122_vm6, %v6142_v4, 0.0 }
 0x232   : > { %v3422_v29 = vadd.f32 %v3421_v16, %v6057_v43  ;;  %1613 = vst.msk [vmem:[#allocation3 + $0x148] sm:$0xff] %vm873_vm2, %v1549_v26  ;;  %v2247_v34 = vadd.f32 %v2183_v28, %v2083_v13  ;;  %2851 = vrot.lane.b32.xlu2 %v2758_v36, %s5167_s26  ;;  %v828_v55 = vpop.f32.mrf.mxu0  ;;  %v3036_v42 = vrot.slane %v6102_v60, 6  ;;  %v3033_v16 = vrot.slane %v5965_v5, 6  ;;  %v2359_v36 = vld [vmem:[#allocation3 + $0xc0] sm:$0xff] }
 0x233   : > { %2849 = vrot.lane.b32.xlu1 %v2756_v32, %s5167_s26  ;;  %920 = vst.msk [vmem:[#allocation3 + $0x170] sm:$0xff] %vm873_vm2, %v828_v55  ;;  %v2374_v50 = vld [vmem:[#allocation3 + $0x138] sm:$0xff]  ;;  %v3035_v28 = vrot.slane %v6087_v15, 6  ;;  %v2736_v5 = vsel %vm2688_vm3, %v2734_v54, %v2735_v17 }
 0x234   : > { %v6127_v49 = vadd.f32 %v3423_v35, %v3422_v29  ;;  %2311 = vst.msk [vmem:[#allocation3 + $0x140] sm:$0xff] %vm873_vm2, %v2247_v34  ;;  %v2125_v43 = vpop.f32.mrf.mxu3  ;;  %v2737_v24 = vrot.slane %v2374_v50, 4  ;;  %v6159_v60 = vsel %vm3009_vm5, %v3031_v19, %v3033_v16  ;;  %v3139_v34 = vadd.f32 %v3138_v14, %v5953_v37  ;;  %v2810_v35 = vpop.permute.xlu2 %2809  ;;  %v1488_v19 = vld [vmem:[#allocation3 + $0x160] sm:$0xff]  ;;  %v4967_v50 = vld [vmem:[#allocation3 + $0xc8] sm:$0xff] }
 0x235   : > { %v2264_v46 = vadd.f32 %v2200_v18, %v2125_v43  ;;  %v6166_v15 = vsel %vm3009_vm5, %v3035_v28, %v3036_v42 }
 0x236   : > { %v2085_v48 = vpop.f32.mrf.mxu2 }
 0x237   : > { %2328 = vst.msk [vmem:[#allocation3 + $0x1c8] sm:$0xff] %vm873_vm2, %v2264_v46  ;;  %v1389_v39 = vpop.f32.mrf.mxu1  ;;  %v2644_v46 = vadd.f32 %v2521_v56, %v5839_v3  ;;  %v3140_v3 = vsel %vm3122_vm6, %v6159_v60, 0.0  ;;  %v3038_v56 = vrot.slane %v6085_v57, 6 }
 0x238   : > { %v1550_v58 = vadd.f32 %v1486_v31, %v1389_v39  ;;  %v2517_v59 = vpop.permute.xlu0 %2516  ;;  %v3141_v1 = vadd.f32 %v3140_v3, %v3139_v34 }
 0x239   : > { %2823 = vrot.lane.b32.xlu0 %v2734_v54, %s5167_s26  ;;  %v2184_v61 = vld [vmem:[#allocation3 + $0x148] sm:$0xff]  ;;  %v2642_v31 = vadd.f32 %v2517_v59, %v2359_v36  ;;  %v2933_v39 = vadd.f32 %v2810_v35, %v2644_v46 }
 0x23a   : > { %1614 = vst.msk [vmem:[#allocation3 + $0x150] sm:$0xff] %vm873_vm2, %v1550_v58  ;;  %v2248_v52 = vadd.f32 %v2184_v61, %v2085_v48  ;;  %2538 = vrot.lane.b32.xlu2 %v2460_v38, %s5166_s21  ;;  %v830_v26 = vpop.f32.mrf.mxu0  ;;  %v2738_v38 = vsel %vm2688_vm3, %v2735_v17, %v2737_v24  ;;  %v2202_v48 = vld [vmem:[#allocation3 + $0x1d8] sm:$0xff]  ;;  %v3142_v58 = vsel %vm3122_vm6, %v6166_v15, 0.0 }
 0x23b   : > { %2536 = vrot.lane.b32.xlu1 %v2461_v25, %s5166_s21  ;;  %921 = vst.msk [vmem:[#allocation3 + $0x178] sm:$0xff] %vm873_vm2, %v830_v26  ;;  %v3214_v17 = vmul.f32 %v2933_v39, %v2933_v39 }
 0x23c   : > { %2312 = vst.msk [vmem:[#allocation3 + $0x148] sm:$0xff] %vm873_vm2, %v2248_v52  ;;  %v2128_v0 = vpop.f32.mrf.mxu3 }
 0x23d   : > { %v2265_v8 = vadd.f32 %v2201_v7, %v2128_v0  ;;  %v6183_v7 = vsel %vm3009_vm5, %v3036_v42, %v3038_v56 }
 0x23e   : > { %v6146_v20 = vld [vmem:[#allocation3 + $0x1c8] sm:$0xff]  ;;  %v2088_v13 = vpop.f32.mrf.mxu2  ;;  %v3144_v42 = vsel %vm3122_vm6, %v6183_v7, 0.0 }
 0x23f   : > { %2329 = vst.msk [vmem:[#allocation3 + $0x1d0] sm:$0xff] %vm873_vm2, %v2265_v8  ;;  %v2474_v21 = vrot.slane %v6146_v20, 2  ;;  %v1391_v22 = vpop.f32.mrf.mxu1  ;;  %v2759_v25 = vrot.slane %v6146_v20, 4 }
 0x240   : > { %v1551_v27 = vadd.f32 %v1487_v11, %v1391_v22  ;;  %v2806_v18 = vpop.permute.xlu0 %2805  ;;  %v3143_v11 = vadd.f32 %v3142_v58, %v3141_v1 }
 0x241   : > { %2564 = vrot.lane.b32.xlu0 %v2474_v21, %s5166_s21  ;;  %v2185_v29 = vld [vmem:[#allocation3 + $0x150] sm:$0xff]  ;;  %v2519_v32 = vpop.permute.xlu1 %2518  ;;  %v2931_v55 = vadd.f32 %v2806_v18, %v2642_v31 }
 0x242   : > { %1615 = vst.msk [vmem:[#allocation3 + $0x158] sm:$0xff] %vm873_vm2, %v1551_v27  ;;  %v2249_v43 = vadd.f32 %v2185_v29, %v2088_v13  ;;  %2827 = vrot.lane.b32.xlu2 %v2738_v38, %s5167_s26  ;;  %v2643_v8 = vadd.f32 %v4967_v50, %v2519_v32  ;;  %v3043_v27 = vrot.slane %v2933_v39, 6  ;;  %v2203_v32 = vld [vmem:[#allocation3 + $0x1e0] sm:$0xff]  ;;  %v3145_v36 = vadd.f32 %v3144_v42, %v3143_v11  ;;  %v2204_v42 = vld [vmem:[#allocation3 + $0x1e8] sm:$0xff] }
 0x243   : > { %2825 = vrot.lane.b32.xlu1 %v2736_v5, %s5167_s26  ;;  %v3212_v13 = vmul.f32 %v2931_v55, %v2931_v55  ;;  %v3040_v28 = vrot.slane %v2931_v55, 6  ;;  %v6193_v35 = vld [vmem:[#allocation3 + $0x148] sm:$0xff]  ;;  %v3323_v5 = vrot.slane %v3214_v17, 6 }
 0x244   : > { %2313 = vst.msk [vmem:[#allocation3 + $0x150] sm:$0xff] %vm873_vm2, %v2249_v43  ;;  %v2130_v37 = vpop.f32.mrf.mxu3 }
 0x245   : > { %v2266_v54 = vadd.f32 %v2202_v48, %v2130_v37  ;;  %v3320_v43 = vrot.slane %v3212_v13, 6 }
 0x246   : > { %v6177_v59 = vld [vmem:[#allocation3 + $0x1d0] sm:$0xff]  ;;  %v2090_v61 = vpop.f32.mrf.mxu2 }
 0x247   : > { %2330 = vst.msk [vmem:[#allocation3 + $0x1d8] sm:$0xff] %vm873_vm2, %v2266_v54  ;;  %v1394_v52 = vpop.f32.mrf.mxu1  ;;  %v2475_v0 = vrot.slane %v6177_v59, 2  ;;  %v2760_v37 = vrot.slane %v6177_v59, 4  ;;  %v2462_v54 = vrot.slane %v6193_v35, 2 }
 0x248   : > { %v1552_v57 = vadd.f32 %v1488_v19, %v1394_v52  ;;  %v1489_v19 = vld [vmem:[#allocation3 + $0x168] sm:$0xff]  ;;  %v2527_v1 = vpop.permute.xlu2 %2526 }
 0x249   : > { %2853 = vrot.lane.b32.xlu0 %v2759_v25, %s5167_s26  ;;  %v2476_v14 = vsel %vm2431_vm4, %v2474_v21, %v2475_v0  ;;  %v2186_v22 = vld [vmem:[#allocation3 + $0x158] sm:$0xff]  ;;  %v2808_v24 = vpop.permute.xlu1 %2807  ;;  %v2761_v17 = vsel %vm2688_vm3, %v2759_v25, %v2760_v37  ;;  %v1490_v25 = vld [vmem:[#allocation3 + $0x170] sm:$0xff] }
 0x24a   : > { %1616 = vst.msk [vmem:[#allocation3 + $0x160] sm:$0xff] %vm873_vm2, %v1552_v57  ;;  %v2250_v26 = vadd.f32 %v2186_v22, %v2090_v61  ;;  %v2932_v16 = vadd.f32 %v2808_v24, %v2643_v8  ;;  %2568 = vrot.lane.b32.xlu2 %v2475_v0, %s5166_s21 }
 0x24b   : > { %2566 = vrot.lane.b32.xlu1 %v2476_v14, %s5166_s21  ;;  %v6218_v24 = vld [vmem:[#allocation3 + $0x150] sm:$0xff] }
 0x24c   : > { %2314 = vst.msk [vmem:[#allocation3 + $0x158] sm:$0xff] %vm873_vm2, %v2250_v26  ;;  %v2133_v29 = vpop.f32.mrf.mxu3  ;;  %v3041_v21 = vrot.slane %v2932_v16, 6  ;;  %v3213_v34 = vmul.f32 %v2932_v16, %v2932_v16 }
 0x24d   : > { %v2267_v18 = vadd.f32 %v2203_v32, %v2133_v29  ;;  %v2739_v32 = vrot.slane %v6193_v35, 4 }
 0x24e   : > { %v6196_v46 = vsel %vm3009_vm5, %v3040_v28, %v3041_v21  ;;  %v6199_v31 = vsel %vm3009_vm5, %v3041_v21, %v3043_v27  ;;  %v3321_v38 = vrot.slane %v3213_v34, 6  ;;  %v2093_v48 = vpop.f32.mrf.mxu2  ;;  %v2394_v61 = vld [vmem:[#allocation3 + $0x1d8] sm:$0xff]  ;;  %v2463_v28 = vrot.slane %v6218_v24, 2 }
 0x24f   : > { %2331 = vst.msk [vmem:[#allocation3 + $0x1e0] sm:$0xff] %vm873_vm2, %v2267_v18  ;;  %v3146_v39 = vsel %vm3122_vm6, %v6196_v46, 0.0  ;;  %v1396_v55 = vpop.f32.mrf.mxu1  ;;  %v3148_v52 = vsel %vm3122_vm6, %v6199_v31, 0.0  ;;  %v2762_v14 = vrot.slane %v2394_v61, 4 }
 0x250   : > { %v3147_v3 = vadd.f32 %v3146_v39, %v3145_v36  ;;  %v3322_v56 = vsel %vm3009_vm5, %v3320_v43, %v3321_v38  ;;  %v3324_v58 = vsel %vm3009_vm5, %v3321_v38, %v3323_v5  ;;  %v1553_v11 = vadd.f32 %v1489_v19, %v1396_v55  ;;  %v1491_v55 = vld [vmem:[#allocation3 + $0x178] sm:$0xff] }
 0x251   : > { %v3425_v0 = vsel %vm3122_vm6, %v3322_v56, 0.0  ;;  %2540 = vrot.lane.b32.xlu0 %v2462_v54, %s5166_s21  ;;  %v2187_v50 = vld [vmem:[#allocation3 + $0x160] sm:$0xff]  ;;  %v3427_v13 = vsel %vm3122_vm6, %v3324_v58, 0.0  ;;  %v2763_v27 = vsel %vm2688_vm3, %v2760_v37, %v2762_v14  ;;  %v2464_v36 = vsel %vm2431_vm4, %v2462_v54, %v2463_v28  ;;  %v2816_v5 = vpop.permute.xlu2 %2815  ;;  %v2205_v37 = vld [vmem:[#allocation3 + $0x1f0] sm:$0xff] }
 0x252   : > { %v6212_v8 = vadd.f32 %v3148_v52, %v3147_v3  ;;  %v3426_v57 = vadd.f32 %v3425_v0, %v6127_v49  ;;  %v2251_v22 = vadd.f32 %v2187_v50, %v2093_v48  ;;  %1617 = vst.msk [vmem:[#allocation3 + $0x168] sm:$0xff] %vm873_vm2, %v1553_v11  ;;  %2857 = vrot.lane.b32.xlu2 %v2763_v27, %s5167_s26  ;;  %v2740_v3 = vrot.slane %v6218_v24, 4  ;;  %v2363_v14 = vld [vmem:[#allocation3 + $0xe0] sm:$0xff]  ;;  %v2206_v27 = vld [vmem:[#allocation3 + $0x1f8] sm:$0xff] }
 0x253   : > { %2855 = vrot.lane.b32.xlu1 %v2761_v17, %s5167_s26  ;;  %v2378_v56 = vld [vmem:[#allocation3 + $0x158] sm:$0xff] }
 0x254   : > { %v6220_v26 = vadd.f32 %v3427_v13, %v3426_v57  ;;  %v2135_v16 = vpop.f32.mrf.mxu3  ;;  %2315 = vst.msk [vmem:[#allocation3 + $0x160] sm:$0xff] %vm873_vm2, %v2251_v22  ;;  %v2742_v0 = vrot.slane %v2378_v56, 4  ;;  %v2741_v11 = vsel %vm2688_vm3, %v2739_v32, %v2740_v3  ;;  %v2647_v13 = vadd.f32 %v2527_v1, %v5925_v62 }
 0x255   : > { %v2268_v49 = vadd.f32 %v2204_v42, %v2135_v16 }
 0x256   : > { %v2095_v29 = vpop.f32.mrf.mxu2 }
 0x257   : > { %2332 = vst.msk [vmem:[#allocation3 + $0x1e8] sm:$0xff] %vm873_vm2, %v2268_v49  ;;  %v1399_v21 = vpop.f32.mrf.mxu1  ;;  %v2936_v49 = vadd.f32 %v2816_v5, %v2647_v13 }
 0x258   : > { %v1554_v34 = vadd.f32 %v1490_v25, %v1399_v21  ;;  %v2523_v48 = vpop.permute.xlu0 %2522  ;;  %v2743_v25 = vsel %vm2688_vm3, %v2740_v3, %v2742_v0 }
 0x259   : > { %2829 = vrot.lane.b32.xlu0 %v2739_v32, %s5167_s26  ;;  %v2188_v43 = vld [vmem:[#allocation3 + $0x168] sm:$0xff]  ;;  %v2645_v22 = vadd.f32 %v2523_v48, %v2363_v14  ;;  %v3048_v56 = vrot.slane %v2936_v49, 6 }
 0x25a   : > { %1618 = vst.msk [vmem:[#allocation3 + $0x170] sm:$0xff] %vm873_vm2, %v1554_v34  ;;  %v2252_v18 = vadd.f32 %v2188_v43, %v2095_v29  ;;  %2544 = vrot.lane.b32.xlu2 %v2463_v28, %s5166_s21 }
 0x25b   : > { %2542 = vrot.lane.b32.xlu1 %v2464_v36, %s5166_s21  ;;  %v3217_v36 = vmul.f32 %v2936_v49, %v2936_v49 }
 0x25c   : > { %v2138_v38 = vpop.f32.mrf.mxu3  ;;  %2316 = vst.msk [vmem:[#allocation3 + $0x168] sm:$0xff] %vm873_vm2, %v2252_v18 }
 0x25d   : > { %v2269_v39 = vadd.f32 %v2205_v37, %v2138_v38  ;;  %v3328_v0 = vrot.slane %v3217_v36, 6 }
 0x25e   : > { %v6235_v19 = vld [vmem:[#allocation3 + $0x1e8] sm:$0xff]  ;;  %v2098_v61 = vpop.f32.mrf.mxu2 }
 0x25f   : > { %2333 = vst.msk [vmem:[#allocation3 + $0x1f0] sm:$0xff] %vm873_vm2, %v2269_v39  ;;  %v2477_v54 = vrot.slane %v6235_v19, 2  ;;  %v1401_v58 = vpop.f32.mrf.mxu1  ;;  %v2764_v62 = vrot.slane %v6235_v19, 4 }
 0x260   : > { %v1555_v52 = vadd.f32 %v1491_v55, %v1401_v58  ;;  %v2812_v29 = vpop.permute.xlu0 %2811  ;;  %v5169_v55 = vmov 1934713408  }
 0x261   : > { %2570 = vrot.lane.b32.xlu0 %v2477_v54, %s5166_s21  ;;  %v2189_v50 = vld [vmem:[#allocation3 + $0x170] sm:$0xff]  ;;  %v2525_v57 = vpop.permute.xlu1 %2524  ;;  %v2934_v32 = vadd.f32 %v2812_v29, %v2645_v22  ;;  %v3526_v3 = vunpack.c.l.s4 %v5169_v55 }
 0x262   : > { %1619 = vst.msk [vmem:[#allocation3 + $0x178] sm:$0xff] %vm873_vm2, %v1555_v52  ;;  %v2253_v17 = vadd.f32 %v2189_v50, %v2098_v61  ;;  %2833 = vrot.lane.b32.xlu2 %v2743_v25, %s5167_s26  ;;  %v2646_v34 = vadd.f32 %v2525_v57, %v5905_v47 }
 0x263   : > { %2831 = vrot.lane.b32.xlu1 %v2741_v11, %s5167_s26  ;;  %v3215_v37 = vmul.f32 %v2934_v32, %v2934_v32  ;;  %v3045_v58 = vrot.slane %v2934_v32, 6  ;;  %v6258_v52 = vld [vmem:[#allocation3 + $0x168] sm:$0xff] }
 0x264   : > { %v2557_v16 = vpop.permute.xlu2 %2556  ;;  %2317 = vst.msk [vmem:[#allocation3 + $0x170] sm:$0xff] %vm873_vm2, %v2253_v17  ;;  %v2140_v42 = vpop.f32.mrf.mxu3  ;;  %v2465_v25 = vrot.slane %v6258_v52, 2 }
 0x265   : > { %v2270_v28 = vadd.f32 %v2206_v27, %v2140_v42  ;;  %v2662_v50 = vadd.f32 %v2557_v16, %v6021_v51  ;;  %v3325_v11 = vrot.slane %v3215_v37, 6  ;;  %v3511_v51 = vrot.slane %v6166_v15, 4 }
 0x266   : > { %v6248_v21 = vld [vmem:[#allocation3 + $0x1f0] sm:$0xff]  ;;  %v2100_v43 = vpop.f32.mrf.mxu2 }
 0x267   : > { %2334 = vst.msk [vmem:[#allocation3 + $0x1f8] sm:$0xff] %vm873_vm2, %v2270_v28  ;;  %v2478_v1 = vrot.slane %v6248_v21, 2  ;;  %v2765_v57 = vrot.slane %v6248_v21, 4 }
 0x269   : > { %2859 = vrot.lane.b32.xlu0 %v2764_v62, %s5167_s26  ;;  %v2479_v5 = vsel %vm2431_vm4, %v2477_v54, %v2478_v1  ;;  %v2190_v18 = vld [vmem:[#allocation3 + $0x178] sm:$0xff]  ;;  %v2814_v38 = vpop.permute.xlu1 %2813  ;;  %v3497_v54 = vrot.slane %v6196_v46, 4  ;;  %v2766_v36 = vsel %vm2688_vm3, %v2764_v62, %v2765_v57 }
 0x26a   : > { %v2254_v48 = vadd.f32 %v2190_v18, %v2100_v43  ;;  %v2935_v39 = vadd.f32 %v2814_v38, %v2646_v34  ;;  %2574 = vrot.lane.b32.xlu2 %v2478_v1, %s5166_s21 }
 0x26b   : > { %2572 = vrot.lane.b32.xlu1 %v2479_v5, %s5166_s21  ;;  %v3498_v5 = vsel %vm3473_vm7, %v3497_v54, %v6142_v4  ;;  %v6291_v55 = vld [vmem:[#allocation3 + $0x170] sm:$0xff] }
 0x26c   : > { %2318 = vst.msk [vmem:[#allocation3 + $0x178] sm:$0xff] %vm873_vm2, %v2254_v48  ;;  %v3046_v47 = vrot.slane %v2935_v39, 6  ;;  %v3216_v61 = vmul.f32 %v2935_v39, %v2935_v39  ;;  %v2846_v17 = vpop.permute.xlu2 %2845  ;;  %v2466_v54 = vrot.slane %v6291_v55, 2 }
 0x26d   : > { %v6268_v42 = vadd.f32 %v2846_v17, %v2662_v50  ;;  %v2744_v50 = vrot.slane %v6258_v52, 4 }
 0x26e   : > { %v3047_v13 = vsel %vm3009_vm5, %v3045_v58, %v3046_v47  ;;  %v6266_v14 = vsel %vm3009_vm5, %v3046_v47, %v3048_v56  ;;  %v3326_v22 = vrot.slane %v3216_v61, 6  ;;  %v2398_v32 = vld [vmem:[#allocation3 + $0x1f8] sm:$0xff]  ;;  %v3504_v56 = vperm.slane %v3498_v5, %v5893_v30 }
 0x26f   : > { %v3150_v27 = vsel %vm3122_vm6, %v3047_v13, 0.0  ;;  %v3509_v49 = vrot.slane %v3047_v13, 4  ;;  %v3152_v1 = vsel %vm3122_vm6, %v6266_v14, 0.0  ;;  %v3512_v38 = vsel %vm3473_vm7, %v3047_v13, %v3511_v51 }
 0x270   : > { %v3151_v16 = vadd.f32 %v3150_v27, %v6212_v8  ;;  %v3327_v28 = vsel %vm3009_vm5, %v3325_v11, %v3326_v22  ;;  %v3329_v29 = vsel %vm3009_vm5, %v3326_v22, %v3328_v0  ;;  %v2767_v48 = vrot.slane %v2398_v32, 4  ;;  %v2383_v22 = vld [vmem:[#allocation3 + $0x180] sm:$0xff] }
 0x271   : > { %v3429_v34 = vsel %vm3122_vm6, %v3327_v28, 0.0  ;;  %2546 = vrot.lane.b32.xlu0 %v2465_v25, %s5166_s21  ;;  %v3510_v18 = vsel %vm3473_vm7, %v3509_v49, %v6166_v15  ;;  %v3431_v37 = vsel %vm3122_vm6, %v3329_v29, 0.0  ;;  %v6297_v58 = vperm.slane %v3512_v38, %v5893_v30 }
 0x272   : > { %v6283_v43 = vadd.f32 %v3152_v1, %v3151_v16  ;;  %v3430_v8 = vadd.f32 %v3429_v34, %v6220_v26  ;;  %v2768_v26 = vsel %vm2688_vm3, %v2765_v57, %v2767_v48  ;;  %v3516_v15 = vperm.slane %v3510_v18, %v5893_v30 }
 0x273   : > { %2861 = vrot.lane.b32.xlu1 %v2766_v36, %s5167_s26  ;;  %v2553_v39 = vpop.permute.xlu0 %2552  ;;  %v3499_v47 = vrot.slane %v6142_v4, 4  ;;  %2863 = vrot.lane.b32.xlu2 %v2768_v26, %s5167_s26  ;;  %v6304_v0 = vunpack.c.0.s8 %v3526_v3  ;;  %v3547_v13 = vrot.slane %v3504_v56, 4  ;;  %v3557_v4 = vrot.slane %v6297_v58, 4 }
 0x274   : > { %v6293_v62 = vadd.f32 %v3431_v37, %v3430_v8  ;;  %v2533_v61 = vpop.permute.xlu2 %2532  ;;  %v3545_v11 = vrot.slane %v3516_v15, 4  ;;  %v2660_v3 = vadd.f32 %v2553_v39, %v2383_v22  ;;  %v2467_v49 = vsel %vm2431_vm4, %v2465_v25, %v2466_v54 }
 0x275   : > { %v3500_v17 = vsel %vm3473_vm7, %v6196_v46, %v3499_v47  ;;  %v6311_v57 = vperm.slane %v5982_v2, %v6304_v0  ;;  %v3548_v46 = vsel %vm3473_vm7, %v3516_v15, %v3547_v13  ;;  %v2650_v32 = vadd.f32 %v2533_v61, %v6055_v41 }
 0x276   : > { %v3546_v27 = vsel %vm3473_vm7, %v3545_v11, %v3504_v56  ;;  %v3508_v16 = vperm.slane %v3500_v17, %v5893_v30  ;;  %v3556_v34 = vperm.slane %v3548_v46, %v6304_v0  ;;  %v2745_v8 = vrot.slane %v6291_v55, 4  ;;  %v2382_v17 = vld [vmem:[#allocation3 + $0x178] sm:$0xff] }
 0x277   : > { %v6318_v51 = vperm.slane %v3546_v27, %v6304_v0  ;;  %v3571_v29 = vrot.slane %v6311_v57, 4  ;;  %v3532_v38 = vperm.slane %v5974_v63, %v6304_v0  ;;  %v3735_v48 = vrot.slane %v6183_v7, 4 }
 0x278   : > { %v3558_v25 = vsel %vm3473_vm7, %v3557_v4, %v3508_v16  ;;  %v3573_v37 = vrot.slane %v3556_v34, 4  ;;  %v3733_v39 = vrot.slane %v6266_v14, 4  ;;  %v2746_v56 = vsel %vm2688_vm3, %v2744_v50, %v2745_v8 }
 0x279   : > { %2835 = vrot.lane.b32.xlu0 %v2744_v50, %s5167_s26  ;;  %v3572_v5 = vsel %vm3473_vm7, %v6318_v51, %v3571_v29  ;;  %v6336_v41 = vperm.slane %v3558_v25, %v6304_v0  ;;  %v3232_v26 = vmul.f32 %v6268_v42, %v6268_v42  ;;  %v6347_v63 = vperm.slane %v5988_v9, %v6304_v0 }
 0x27a   : > { %v3575_v47 = vrot.slane %v3532_v38, 4  ;;  %v3736_v61 = vsel %vm3473_vm7, %v6266_v14, %v3735_v48  ;;  %v3559_v50 = vrot.slane %v3508_v16, 4  ;;  %v3723_v13 = vrot.slane %v6159_v60, 4 }
 0x27b   : > { %2548 = vrot.lane.b32.xlu1 %v2467_v49, %s5166_s21  ;;  %v2842_v2 = vpop.permute.xlu0 %2841  ;;  %2550 = vrot.lane.b32.xlu2 %v2466_v54, %s5166_s21  ;;  %v3577_v11 = vrot.slane %v6336_v41, 4  ;;  %v3574_v22 = vsel %vm3473_vm7, %v3573_v37, %v3532_v38  ;;  %v3544_v9 = vperm.slane %v5991_v10, %v6304_v0  ;;  %v3734_v14 = vsel %vm3473_vm7, %v3733_v39, %v6183_v7 }
 0x27c   : > { %v2949_v28 = vadd.f32 %v2842_v2, %v2660_v3  ;;  %v2822_v36 = vpop.permute.xlu2 %2821  ;;  %v3721_v3 = vrot.slane %v6199_v31, 4  ;;  %v3560_v46 = vsel %vm3473_vm7, %v6297_v58, %v3559_v50  ;;  %v3073_v16 = vrot.slane %v6268_v42, 6 }
 0x27d   : > { %v2555_v1 = vpop.permute.xlu1 %2554  ;;  %v6331_v18 = vadd.f32 %v2822_v36, %v2650_v32  ;;  %v3353_v2 = vrot.slane %v3232_v26, 6  ;;  %v6365_v29 = vperm.slane %v3736_v61, %v5893_v30  ;;  %v2747_v10 = vrot.slane %v2382_v17, 4 }
 0x27e   : > { %v2661_v54 = vadd.f32 %v2555_v1, %v6008_v23  ;;  %v3230_v4 = vmul.f32 %v2949_v28, %v2949_v28  ;;  %v3070_v32 = vrot.slane %v2949_v28, 6  ;;  %v3578_v7 = vsel %vm3473_vm7, %v3577_v11, %v6347_v63 }
 0x27f   : > { %v3576_v58 = vsel %vm3473_vm7, %v3556_v34, %v3575_v47  ;;  %v3568_v42 = vperm.slane %v3560_v46, %v6304_v0  ;;  %v3740_v38 = vperm.slane %v3734_v14, %v5893_v30  ;;  %v3722_v34 = vsel %vm3473_vm7, %v3721_v3, %v6159_v60 }
 0x280   : > { %v3350_v36 = vrot.slane %v3230_v4, 6  ;;  %v3583_v50 = vrot.slane %v3544_v9, 4 }
 0x281   : > { %3923 = vrot.lane.b32.xlu0 %v3572_v5, %s5170_s30  ;;  %v2367_v5 = vld [vmem:[#allocation3 + $0x100] sm:$0xff]  ;;  %v3581_v4 = vrot.slane %v3568_v42, 4 }
 0x282   : > { %v3584_v14 = vsel %vm3473_vm7, %v3568_v42, %v3583_v50  ;;  %v2387_v50 = vld [vmem:[#allocation3 + $0x1a0] sm:$0xff] }
 0x283   : > { %2837 = vrot.lane.b32.xlu1 %v2746_v56, %s5167_s26  ;;  %v2529_v15 = vpop.permute.xlu0 %2528  ;;  %3931 = vrot.lane.b32.xlu2 %v3574_v22, %s5171_s5  ;;  %v3724_v56 = vsel %vm3473_vm7, %v6199_v31, %v3723_v13  ;;  %v2748_v31 = vsel %vm2688_vm3, %v2745_v8, %v2747_v10  ;;  %v3728_v22 = vperm.slane %v3722_v34, %v5893_v30  ;;  %v3053_v34 = vrot.slane %v6331_v18, 6 }
 0x284   : > { %v2563_v49 = vpop.permute.xlu2 %2562  ;;  %v2648_v37 = vadd.f32 %v2529_v15, %v2367_v5  ;;  %v3732_v13 = vperm.slane %v3724_v56, %v5893_v30 }
 0x285   : > { %v2844_v27 = vpop.permute.xlu1 %2843  ;;  %v2665_v11 = vadd.f32 %v2563_v49, %v6089_v44  ;;  %v6401_v44 = vperm.slane %v5996_v6, %v6304_v0  ;;  %v6408_v49 = vperm.slane %v5999_v33, %v6304_v0 }
 0x286   : > { %v2950_v23 = vadd.f32 %v2844_v27, %v2661_v54  ;;  %v3781_v54 = vrot.slane %v6365_v29, 4  ;;  %v3769_v27 = vrot.slane %v3740_v38, 4 }
 0x288   : > { %v3071_v1 = vrot.slane %v2950_v23, 6  ;;  %v3231_v25 = vmul.f32 %v2950_v23, %v2950_v23  ;;  %v3782_v8 = vsel %vm3473_vm7, %v3781_v54, %v3732_v13  ;;  %v3582_v23 = vsel %vm3473_vm7, %v3581_v4, %v3544_v9 }
 0x289   : > { %3947 = vrot.lane.b32.xlu0 %v3578_v7, %s5172_s24  ;;  %v3770_v46 = vsel %vm3473_vm7, %v3769_v27, %v3728_v22  ;;  %v3788_v6 = vperm.slane %v3782_v8, %v6304_v0  ;;  %v3803_v9 = vrot.slane %v6401_v44, 4  ;;  %v3220_v7 = vmul.f32 %v6331_v18, %v6331_v18 }
 0x28a   : > { %v6374_v48 = vsel %vm3009_vm5, %v3070_v32, %v3071_v1  ;;  %v6377_v28 = vsel %vm3009_vm5, %v3071_v1, %v3073_v16  ;;  %v3351_v39 = vrot.slane %v3231_v25, 6  ;;  %v3771_v16 = vrot.slane %v3728_v22, 4  ;;  %v4968_v1 = vld [vmem:[#allocation3 + $0x108] sm:$0xff] }
 0x28b   : > { %3939 = vrot.lane.b32.xlu1 %v3576_v58, %s5173_s27  ;;  %v2818_v26 = vpop.permute.xlu0 %2817  ;;  %2839 = vrot.lane.b32.xlu2 %v2748_v31, %s5167_s26  ;;  %v3756_v32 = vperm.slane %v6003_v12, %v6304_v0  ;;  %v6423_v58 = vperm.slane %v3770_v46, %v6304_v0  ;;  %v3333_v31 = vrot.slane %v3220_v7, 6 }
 0x28c   : > { %v6385_v47 = vsel %vm3009_vm5, %v3350_v36, %v3351_v39  ;;  %v6388_v15 = vsel %vm3009_vm5, %v3351_v39, %v3353_v2  ;;  %v2937_v61 = vadd.f32 %v2818_v26, %v2648_v37  ;;  %v2852_v60 = vpop.permute.xlu2 %2851  ;;  %v3579_v2 = vrot.slane %v6347_v63, 4 }
 0x28d   : > { %v2531_v17 = vpop.permute.xlu1 %2530  ;;  %v6396_v3 = vadd.f32 %v2852_v60, %v2665_v11  ;;  %v3772_v33 = vsel %vm3473_vm7, %v3740_v38, %v3771_v16  ;;  %v3795_v37 = vrot.slane %v6408_v49, 4  ;;  %v3783_v39 = vrot.slane %v3732_v13, 4 }
 0x28e   : > { %v2649_v25 = vadd.f32 %v4968_v1, %v2531_v17  ;;  %v3218_v36 = vmul.f32 %v2937_v61, %v2937_v61  ;;  %v3580_v5 = vsel %vm3473_vm7, %v6336_v41, %v3579_v2  ;;  %v3804_v38 = vsel %vm3473_vm7, %v3788_v6, %v3803_v9 }
 0x28f   : > { %v3780_v56 = vperm.slane %v3772_v33, %v6304_v0  ;;  %v3799_v26 = vrot.slane %v3756_v32, 4  ;;  %v3050_v41 = vrot.slane %v2937_v61, 6  ;;  %v3796_v60 = vsel %vm3473_vm7, %v6423_v58, %v3795_v37 }
 0x290   : > { %v3330_v17 = vrot.slane %v3218_v36, 6  ;;  %v3784_v13 = vsel %vm3473_vm7, %v6365_v29, %v3783_v39 }
 0x291   : > { %3971 = vrot.lane.b32.xlu0 %v3584_v14, %s5166_s21  ;;  %v3800_v14 = vsel %vm3473_vm7, %v3780_v56, %v3799_v26  ;;  %v6453_v33 = vperm.slane %v3784_v13, %v6304_v0  ;;  %v3235_v26 = vmul.f32 %v6396_v3, %v6396_v3 }
 0x293   : > { %3963 = vrot.lane.b32.xlu1 %v3582_v23, %s5167_s26  ;;  %v2559_v10 = vpop.permute.xlu0 %2558  ;;  %3955 = vrot.lane.b32.xlu2 %v3580_v5, %s5174_s28  ;;  %v3797_v23 = vrot.slane %v3780_v56, 4  ;;  %v3801_v5 = vrot.slane %v3788_v6, 4 }
 0x294   : > { %v2539_v42 = vpop.permute.xlu2 %2538  ;;  %v2663_v4 = vadd.f32 %v2559_v10, %v2387_v50  ;;  %v3358_v50 = vrot.slane %v3235_v26, 6 }
 0x295   : > { %v2820_v63 = vpop.permute.xlu1 %2819  ;;  %v3798_v39 = vsel %vm3473_vm7, %v3797_v23, %v3756_v32  ;;  %v2371_v23 = vld [vmem:[#allocation3 + $0x120] sm:$0xff] }
 0x296   : > { %v2938_v12 = vadd.f32 %v2820_v63, %v2649_v25  ;;  %v2653_v25 = vadd.f32 %v2539_v42, %v6125_v45  ;;  %v3805_v45 = vrot.slane %v6453_v33, 4  ;;  %v3802_v42 = vsel %vm3473_vm7, %v3801_v5, %v6401_v44 }
 0x298   : > { %v3051_v54 = vrot.slane %v2938_v12, 6  ;;  %v3219_v11 = vmul.f32 %v2938_v12, %v2938_v12 }
 0x299   : > { %4011 = vrot.lane.b32.xlu0 %v3804_v38, %s5174_s28  ;;  %v4969_v38 = vld [vmem:[#allocation3 + $0x1a8] sm:$0xff] }
 0x29a   : > { %v6436_v22 = vsel %vm3009_vm5, %v3050_v41, %v3051_v54  ;;  %v6439_v18 = vsel %vm3009_vm5, %v3051_v54, %v3053_v34  ;;  %v3331_v61 = vrot.slane %v3219_v11, 6  ;;  %v3078_v11 = vrot.slane %v6396_v3, 6 }
 0x29b   : > { %v3154_v27 = vsel %vm3122_vm6, %v6436_v22, 0.0  ;;  %3979 = vrot.lane.b32.xlu1 %v3796_v60, %s5170_s30  ;;  %v2848_v8 = vpop.permute.xlu0 %2847  ;;  %v3156_v10 = vsel %vm3122_vm6, %v6439_v18, 0.0  ;;  %3995 = vrot.lane.b32.xlu2 %v3800_v14, %s5173_s27 }
 0x29c   : > { %v3155_v46 = vadd.f32 %v3154_v27, %v6283_v43  ;;  %v3332_v29 = vsel %vm3009_vm5, %v3330_v17, %v3331_v61  ;;  %v3334_v16 = vsel %vm3009_vm5, %v3331_v61, %v3333_v31  ;;  %v2952_v2 = vadd.f32 %v2848_v8, %v2663_v4  ;;  %v2828_v43 = vpop.permute.xlu2 %2827 }
 0x29d   : > { %v3433_v1 = vsel %vm3122_vm6, %v3332_v29, 0.0  ;;  %v2561_v9 = vpop.permute.xlu1 %2560  ;;  %v3435_v63 = vsel %vm3122_vm6, %v3334_v16, 0.0  ;;  %v2942_v12 = vadd.f32 %v2828_v43, %v2653_v25 }
 0x29e   : > { %v3157_v7 = vadd.f32 %v3156_v10, %v3155_v46  ;;  %v3434_v36 = vadd.f32 %v3433_v1, %v6293_v62  ;;  %v6466_v62 = vperm.slane %v6006_v53, %v6304_v0  ;;  %v2664_v56 = vadd.f32 %v4969_v38, %v2561_v9 }
 0x29f   : > { %v3233_v41 = vmul.f32 %v2952_v2, %v2952_v2  ;;  %v3075_v31 = vrot.slane %v2952_v2, 6  ;;  %v3223_v9 = vmul.f32 %v2942_v12, %v2942_v12 }
 0x2a0   : > { %v3436_v37 = vadd.f32 %v3435_v63, %v3434_v36  ;;  %v3806_v32 = vsel %vm3473_vm7, %v3805_v45, %v6466_v62  ;;  %v3058_v63 = vrot.slane %v2942_v12, 6 }
 0x2a1   : > { %3987 = vrot.lane.b32.xlu0 %v3798_v39, %s5171_s5  ;;  %v3355_v60 = vrot.slane %v3233_v41, 6 }
 0x2a3   : > { %4003 = vrot.lane.b32.xlu1 %v3802_v42, %s5172_s24  ;;  %v2535_v6 = vpop.permute.xlu0 %2534  ;;  %4019 = vrot.lane.b32.xlu2 %v3806_v32, %s5167_s26 }
 0x2a4   : > { %v2569_v54 = vpop.permute.xlu2 %2568  ;;  %v2651_v29 = vadd.f32 %v2535_v6, %v2371_v23 }
 0x2a5   : > { %v2850_v34 = vpop.permute.xlu1 %2849  ;;  %v2668_v46 = vadd.f32 %v2569_v54, %v6177_v59 }
 0x2a6   : > { %v2953_v44 = vadd.f32 %v2850_v34, %v2664_v56  ;;  %v3338_v56 = vrot.slane %v3223_v9, 6  ;;  %v2391_v9 = vld [vmem:[#allocation3 + $0x1c0] sm:$0xff] }
 0x2a8   : > { %v3076_v53 = vrot.slane %v2953_v44, 6  ;;  %v3234_v17 = vmul.f32 %v2953_v44, %v2953_v44 }
 0x2aa   : > { %v6475_v13 = vsel %vm3009_vm5, %v3075_v31, %v3076_v53  ;;  %v6478_v4 = vsel %vm3009_vm5, %v3076_v53, %v3078_v11  ;;  %v3356_v61 = vrot.slane %v3234_v17, 6 }
 0x2ab   : > { %v2824_v27 = vpop.permute.xlu0 %2823 }
 0x2ac   : > { %v6481_v14 = vsel %vm3009_vm5, %v3355_v60, %v3356_v61  ;;  %v6484_v8 = vsel %vm3009_vm5, %v3356_v61, %v3358_v50  ;;  %v2858_v16 = vpop.permute.xlu2 %2857  ;;  %v2940_v10 = vadd.f32 %v2824_v27, %v2651_v29 }
 0x2ad   : > { %v2537_v3 = vpop.permute.xlu1 %2536  ;;  %v6487_v2 = vadd.f32 %v2858_v16, %v2668_v46 }
 0x2ae   : > { %v2652_v25 = vadd.f32 %v2537_v3, %v6109_v40  ;;  %v3221_v43 = vmul.f32 %v2940_v10, %v2940_v10  ;;  %v3055_v39 = vrot.slane %v2940_v10, 6 }
 0x2af   : > { %v3083_v46 = vrot.slane %v6487_v2, 6 }
 0x2b0   : > { %v3335_v26 = vrot.slane %v3221_v43, 6 }
 0x2b3   : > { %v2565_v1 = vpop.permute.xlu0 %2564 }
 0x2b4   : > { %v2545_v38 = vpop.permute.xlu2 %2544  ;;  %v2666_v43 = vadd.f32 %v2565_v1, %v2391_v9  ;;  %v6529_v1 = vsel %vm3122_vm6, %v6374_v48, 0.0  ;;  %v6568_v9 = vsel %vm3122_vm6, %v6484_v8, 0.0 }
 0x2b5   : > { %v2826_v36 = vpop.permute.xlu1 %2825 }
 0x2b6   : > { %v2941_v5 = vadd.f32 %v2826_v36, %v2652_v25  ;;  %v3835_v25 = vrot.slane %v6377_v28, 4 }
 0x2b8   : > { %v3056_v45 = vrot.slane %v2941_v5, 6  ;;  %v3222_v42 = vmul.f32 %v2941_v5, %v2941_v5 }
 0x2ba   : > { %v6491_v59 = vsel %vm3009_vm5, %v3055_v39, %v3056_v45  ;;  %v6494_v6 = vsel %vm3009_vm5, %v3056_v45, %v3058_v63  ;;  %v3336_v32 = vrot.slane %v3222_v42, 6  ;;  %v3569_v39 = vrot.slane %v6318_v51, 4 }
 0x2bb   : > { %v3158_v40 = vsel %vm3122_vm6, %v6491_v59, 0.0  ;;  %v2854_v34 = vpop.permute.xlu0 %2853  ;;  %v3160_v54 = vsel %vm3122_vm6, %v6494_v6, 0.0  ;;  %v3611_v51 = vrot.slane %v6374_v48, 4 }
 0x2bc   : > { %v3159_v41 = vadd.f32 %v3158_v40, %v3157_v7  ;;  %v3337_v12 = vsel %vm3009_vm5, %v3335_v26, %v3336_v32  ;;  %v3339_v44 = vsel %vm3009_vm5, %v3336_v32, %v3338_v56  ;;  %v2834_v61 = vpop.permute.xlu2 %2833  ;;  %v2955_v45 = vadd.f32 %v2854_v34, %v2666_v43  ;;  %v2375_v34 = vld [vmem:[#allocation3 + $0x140] sm:$0xff] }
 0x2bd   : > { %v3437_v11 = vsel %vm3122_vm6, %v3337_v12, 0.0  ;;  %v2567_v31 = vpop.permute.xlu1 %2566  ;;  %v3439_v50 = vsel %vm3122_vm6, %v3339_v44, 0.0  ;;  %v2656_v56 = vadd.f32 %v2545_v38, %v6218_v24  ;;  %v6525_v40 = vsel %vm3473_vm7, %v3569_v39, %v6311_v57 }
 0x2be   : > { %v6503_v53 = vadd.f32 %v3160_v54, %v3159_v41  ;;  %v3438_v17 = vadd.f32 %v3437_v11, %v3436_v37  ;;  %v2667_v7 = vadd.f32 %v2567_v31, %v6146_v20  ;;  %v3080_v26 = vrot.slane %v2955_v45, 6 }
 0x2bf   : > { %v6533_v41 = vsel %vm3122_vm6, %v6377_v28, 0.0  ;;  %v2945_v24 = vadd.f32 %v2834_v61, %v2656_v56  ;;  %v6540_v11 = vsel %vm3122_vm6, %v6385_v47, 0.0  ;;  %v6544_v31 = vsel %vm3122_vm6, %v6388_v15, 0.0 }
 0x2c0   : > { %v6506_v60 = vadd.f32 %v3439_v50, %v3438_v17  ;;  %v3811_v50 = vrot.slane %v6439_v18, 4  ;;  %v3236_v61 = vmul.f32 %v2955_v45, %v2955_v45  ;;  %v6556_v47 = vsel %vm3122_vm6, %v6478_v4, 0.0 }
 0x2c1   : > { %v3623_v15 = vrot.slane %v6475_v13, 4 }
 0x2c2   : > { %v3360_v39 = vrot.slane %v3236_v61, 6 }
 0x2c3   : > { %v2541_v27 = vpop.permute.xlu0 %2540 }
 0x2c4   : > { %v2575_v16 = vpop.permute.xlu2 %2574  ;;  %v2654_v38 = vadd.f32 %v2541_v27, %v2375_v34 }
 0x2c5   : > { %v2856_v3 = vpop.permute.xlu1 %2855 }
 0x2c6   : > { %v2956_v23 = vadd.f32 %v2856_v3, %v2667_v7  ;;  %v6552_v7 = vsel %vm3122_vm6, %v6475_v13, 0.0 }
 0x2c8   : > { %v3081_v29 = vrot.slane %v2956_v23, 6  ;;  %v3237_v54 = vmul.f32 %v2956_v23, %v2956_v23 }
 0x2ca   : > { %v6511_v10 = vsel %vm3009_vm5, %v3081_v29, %v3083_v46  ;;  %v3082_v44 = vsel %vm3009_vm5, %v3080_v26, %v3081_v29  ;;  %v3226_v46 = vmul.f32 %v2945_v24, %v2945_v24  ;;  %v3361_v29 = vrot.slane %v3237_v54, 6 }
 0x2cb   : > { %v2830_v37 = vpop.permute.xlu0 %2829  ;;  %v3833_v36 = vrot.slane %v6511_v10, 4  ;;  %v3836_v5 = vsel %vm3473_vm7, %v6511_v10, %v3835_v25  ;;  %v3609_v3 = vrot.slane %v3082_v44, 4  ;;  %v3612_v45 = vsel %vm3473_vm7, %v3082_v44, %v3611_v51 }
 0x2cc   : > { %v2943_v27 = vadd.f32 %v2830_v37, %v2654_v38  ;;  %v6564_v37 = vsel %vm3122_vm6, %v6481_v14, 0.0  ;;  %v2671_v14 = vadd.f32 %v2575_v16, %v6248_v21  ;;  %v3063_v54 = vrot.slane %v2945_v24, 6 }
 0x2cd   : > { %v2543_v20 = vpop.permute.xlu1 %2542  ;;  %v6519_v63 = vsel %vm3473_vm7, %v3833_v36, %v6377_v28  ;;  %v2864_v42 = vpop.permute.xlu2 %2863  ;;  %v3238_v28 = vmul.f32 %v6487_v2, %v6487_v2  ;;  %v3343_v8 = vrot.slane %v3226_v46, 6  ;;  %v6579_v51 = vperm.slane %v3612_v45, %v5893_v30 }
 0x2ce   : > { %v2655_v12 = vadd.f32 %v2543_v20, %v6193_v35  ;;  %v3587_v35 = vrot.slane %v6436_v22, 4  ;;  %v3224_v56 = vmul.f32 %v2943_v27, %v2943_v27  ;;  %v3060_v38 = vrot.slane %v2943_v27, 6 }
 0x2cf   : > { %v3363_v36 = vrot.slane %v3238_v28, 6  ;;  %v2960_v20 = vadd.f32 %v2864_v42, %v2671_v14  ;;  %v6583_v2 = vsel %vm3122_vm6, %v3082_v44, 0.0  ;;  %v6593_v24 = vsel %vm3122_vm6, %v6511_v10, 0.0  ;;  %v2395_v44 = vld [vmem:[#allocation3 + $0x1e0] sm:$0xff] }
 0x2d0   : > { %v3340_v16 = vrot.slane %v3224_v56, 6  ;;  %v6600_v42 = vperm.slane %v6519_v63, %v5893_v30 }
 0x2d1   : > { %v3364_v61 = vsel %vm3009_vm5, %v3361_v29, %v3363_v36  ;;  %v3671_v36 = vrot.slane %v6579_v51, 4 }
 0x2d3   : > { %v2571_v32 = vpop.permute.xlu0 %2570 }
 0x2d5   : > { %v2832_v57 = vpop.permute.xlu1 %2831  ;;  %v6559_v23 = vpop.permute.xlu2 %2550 }
 0x2d6   : > { %v2944_v17 = vadd.f32 %v2832_v57, %v2655_v12  ;;  %v3610_v12 = vsel %vm3473_vm7, %v3609_v3, %v6374_v48  ;;  %v3362_v57 = vsel %vm3009_vm5, %v3360_v39, %v3361_v29  ;;  %v6589_v48 = vperm.slane %v3836_v5, %v5893_v30 }
 0x2d7   : > { %v6586_v21 = vperm.slane %v3610_v12, %v5893_v30  ;;  %v6596_v27 = vsel %vm3122_vm6, %v3362_v57, 0.0  ;;  %v6606_v5 = vsel %vm3122_vm6, %v3364_v61, 0.0  ;;  %v2669_v29 = vadd.f32 %v2571_v32, %v2395_v44 }
 0x2d8   : > { %v3225_v25 = vmul.f32 %v2944_v17, %v2944_v17  ;;  %v3061_v43 = vrot.slane %v2944_v17, 6  ;;  %v6610_v39 = vmul.f32 %v2960_v20, %v2960_v20  ;;  %v3883_v61 = vrot.slane %v6600_v42, 4 }
 0x2da   : > { %v3341_v28 = vrot.slane %v3225_v25, 6  ;;  %v3062_v34 = vsel %vm3009_vm5, %v3060_v38, %v3061_v43  ;;  %v3064_v3 = vsel %vm3009_vm5, %v3061_v43, %v3063_v54  ;;  %v3659_v38 = vrot.slane %v6586_v21, 4 }
 0x2db   : > { %v2860_v26 = vpop.permute.xlu0 %2859  ;;  %v3585_v10 = vrot.slane %v3062_v34, 4  ;;  %v3162_v45 = vsel %vm3122_vm6, %v3062_v34, 0.0  ;;  %v3588_v63 = vsel %vm3473_vm7, %v3062_v34, %v3587_v35  ;;  %v3809_v43 = vrot.slane %v3064_v3, 4 }
 0x2dc   : > { %v3342_v25 = vsel %vm3009_vm5, %v3340_v16, %v3341_v28  ;;  %v2958_v12 = vadd.f32 %v2860_v26, %v2669_v29  ;;  %v3812_v54 = vsel %vm3473_vm7, %v3064_v3, %v3811_v50  ;;  %v3088_v16 = vrot.slane %v2960_v20, 6 }
 0x2dd   : > { %v2573_v17 = vpop.permute.xlu1 %2572  ;;  %v6603_v46 = vpop.permute.xlu2 %3931  ;;  %v3441_v32 = vsel %vm3122_vm6, %v3342_v25, 0.0  ;;  %v3163_v44 = vadd.f32 %v3162_v45, %v6503_v53  ;;  %v3586_v35 = vsel %vm3473_vm7, %v3585_v10, %v6436_v22  ;;  %v6624_v34 = vperm.slane %v3588_v63, %v5893_v30 }
 0x2de   : > { %v2670_v57 = vadd.f32 %v2573_v17, %v6235_v19  ;;  %v3368_v29 = vrot.slane %v6610_v39, 6  ;;  %v3164_v25 = vsel %vm3122_vm6, %v3064_v3, 0.0  ;;  %v3344_v50 = vsel %vm3009_vm5, %v3341_v28, %v3343_v8 }
 0x2df   : > { %v3442_v19 = vadd.f32 %v3441_v32, %v6506_v60  ;;  %v3810_v20 = vsel %vm3473_vm7, %v3809_v43, %v6439_v18  ;;  %v6633_v53 = vperm.slane %v3812_v54, %v5893_v30  ;;  %v3085_v22 = vrot.slane %v2958_v12, 6 }
 0x2e0   : > { %v3239_v17 = vmul.f32 %v2958_v12, %v2958_v12  ;;  %v6636_v39 = vperm.slane %v3586_v35, %v5893_v30  ;;  %v6638_v3 = vadd.f32 %v3164_v25, %v3163_v44  ;;  %v3443_v8 = vsel %vm3122_vm6, %v3344_v50, 0.0  ;;  %v2379_v35 = vld [vmem:[#allocation3 + $0x160] sm:$0xff] }
 0x2e1   : > { %v2659_v60 = vadd.f32 %v6559_v23, %v6291_v55  ;;  %v3647_v18 = vrot.slane %v6624_v34, 4  ;;  %v6649_v32 = vadd.f32 %v3443_v8, %v3442_v19  ;;  %v3871_v25 = vrot.slane %v6633_v53, 4 }
 0x2e2   : > { %v3365_v23 = vrot.slane %v3239_v17, 6 }
 0x2e3   : > { %v2547_v14 = vpop.permute.xlu0 %2546 }
 0x2e4   : > { %v2657_v50 = vadd.f32 %v2547_v14, %v2379_v35 }
 0x2e5   : > { %v2862_v26 = vpop.permute.xlu1 %2861  ;;  %v2840_v63 = vpop.permute.xlu2 %2839 }
 0x2e6   : > { %v2959_v56 = vadd.f32 %v2862_v26, %v2670_v57  ;;  %v6654_v44 = vadd.f32 %v2840_v63, %v2659_v60 }
 0x2e8   : > { %v3086_v10 = vrot.slane %v2959_v56, 6  ;;  %v3240_v45 = vmul.f32 %v2959_v56, %v2959_v56  ;;  %v6647_v56 = vperm.slane %v3810_v20, %v5893_v30  ;;  %v3229_v14 = vmul.f32 %v6654_v44, %v6654_v44 }
 0x2ea   : > { %v3087_v28 = vsel %vm3009_vm5, %v3085_v22, %v3086_v10  ;;  %v3089_v43 = vsel %vm3009_vm5, %v3086_v10, %v3088_v16  ;;  %v3366_v12 = vrot.slane %v3240_v45, 6  ;;  %v3635_v16 = vrot.slane %v6636_v39, 4 }
 0x2eb   : > { %v3621_v54 = vrot.slane %v3087_v28, 4  ;;  %v3624_v57 = vsel %vm3473_vm7, %v3087_v28, %v3623_v15  ;;  %v2836_v55 = vpop.permute.xlu0 %2835  ;;  %v3845_v20 = vrot.slane %v3089_v43, 4  ;;  %v6999_v22 = vrot.slane %v6478_v4, 4 }
 0x2ec   : > { %v3632_v26 = vperm.slane %v3624_v57, %v5893_v30  ;;  %v3367_v45 = vsel %vm3009_vm5, %v3365_v23, %v3366_v12  ;;  %v6668_v60 = vsel %vm3122_vm6, %v3087_v28, 0.0  ;;  %v6674_v57 = vsel %vm3122_vm6, %v3089_v43, 0.0 }
 0x2ed   : > { %v3622_v19 = vsel %vm3473_vm7, %v3621_v54, %v6475_v13  ;;  %v3848_v15 = vsel %vm3473_vm7, %v3089_v43, %v6999_v22  ;;  %v2549_v10 = vpop.permute.xlu1 %2548  ;;  %v2946_v13 = vadd.f32 %v2836_v55, %v2657_v50  ;;  %v6683_v28 = vsel %vm3122_vm6, %v3367_v45, 0.0 }
 0x2ee   : > { %v3669_v17 = vrot.slane %v3632_v26, 4  ;;  %v3856_v63 = vperm.slane %v3848_v15, %v5893_v30  ;;  %v3672_v54 = vsel %vm3473_vm7, %v3632_v26, %v3671_v36  ;;  %v3628_v22 = vperm.slane %v3622_v19, %v5893_v30 }
 0x2ef   : > { %v6680_v15 = vsel %vm3009_vm5, %v3366_v12, %v3368_v29  ;;  %v3846_v55 = vsel %vm3473_vm7, %v3845_v20, %v6478_v4  ;;  %v6688_v36 = vperm.slane %v3672_v54, %v6304_v0  ;;  %v3068_v43 = vrot.slane %v6654_v44, 6 }
 0x2f0   : > { %v3893_v35 = vrot.slane %v3856_v63, 4  ;;  %v3670_v23 = vsel %vm3473_vm7, %v3669_v17, %v6579_v51  ;;  %v3348_v26 = vrot.slane %v3229_v14, 6  ;;  %v2658_v50 = vadd.f32 %v2549_v10, %v6258_v52 }
 0x2f1   : > { %v3660_v51 = vsel %vm3473_vm7, %v3628_v22, %v3659_v38  ;;  %v3065_v29 = vrot.slane %v2946_v13, 6  ;;  %v3227_v12 = vmul.f32 %v2946_v13, %v2946_v13  ;;  %v6696_v45 = vperm.slane %v3670_v23, %v6304_v0 }
 0x2f2   : > { %v3657_v17 = vrot.slane %v3628_v22, 4  ;;  %v6699_v4 = vperm.slane %v3660_v51, %v6304_v0  ;;  %v3894_v44 = vsel %vm3473_vm7, %v3893_v35, %v6589_v48  ;;  %v7000_v52 = vrot.slane %v6589_v48, 4 }
 0x2f3   : > { %v3924_v19 = vpop.permute.xlu0 %3923  ;;  %v3852_v38 = vperm.slane %v3846_v55, %v5893_v30  ;;  %v3693_v13 = vrot.slane %v6688_v36, 4  ;;  %v6713_v23 = vperm.slane %v3894_v44, %v6304_v0  ;;  %v3345_v35 = vrot.slane %v3227_v12, 6 }
 0x2f4   : > { %v3896_v20 = vsel %vm3473_vm7, %v3856_v63, %v7000_v52  ;;  %v4033_v10 = vsel %vm3122_vm6, %v6525_v40, %v3924_v19  ;;  %v3658_v54 = vsel %vm3473_vm7, %v3657_v17, %v6586_v21  ;;  %v3689_v55 = vrot.slane %v6696_v45, 4 }
 0x2f5   : > { %v2838_v14 = vpop.permute.xlu1 %2837  ;;  %v6716_v48 = vperm.slane %v3658_v54, %v6304_v0  ;;  %v6719_v63 = vperm.slane %v3896_v20, %v6304_v0  ;;  %v3884_v40 = vsel %vm3473_vm7, %v3852_v38, %v3883_v61  ;;  %v3881_v51 = vrot.slane %v3852_v38, 4 }
 0x2f6   : > { %v2947_v22 = vadd.f32 %v2838_v14, %v2658_v50  ;;  %v6726_v21 = vperm.slane %v3884_v40, %v6304_v0  ;;  %v4035_v17 = vsel %vm607_vm1, %v4033_v10, %v6603_v46  ;;  %v7001_v52 = vrot.slane %v6491_v59, 4 }
 0x2f7   : > { %v3917_v61 = vrot.slane %v6719_v63, 4  ;;  %v6736_v12 = vsel %vm3473_vm7, %v3881_v51, %v6600_v42  ;;  %v7002_v44 = vrot.slane %v6494_v6, 4 }
 0x2f8   : > { %v3066_v19 = vrot.slane %v2947_v22, 6  ;;  %v3228_v50 = vmul.f32 %v2947_v22, %v2947_v22 }
 0x2fa   : > { %v3067_v14 = vsel %vm3009_vm5, %v3065_v29, %v3066_v19  ;;  %v6740_v38 = vsel %vm3009_vm5, %v3066_v19, %v3068_v43  ;;  %v3346_v54 = vrot.slane %v3228_v50, 6 }
 0x2fb   : > { %v3166_v10 = vsel %vm3122_vm6, %v3067_v14, 0.0  ;;  %v3168_v22 = vsel %vm3122_vm6, %v6740_v38, 0.0  ;;  %v3597_v40 = vrot.slane %v3067_v14, 4  ;;  %v3600_v8 = vsel %vm3473_vm7, %v3067_v14, %v7001_v52  ;;  %v3948_v19 = vpop.permute.xlu0 %3947 }
 0x2fc   : > { %v3167_v42 = vadd.f32 %v3166_v10, %v6638_v3  ;;  %v3347_v29 = vsel %vm3009_vm5, %v3345_v35, %v3346_v54  ;;  %v3349_v43 = vsel %vm3009_vm5, %v3346_v54, %v3348_v26  ;;  %v3608_v51 = vperm.slane %v3600_v8, %v5893_v30 }
 0x2fd   : > { %v3445_v50 = vsel %vm3122_vm6, %v3347_v29, 0.0  ;;  %v3447_v46 = vsel %vm3122_vm6, %v3349_v43, 0.0  ;;  %v3821_v20 = vrot.slane %v6740_v38, 4  ;;  %v3824_v52 = vsel %vm3473_vm7, %v6740_v38, %v7002_v44  ;;  %v3940_v3 = vpop.permute.xlu1 %3939  ;;  %v3956_v44 = vpop.permute.xlu2 %3955 }
 0x2fe   : > { %v3169_v14 = vadd.f32 %v3168_v22, %v3167_v42  ;;  %v3446_v35 = vadd.f32 %v3445_v50, %v6649_v32  ;;  %v3832_v26 = vperm.slane %v3824_v52, %v5893_v30  ;;  %v4037_v8 = vsel %vm873_vm2, %v4035_v17, %v3940_v3 }
 0x2ff   : > { %v4040_v54 = vsel %vm4039_vm8, %v4037_v8, %v3948_v19  ;;  %v3648_v10 = vsel %vm3473_vm7, %v3608_v51, %v3647_v18  ;;  %v3645_v29 = vrot.slane %v3608_v51, 4  ;;  %v3598_v43 = vsel %vm3473_vm7, %v3597_v40, %v6491_v59 }
 0x300   : > { %v3171_v38 = vadd.f32 %v6529_v1, %v3169_v14  ;;  %v3448_v22 = vadd.f32 %v3447_v46, %v3446_v35  ;;  %v6771_v32 = vperm.slane %v3648_v10, %v6304_v0  ;;  %v3604_v17 = vperm.slane %v3598_v43, %v5893_v30 }
 0x301   : > { %v3646_v42 = vsel %vm3473_vm7, %v3645_v29, %v6624_v34  ;;  %v4043_v19 = vsel %vm4042_vm9, %v4040_v54, %v3956_v44  ;;  %v3869_v18 = vrot.slane %v3832_v26, 4  ;;  %v3872_v51 = vsel %vm3473_vm7, %v3832_v26, %v3871_v25 }
 0x302   : > { %v3173_v59 = vadd.f32 %v6533_v41, %v3171_v38  ;;  %v3450_v1 = vadd.f32 %v6540_v11, %v3448_v22  ;;  %v3694_v46 = vsel %vm3473_vm7, %v3693_v13, %v6771_v32  ;;  %v3652_v40 = vperm.slane %v3646_v42, %v6304_v0 }
 0x303   : > { %3965 = vrot.lane.b32.xlu2 %v3694_v46, %s5167_s26  ;;  %v3636_v34 = vsel %vm3473_vm7, %v3604_v17, %v3635_v16  ;;  %v3633_v50 = vrot.slane %v3604_v17, 4  ;;  %v3870_v25 = vsel %vm3473_vm7, %v3869_v18, %v6633_v53  ;;  %v3880_v41 = vperm.slane %v3872_v51, %v6304_v0 }
 0x304   : > { %v3175_v11 = vadd.f32 %v6552_v7, %v3173_v59  ;;  %v3452_v52 = vadd.f32 %v6544_v31, %v3450_v1  ;;  %v3690_v13 = vsel %vm3473_vm7, %v3689_v55, %v3652_v40  ;;  %v3644_v3 = vperm.slane %v3636_v34, %v6304_v0  ;;  %v3972_v31 = vpop.permute.xlu0 %3971 }
 0x305   : > { %3949 = vrot.lane.b32.xlu1 %v3690_v13, %s5172_s24  ;;  %v3964_v14 = vpop.permute.xlu1 %3963  ;;  %v3691_v35 = vrot.slane %v3652_v40, 4  ;;  %v3634_v16 = vsel %vm3473_vm7, %v3633_v50, %v6636_v39  ;;  %v3876_v26 = vperm.slane %v3870_v25, %v6304_v0  ;;  %v3918_v53 = vsel %vm3473_vm7, %v3917_v61, %v3880_v41 }
 0x306   : > { %v3177_v8 = vadd.f32 %v6556_v47, %v3175_v11  ;;  %v3454_v7 = vadd.f32 %v6564_v37, %v3452_v52  ;;  %v7003_v55 = vrot.slane %v6699_v4, 4  ;;  %v4046_v10 = vsel %vm4045_vm10, %v4043_v19, %v3964_v14 }
 0x307   : > { %v4049_v29 = vsel %vm4048_vm11, %v4046_v10, %v3972_v31  ;;  %v3687_v39 = vrot.slane %v3644_v3, 4  ;;  %v3692_v43 = vsel %vm3473_vm7, %v6696_v45, %v3691_v35  ;;  %v3640_v61 = vperm.slane %v3634_v16, %v6304_v0 }
 0x308   : > { %v3686_v54 = vsel %vm3473_vm7, %v7003_v55, %v3644_v3  ;;  %v3179_v47 = vadd.f32 %v6583_v2, %v3177_v8  ;;  %v3456_v37 = vadd.f32 %v6568_v9, %v3454_v7  ;;  %4065 = vst [vmem:[%s6815_s11] sm:$0xff] %v4049_v29  ;;  %v7004_v44 = vrot.slane %v6713_v23, 4 }
 0x309   : > { %3933 = vrot.lane.b32.xlu0 %v3686_v54, %s5171_s5  ;;  %v3822_v22 = vsel %vm3473_vm7, %v3821_v20, %v6494_v6  ;;  %v3688_v45 = vsel %vm3473_vm7, %v6699_v4, %v3687_v39  ;;  %v3683_v17 = vrot.slane %v3640_v61, 4  ;;  %v3888_v2 = vperm.slane %v6736_v12, %v6304_v0 }
 0x30a   : > { %v3914_v38 = vsel %vm3473_vm7, %v7004_v44, %v3876_v26  ;;  %v3828_v42 = vperm.slane %v3822_v22, %v5893_v30  ;;  %v3181_v9 = vadd.f32 %v6593_v24, %v3179_v47  ;;  %v3458_v19 = vadd.f32 %v6596_v27, %v3456_v37 }
 0x30b   : > { %v3915_v18 = vrot.slane %v3876_v26, 4  ;;  %v3919_v51 = vrot.slane %v3880_v41, 4  ;;  %3941 = vrot.lane.b32.xlu2 %v3688_v45, %s5173_s27  ;;  %v3684_v6 = vsel %vm3473_vm7, %v6716_v48, %v3683_v17  ;;  %v7005_v20 = vrot.slane %v6647_v56, 4 }
 0x30c   : > { %v3857_v59 = vrot.slane %v3828_v42, 4  ;;  %v3695_v30 = vrot.slane %v6771_v32, 4  ;;  %v3460_v12 = vadd.f32 %v6606_v5, %v3458_v19  ;;  %v7006_v5 = vrot.slane %v6716_v48, 4 }
 0x30d   : > { %v3860_v4 = vsel %vm3473_vm7, %v3828_v42, %v7005_v20  ;;  %v3916_v27 = vsel %vm3473_vm7, %v6713_v23, %v3915_v18  ;;  %v6843_v1 = vsel %vm3473_vm7, %v6719_v63, %v3919_v51  ;;  %3925 = vrot.lane.b32.xlu1 %v3684_v6, %s5170_s30  ;;  %v3183_v23 = vadd.f32 %v6668_v60, %v3181_v9 }
 0x30e   : > { %v3868_v24 = vperm.slane %v3860_v4, %v6304_v0  ;;  %v3858_v46 = vsel %vm3473_vm7, %v3857_v59, %v6647_v56  ;;  %v6850_v40 = vsel %vm3473_vm7, %v6688_v36, %v3695_v30  ;;  %v6855_v32 = vsel %vm3473_vm7, %v7006_v5, %v3640_v61 }
 0x30f   : > { %v3462_v34 = vadd.f32 %v6683_v28, %v3460_v12  ;;  %v7007_v63 = vrot.slane %v6726_v21, 4  ;;  %v3864_v25 = vperm.slane %v3858_v46, %v6304_v0  ;;  %v3905_v56 = vrot.slane %v3888_v2, 4 }
 0x310   : > { %v3463_v36 = vsel %vm3122_vm6, %v6680_v15, 0.0  ;;  %v3911_v48 = vrot.slane %v3868_v24, 4  ;;  %v3185_v41 = vadd.f32 %v6674_v57, %v3183_v23 }
 0x311   : > { %v3910_v50 = vsel %vm3473_vm7, %v7007_v63, %v3868_v24  ;;  %3957 = vrot.lane.b32.xlu0 %v3692_v43, %s5174_s28  ;;  %v3907_v11 = vrot.slane %v3864_v25, 4  ;;  %v6868_v60 = vsel %vm3473_vm7, %v3905_v56, %v3864_v25  ;;  %v3464_v28 = vadd.f32 %v3463_v36, %v3462_v34 }
 0x312   : > { %v3912_v52 = vsel %vm3473_vm7, %v6726_v21, %v3911_v48  ;;  %v3186_v13 = vrot.slane %v3185_v41, 4 }
 0x313   : > { %v3908_v0 = vsel %vm3473_vm7, %v3888_v2, %v3907_v11  ;;  %v3465_v3 = vrot.slane %v3464_v28, 4  ;;  %4005 = vrot.lane.b32.xlu2 %v3914_v38, %s5172_s24  ;;  %s5044_s24 = sshra.s32 %s4109_s7, 4  ;;  %s5045_s24 = int_to_ptr.hbm [resolvable:$true] %s5044_s24 }
 0x314   : > { %v3187_v15 = vadd.f32 %v3186_v13, %v3185_v41  ;;  %s5046_s6 = scalar_lea.hbm %s5045_s24, 1  ;;  %p5051_p11 = scmp.lt.s32.totalorder %s5045_s24, %s6991_s3 }
 0x315   : > { %v3466_v14 = vadd.f32 %v3465_v3, %v3464_v28  ;;  %3989 = vrot.lane.b32.xlu1 %v3910_v50, %s5171_s5  ;;  %s6886_s5 = scalar_lea.sflag [#allocation11], %s4074_s13  ;;  %p5047_p1 = scmp.ne.s32.totalorder %s5045_s24, %s5046_s6 }
 0x316   : > { %v3188_v57 = vrot.slane %v3187_v15, 2 }
 0x317   : > { %v3467_v35 = vrot.slane %v3466_v14, 2  ;;  %p5048_p4 = pnand %p5047_p1, %p5272_p3 }
 0x318   : > { %v3189_v16 = vadd.f32 %v3188_v57, %v3187_v15 }
 0x319   : > { %4021 = vrot.lane.b32.xlu0 %v3918_v53, %s5167_s26  ;;  %v3468_v26 = vadd.f32 %v3467_v35, %v3466_v14  ;;  %s250_s26 = scalar_lea.vmem [#allocation12], %s5302_s10  ;;  %p5049_p8 = pneg %p5048_p4 }
 0x31a   : > { %v3190_v21 = vrot.slane %v3189_v16, 1 }
 0x31b   : > { %v3469_v8 = vrot.slane %v3468_v26, 1  ;;  %3981 = vrot.lane.b32.xlu2 %v3908_v0, %s5170_s30 }
 0x31c   : > { %v3191_v7 = vadd.f32 %v3190_v21, %v3189_v16 }
 0x31d   : > { %v3470_v31 = vadd.f32 %v3469_v8, %v3468_v26  ;;  %4013 = vrot.lane.b32.xlu1 %v3916_v27, %s5174_s28  ;;  %s5050_s28 = scalar_lea.hbm %s6991_s3, 2 }
 0x31e   : > { %3193 = vst.msk [vmem:[%s244_s25] sm:$0x1] %vm3192_vm12, %v3191_v7  ;;  %p5052_p9 = scmp.lt.s32.totalorder %s5050_s28, %s5046_s6 }
 0x31f   : > { %3471 = vst.msk [vmem:[%s250_s26] sm:$0x1] %vm3192_vm12, %v3470_v31 }
 0x320   : > { %p5053_p2 = por %p5052_p9, %p5051_p11 }
 0x321   : > { %3997 = vrot.lane.b32.xlu0 %v3912_v52, %s5173_s27 }
 0x322   : > { %p5054_p10 = pnand %p5053_p2, %p5049_p8 }
 0x324   : > { %5057 = shalt.err (!%p5054_p10)
}
 0x325   : > { %4892 = dma.vmem_to_hbm [thread:$0]  (%p5272_p3), %s4107_s20, 16, %s4109_s7, %s6886_s5   ;;  %v3807_v53 = vrot.slane %v6466_v62, 4  ;;  %3973 = vrot.lane.b32.xlu1 %v6850_v40, %s5166_s21 }
 0x326   : > { %s4117_s12 = scalar_lea.hbm %s6992_s4, %s5222_s19  ;;  %s4119_s24 = sshll.u32 %s250_s26, 4  ;;  %s4120_s24 = int_to_ptr.vmem [resolvable:$true] %s4119_s24 }
 0x327   : > { %v3808_v55 = vsel %vm3473_vm7, %v6453_v33, %v3807_v53  ;;  %s4121_s6 = sshll.u32 %s4117_s12, 4  ;;  %s5078_s25 = scalar_lea.hbm %s6992_s4, 2  ;;  %s4122_s6 = int_to_ptr.hbm [resolvable:$true] %s4121_s6 }
 0x328   : > { %4027 = vrot.lane.b32.xlu2 %v3808_v55, %s5166_s21  ;;  %s5072_s14 = sshra.s32 %s4122_s6, 4  ;;  %s5073_s14 = int_to_ptr.hbm [resolvable:$true] %s5072_s14 }
 0x329   : > { %s5074_s20 = scalar_lea.hbm %s5073_s14, 1  ;;  %p5079_p5 = scmp.lt.s32.totalorder %s5073_s14, %s6992_s4 }
 0x32a   : > { %p5075_p12 = scmp.ne.s32.totalorder %s5073_s14, %s5074_s20  ;;  %p5080_p7 = scmp.lt.s32.totalorder %s5078_s25, %s5074_s20 }
 0x32c   : > { %p5076_p13 = pnand %p5075_p12, %p5272_p3  ;;  %p5081_p1 = por %p5080_p7, %p5079_p5 }
 0x32e   : > { %p5077_p0 = pneg %p5076_p13 }
 0x330   : > { %p5082_p4 = pnand %p5081_p1, %p5077_p0 }
 0x332   : > { %5085 = shalt.err (!%p5082_p4)
}
 0x333   : > { %4893 = dma.vmem_to_hbm [thread:$0]  (%p5272_p3), %s4120_s24, 16, %s4122_s6, %s6886_s5   ;;  %4029 = vrot.lane.b32.xlu0 %v6843_v1, %s5166_s21  ;;  %v3996_v33 = vpop.permute.xlu2 %3995  ;;  %v4012_v10 = vpop.permute.xlu0 %4011  ;;  %v3793_v43 = vrot.slane %v6423_v58, 4 }
 0x334   : > { %v3980_v29 = vpop.permute.xlu1 %3979  ;;  %s4878_s21 = sshll.u32 %s5222_s19, 5  ;;  %s4090_s12 = sshll.u32 %s6815_s11, 4  ;;  %s4091_s12 = int_to_ptr.vmem [resolvable:$true] %s4090_s12 }
 0x335   : > { %v3794_v37 = vsel %vm3473_vm7, %v3793_v43, %v6408_v49  ;;  %s4089_s13 = scalar_lea.hbm %s6990_s2, %s4878_s21  ;;  %s4070_s24 = scalar_lea.sflag [#allocation6], %s5302_s10 }
 0x336   : > { %v4051_v38 = vsel %vm3122_vm6, %v3794_v37, %v3980_v29  ;;  %s4092_s19 = sshll.u32 %s4089_s13, 4  ;;  %s5106_s28 = scalar_lea.hbm %s6990_s2, 64  ;;  %s4093_s19 = int_to_ptr.hbm [resolvable:$true] %s4092_s19 }
 0x337   : > { %s5100_s6 = sshra.s32 %s4093_s19, 4  ;;  %s5101_s6 = int_to_ptr.hbm [resolvable:$true] %s5100_s6 }
 0x338   : > { %s5102_s14 = scalar_lea.hbm %s5101_s6, 32  ;;  %p5107_p2 = scmp.lt.s32.totalorder %s5101_s6, %s6990_s2 }
 0x339   : > { %p5103_p8 = scmp.ne.s32.totalorder %s5101_s6, %s5102_s14  ;;  %p5108_p10 = scmp.lt.s32.totalorder %s5106_s28, %s5102_s14 }
 0x33b   : > { %v4020_v62 = vpop.permute.xlu2 %4019  ;;  %v3988_v47 = vpop.permute.xlu0 %3987  ;;  %p5104_p11 = pnand %p5103_p8, %p5272_p3  ;;  %p5109_p12 = por %p5108_p10, %p5107_p2 }
 0x33c   : > { %v4004_v44 = vpop.permute.xlu1 %4003  ;;  %v4053_v22 = vsel %vm607_vm1, %v4051_v38, %v3988_v47 }
 0x33d   : > { %v4055_v45 = vsel %vm873_vm2, %v4053_v22, %v3996_v33  ;;  %p5105_p9 = pneg %p5104_p11 }
 0x33e   : > { %v4057_v42 = vsel %vm4039_vm8, %v4055_v45, %v4004_v44 }
 0x33f   : > { %v4059_v58 = vsel %vm4042_vm9, %v4057_v42, %v4012_v10  ;;  %p5110_p13 = pnand %p5109_p12, %p5105_p9 }
 0x340   : > { %v4061_v19 = vsel %vm4045_vm10, %v4059_v58, %v4020_v62 }
 0x35d   : > { %v3966_v54 = vpop.permute.xlu2 %3965 }
 0x365   : > { %v3942_v39 = vpop.permute.xlu2 %3941 }
 0x36d   : > { %v4006_v61 = vpop.permute.xlu2 %4005 }
 0x375   : > { %v3982_v17 = vpop.permute.xlu2 %3981 }
 0x376   : > { %v4052_v27 = vsel %vm3122_vm6, %v6868_v60, %v3982_v17 }
 0x377   : > { %v3950_v2 = vpop.permute.xlu1 %3949 }
 0x37b   : > { %v3934_v9 = vpop.permute.xlu0 %3933 }
 0x37f   : > { %v3926_v51 = vpop.permute.xlu1 %3925 }
 0x380   : > { %v4034_v4 = vsel %vm3122_vm6, %v6855_v32, %v3926_v51 }
 0x381   : > { %v4036_v30 = vsel %vm607_vm1, %v4034_v4, %v3934_v9 }
 0x382   : > { %v4028_v18 = vpop.permute.xlu2 %4027  ;;  %v4038_v12 = vsel %vm873_vm2, %v4036_v30, %v3942_v39 }
 0x383   : > { %v4063_v49 = vsel %vm4048_vm11, %v4061_v19, %v4028_v18  ;;  %v3958_v6 = vpop.permute.xlu0 %3957  ;;  %v4041_v40 = vsel %vm4039_vm8, %v4038_v12, %v3950_v2 }
 0x384   : > { %4066 = vst [vmem:[%s6815_s11 + $0x8] sm:$0xff] %v4063_v49  ;;  %v4044_v23 = vsel %vm4042_vm9, %v4041_v40, %v3958_v6 }
 0x385   : > { %v4047_v50 = vsel %vm4045_vm10, %v4044_v23, %v3966_v54 }
 0x387   : > { %v3990_v20 = vpop.permute.xlu1 %3989 }
 0x388   : > { %v4054_v1 = vsel %vm607_vm1, %v4052_v27, %v3990_v20 }
 0x38b   : > { %v4022_v59 = vpop.permute.xlu0 %4021 }
 0x38f   : > { %v4014_v24 = vpop.permute.xlu1 %4013 }
 0x393   : > { %v3998_v46 = vpop.permute.xlu0 %3997 }
 0x394   : > { %v4056_v5 = vsel %vm873_vm2, %v4054_v1, %v3998_v46 }
 0x395   : > { %v4058_v32 = vsel %vm4039_vm8, %v4056_v5, %v4006_v61 }
 0x396   : > { %v4060_v34 = vsel %vm4042_vm9, %v4058_v32, %v4014_v24 }
 0x397   : > { %v3974_v63 = vpop.permute.xlu1 %3973  ;;  %v4062_v36 = vsel %vm4045_vm10, %v4060_v34, %v4022_v59 }
 0x398   : > { %v4050_v25 = vsel %vm4048_vm11, %v4047_v50, %v3974_v63 }
 0x399   : > { %4067 = vst [vmem:[%s6815_s11 + $0x10] sm:$0xff] %v4050_v25 }
 0x3a5   : > { %v4030_v56 = vpop.permute.xlu0 %4029 }
 0x3a6   : > { %v4064_v48 = vsel %vm4048_vm11, %v4062_v36, %v4030_v56 }
 0x3a7   : > { %4068 = vst [vmem:[%s6815_s11 + $0x18] sm:$0xff] %v4064_v48 }
 0x3a8   : > { %5113 = shalt.err (!%p5110_p13)
}
 0x3a9   : > { %s5175_s10 = smov 256  }
 0x3aa   : > { %4891 = dma.vmem_to_hbm [thread:$0]  (%p5272_p3), %s4091_s12, 512, %s4093_s19, %s4070_s24, %s5175_s10, %s5175_s10, %s5170_s30  }
 0x3ab PF: > { %s4133_s11 = sand.u32 1, %s5148_s15   ;;  %p7008_p0 = scmp.ge.s32.totalorder %s5160_s18, 2 }
 0x3ac   : > { %s4134_s23 = scalar_lea.sflag [#allocation6], %s4133_s11 }
 0x3ad   : > { %p4906_p5 = pnand %p7008_p0, %p5238_p6 }
 0x3af   : > { %p4907_p7 = pneg %p4906_p5 }
 0x3b1   : > { %5139 = dma.done.wait (%p4907_p7), %s4134_s23, 512  }
 0x3b2   : > { %5141 = vsyncadd (%p4907_p7), %s4134_s23, 4294966784  ;;  %s7009_s21 = sadd.s32 4294967294, %s5160_s18  }
 0x3b3   : > { %s4143_s5 = sand.u32 1, %s7009_s21  }
 0x3b4   : > { %s4144_s27 = scalar_lea.sflag [#allocation11], %s4143_s5 }
 0x3b5   : > { %5143 = dma.done.wait (%p4907_p7), %s4144_s27, 32  }
 0x3b6   : > { %5145 = vsyncadd (%p4907_p7), %s4144_s27, 4294967264  ;;  %p22_p3 = scmp.ge.s32.totalorder %s5256_s29, 4   ;;  %s7010_s15 = smov %s5152_s16 }
 0x3b7   : > { %s7011_s16 = smov %s5156_s17  ;;  %s7012_s17 = smov %s5268_s8 }
 0x3b8   : > { %s7013_s18 = smov %s5256_s29  ;;  %24 = sbr.rel (!%p22_p3) target bundleno = 8 (0x8), region = 114 }
 0x3bd   :  { %4158 = vsyncpa [#allocation5], 1 }
 0x3be   :  { %4160 = vsyncpa [#allocation5 + $0x1], 1 }
 0x3bf   :  { %4161 = vsyncpa [#allocation8], 1 }
 0x3c0   :  { %4162 = vsyncpa [#allocation6], 1 }
 0x3c1   :  { %4164 = vsyncpa [#allocation6 + $0x1], 1 }
 0x3c2   :  { %4165 = vsyncpa [#allocation11], 1 }
 0x3c3   :  { %4167 = vsyncpa [#allocation11 + $0x1], 1 }

</bundles_post_ra>
